<compile_context>
chip_gen: v6e
topology: v6e:2x2x1
jax: 0.10.0
libtpu: 0.0.40
codegen_flags: <defaults>
</compile_context>

<pallas_src>
import functools

import jax
import jax.numpy as jnp
from jax.experimental import pallas as pl
from jax.experimental.pallas import tpu as pltpu

BN_EPS = 1e-5
LANE = 128
BLOCK_N = 1024  # image-feature tile width; 2048 also fits v6e/v7x scoped VMEM


# ----------------------------------------------------------------------------
# Single fused kernel:
#   step 0      : text linear -> (text @ W1_txt) + folded biases
#   every step  : image-linear tile -> (img_tile @ W1_img_tile), accumulated
#   last step   : ReLU -> Dropout(id) -> folded-BN -> fc2 (128-lane padded)
# ----------------------------------------------------------------------------
def _fused_multimodal_kernel(
    pooled_ref, img_ref, txt_w_ref, img_w_ref,
    w1t_ref, w1i_ref, b1_ref, bn_scale_ref, bn_shift_ref, w2_ref, b2_ref,
    o_ref, h_acc,
):
    j = pl.program_id(0)

    # ---- step 0: text encoder + its fc1 contribution + all folded biases --
    @pl.when(j == 0)
    def _():
        text = jnp.dot(pooled_ref[...], txt_w_ref[...],
                       preferred_element_type=jnp.float32)
        h_acc[...] = (
            jnp.dot(text.astype(jnp.bfloat16), w1t_ref[...],
                    preferred_element_type=jnp.float32)
            + b1_ref[...]
        )

    # ---- every step: one image-feature tile chained into the fc1 accumulator
    img_feat = jnp.dot(img_ref[...], img_w_ref[...],
                       preferred_element_type=jnp.float32)
    h_acc[...] += jnp.dot(img_feat.astype(jnp.bfloat16), w1i_ref[...],
                          preferred_element_type=jnp.float32)

    # ---- last step: ReLU -> Dropout(id, eval) -> BN(eval, folded) -> fc2 --
    @pl.when(j == pl.num_programs(0) - 1)
    def _():
        h = jnp.maximum(h_acc[...], 0.0)                       # ReLU (f32)
        h = h * bn_scale_ref[...] + bn_shift_ref[...]          # folded BN
        o_ref[...] = (
            jnp.dot(h.astype(jnp.bfloat16), w2_ref[...],
                    preferred_element_type=jnp.float32)
            + b2_ref[...]
        )


def pallas_multimodal(pooled, img_flat, txt_w, img_w_tiled,
                      w1t, w1i, b1_fold, bn_scale, bn_shift, w2p, b2p):
    """Fused forward.  pooled:(Bp,E) bf16, img_flat:(Bp,Kimg) bf16,
    img_w_tiled:(nt,Kimg,block_n) bf16 (HBM-contiguous tiles)."""
    Bp, E = pooled.shape
    _, Kimg = img_flat.shape
    Ntxt = txt_w.shape[1]
    nt, _, block_n = img_w_tiled.shape
    H = w1t.shape[1]
    Cp = w2p.shape[1]

    grid_spec = pltpu.PrefetchScalarGridSpec(
        num_scalar_prefetch=0,
        grid=(nt,),
        in_specs=[
            pl.BlockSpec((Bp, E), lambda j: (0, 0)),             # pooled (bf16)
            pl.BlockSpec((Bp, Kimg), lambda j: (0, 0)),          # img_flat (bf16)
            pl.BlockSpec((E, Ntxt), lambda j: (0, 0)),           # txt_w (bf16)
            pl.BlockSpec((pl.Squeezed(), Kimg, block_n),
                         lambda j: (j, 0, 0)),                   # img_w tile (bf16, contiguous)
            pl.BlockSpec((Ntxt, H), lambda j: (0, 0)),           # fc1_w text rows (bf16)
            pl.BlockSpec((block_n, H), lambda j: (j, 0)),        # fc1_w image rows (bf16)
            pl.BlockSpec((1, H), lambda j: (0, 0)),              # folded fc1 bias (f32)
            pl.BlockSpec((1, H), lambda j: (0, 0)),              # bn scale
            pl.BlockSpec((1, H), lambda j: (0, 0)),              # bn shift
            pl.BlockSpec((H, Cp), lambda j: (0, 0)),             # fc2_w (bf16, padded)
            pl.BlockSpec((1, Cp), lambda j: (0, 0)),             # fc2_b (padded)
        ],
        out_specs=pl.BlockSpec((Bp, Cp), lambda j: (0, 0)),
        scratch_shapes=[pltpu.VMEM((Bp, H), jnp.float32)],       # fc1 accumulator
    )
    return pl.pallas_call(
        _fused_multimodal_kernel,
        out_shape=jax.ShapeDtypeStruct((Bp, Cp), jnp.float32),
        grid_spec=grid_spec,
        # Single grid axis is a chained reduction into h_acc -> "arbitrary".
        compiler_params=pltpu.CompilerParams(
            dimension_semantics=("arbitrary",)),
    )(pooled, img_flat, txt_w, img_w_tiled,
      w1t, w1i, b1_fold, bn_scale, bn_shift, w2p, b2p)


# ----------------------------------------------------------------------------
# One-time weight layout transforms / constant folding (run OUTSIDE jit).
# ----------------------------------------------------------------------------
def prepare_params(params, *, block_n=BLOCK_N):
    Kimg, Nimg = params["img_w"].shape
    C = params["fc2_w"].shape[1]
    assert Nimg % block_n == 0, (Nimg, block_n)
    nt = Nimg // block_n

    # Contiguous image-weight tiles: tile j == img_w[:, j*block_n:(j+1)*block_n].
    img_w_tiled = jnp.transpose(
        params["img_w"].reshape(Kimg, nt, block_n), (1, 0, 2)
    ).astype(jnp.bfloat16)

    # Fold BatchNorm1d (eval: running stats) into scale/shift.
    bn_scale = params["bn_gamma"] * jax.lax.rsqrt(params["bn_var"] + BN_EPS)
    bn_shift = params["bn_beta"] - params["bn_mean"] * bn_scale

    # Fold encoder biases through fc1 (exact in f32):
    #   b1' = fc1_b + txt_b @ W1_txt + img_b @ W1_img
    b1_fold = (
        params["fc1_b"]
        + params["txt_b"] @ params["fc1_w_txt"].astype(jnp.float32)
        + params["img_b"] @ params["fc1_w_img"].astype(jnp.float32)
    )

    # Lane-pad fc2 to 128-wide output and store weights in bf16.
    Cp = max(LANE, ((C + LANE - 1) // LANE) * LANE)
    w2p = jnp.pad(params["fc2_w"], ((0, 0), (0, Cp - C))).astype(jnp.bfloat16)
    b2p = jnp.pad(params["fc2_b"], ((0, 0), (0, Cp - C)))

    return {
        "embed": params["embed"],
        "txt_w": params["txt_w"].astype(jnp.bfloat16),
        "img_w_tiled": img_w_tiled,
        "w1t": params["fc1_w_txt"].astype(jnp.bfloat16),
        "w1i": params["fc1_w_img"].astype(jnp.bfloat16),
        "b1_fold": b1_fold,
        "bn_scale": bn_scale,
        "bn_shift": bn_shift,
        "w2p": w2p,
        "b2p": b2p,
    }


# ----------------------------------------------------------------------------
# Full model forward (glue in XLA, hot path in one Pallas kernel)
# ----------------------------------------------------------------------------
def multimodal_forward(prepped, input_ids, attention_mask, image, *, num_classes):
    # ---- text-encoder glue: embedding gather + masked mean pool (XLA) -----
    emb = prepped["embed"][input_ids]                        # (B, S, E)
    mask = attention_mask.astype(jnp.float32)[..., None]     # (B, S, 1)
    denom = jnp.maximum(mask.sum(axis=1), 1.0)               # (B, 1)
    pooled = ((emb * mask).sum(axis=1) / denom).astype(jnp.bfloat16)

    # ---- image-encoder glue: flatten NCHW row-major ------------------------
    B = image.shape[0]
    img_flat = image.reshape(B, -1).astype(jnp.bfloat16)     # (B, C*H*W)

    # ---- pad batch to a sublane multiple (MXU-friendly) ---------------------
    Bp = max(8, ((B + 7) // 8) * 8)
    if Bp != B:
        pooled = jnp.pad(pooled, ((0, Bp - B), (0, 0)))
        img_flat = jnp.pad(img_flat, ((0, Bp - B), (0, 0)))

    out_pad = pallas_multimodal(
        pooled, img_flat,
        prepped["txt_w"], prepped["img_w_tiled"],
        prepped["w1t"], prepped["w1i"], prepped["b1_fold"],
        prepped["bn_scale"], prepped["bn_shift"],
        prepped["w2p"], prepped["b2p"],
    )
    return out_pad[:B, :num_classes]


# ----------------------------------------------------------------------------
# Pure-JAX reference for verification (concat-based, unfolded BN / biases)
# ----------------------------------------------------------------------------
def reference_forward(params, input_ids, attention_mask, image):
    emb = params["embed"][input_ids]
    mask = attention_mask.astype(jnp.float32)[..., None]
    denom = jnp.maximum(mask.sum(axis=1), 1.0)
    pooled = (emb * mask).sum(axis=1) / denom
    text = pooled @ params["txt_w"].astype(jnp.float32) + params["txt_b"]
    img_flat = image.reshape(image.shape[0], -1)
    imgf = img_flat @ params["img_w"].astype(jnp.float32) + params["img_b"]
    fused = jnp.concatenate([text, imgf], axis=1)
    fc1_w = jnp.concatenate(
        [params["fc1_w_txt"], params["fc1_w_img"]], axis=0).astype(jnp.float32)
    h = fused @ fc1_w + params["fc1_b"]
    h = jnp.maximum(h, 0.0)
    h = (h - params["bn_mean"]) * jax.lax.rsqrt(params["bn_var"] + BN_EPS)
    h = h * params["bn_gamma"] + params["bn_beta"]
    return h @ params["fc2_w"] + params["fc2_b"]


# ----------------------------------------------------------------------------
# Parameter init (deterministic, synthetic).  Big streamed weights in bf16.
# ----------------------------------------------------------------------------
def init_params(key, *, vocab=100, embed_dim=64, img_feat_in=4 * 16 * 16,
                hidden_size=512, num_classes=3):
    ks = jax.random.split(key, 12)
    txt_out, img_out = 768, 2048

    def lin(k, fan_in, fan_out):
        lim = 1.0 / jnp.sqrt(fan_in)
        return jax.random.uniform(k, (fan_in, fan_out), jnp.float32, -lim, lim)

    fc1_w = lin(ks[5], txt_out + img_out, hidden_size)

    params = {
        "embed": jax.random.normal(ks[0], (vocab, embed_dim), jnp.float32) * 0.02,
        # HBM-bandwidth-dominant weights stored/streamed in bf16.
        "txt_w": lin(ks[1], embed_dim, txt_out).astype(jnp.bfloat16),
        "txt_b": jax.random.normal(ks[2], (1, txt_out), jnp.float32) * 0.01,
        "img_w": lin(ks[3], img_feat_in, img_out).astype(jnp.bfloat16),
        "img_b": jax.random.normal(ks[4], (1, img_out), jnp.float32) * 0.01,
        # fc1 weight pre-split into text/image row blocks (concat-free fusion).
        "fc1_w_txt": fc1_w[:txt_out].astype(jnp.bfloat16),
        "fc1_w_img": fc1_w[txt_out:].astype(jnp.bfloat16),
        "fc1_b": jax.random.normal(ks[6], (1, hidden_size), jnp.float32) * 0.01,
        "bn_gamma": 1.0 + 0.1 * jax.random.normal(ks[7], (1, hidden_size), jnp.float32),
        "bn_beta": 0.1 * jax.random.normal(ks[8], (1, hidden_size), jnp.float32),
        "bn_mean": 0.1 * jax.random.normal(ks[9], (1, hidden_size), jnp.float32),
        "bn_var": 1.0 + 0.1 * jax.random.uniform(ks[10], (1, hidden_size), jnp.float32),
        "fc2_w": lin(ks[11], hidden_size, num_classes),
        "fc2_b": jnp.zeros((1, num_classes), jnp.float32),
    }
    return params


if __name__ == "__main__":
    key = jax.random.PRNGKey(0)
    kp, ki, km, kim = jax.random.split(key, 4)

    B, S = 8, 8                   # batch, sequence length
    C, H, W = 4, 16, 16           # image channels / spatial (NCHW)

    params = init_params(kp, img_feat_in=C * H * W)
    prepped = prepare_params(params)   # one-time layout transforms (outside jit)

    input_ids = jax.random.randint(ki, (B, S), 0, 100, dtype=jnp.int32)
    attention_mask = (jax.random.uniform(km, (B, S)) > 0.2).astype(jnp.int32)
    image = jax.random.normal(kim, (B, C, H, W), jnp.float32)

    fwd = jax.jit(functools.partial(multimodal_forward, num_classes=3))
    out = fwd(prepped, input_ids, attention_mask, image)
    out = jax.block_until_ready(out)

    ref = reference_forward(params, input_ids, attention_mask, image)
    assert out.shape == (B, 3), out.shape
    # bf16 weight/activation streaming on the MXU (f32 accumulation) -> relax
    # tolerance vs. the f32 reference.
    assert jnp.allclose(out, ref, atol=2e-2, rtol=2e-2), "mismatch vs reference"

    print("KERNEL_OK")
</pallas_src>

<mosaic_0001>
module attributes {stable_mosaic.version = 11 : i64} {
  func.func @_fused_multimodal_kernel(%arg0: i32, %arg1: memref<8x64xbf16, #tpu.memory_space<vmem>>, %arg2: memref<8x1024xbf16, #tpu.memory_space<vmem>>, %arg3: memref<64x768xbf16, #tpu.memory_space<vmem>>, %arg4: memref<1x1024x1024xbf16, #tpu.memory_space<vmem>>, %arg5: memref<768x512xbf16, #tpu.memory_space<vmem>>, %arg6: memref<1024x512xbf16, #tpu.memory_space<vmem>>, %arg7: memref<1x512xf32, #tpu.memory_space<vmem>>, %arg8: memref<1x512xf32, #tpu.memory_space<vmem>>, %arg9: memref<1x512xf32, #tpu.memory_space<vmem>>, %arg10: memref<512x128xbf16, #tpu.memory_space<vmem>>, %arg11: memref<1x128xf32, #tpu.memory_space<vmem>>, %arg12: memref<8x128xf32, #tpu.memory_space<vmem>>, %arg13: memref<8x512xf32, #tpu.memory_space<vmem>>) attributes {dimension_semantics = [#tpu.dimension_semantics<arbitrary>], iteration_bounds = array<i64: 2>, scalar_prefetch = 0 : i64, scratch_operands = 1 : i64, tpu.core_type = #tpu.core_type<tc>, window_params = [{pipeline_mode = #tpu.pipeline_mode<synchronous>, transform_indices = @transform_0, window_bounds = array<i64: 8, 64>}, {pipeline_mode = #tpu.pipeline_mode<synchronous>, transform_indices = @transform_1, window_bounds = array<i64: 8, 1024>}, {pipeline_mode = #tpu.pipeline_mode<synchronous>, transform_indices = @transform_2, window_bounds = array<i64: 64, 768>}, {transform_indices = @transform_3, window_bounds = array<i64: 1, 1024, 1024>}, {pipeline_mode = #tpu.pipeline_mode<synchronous>, transform_indices = @transform_4, window_bounds = array<i64: 768, 512>}, {transform_indices = @transform_5, window_bounds = array<i64: 1024, 512>}, {pipeline_mode = #tpu.pipeline_mode<synchronous>, transform_indices = @transform_6, window_bounds = array<i64: 1, 512>}, {pipeline_mode = #tpu.pipeline_mode<synchronous>, transform_indices = @transform_7, window_bounds = array<i64: 1, 512>}, {pipeline_mode = #tpu.pipeline_mode<synchronous>, transform_indices = @transform_8, window_bounds = array<i64: 1, 512>}, {pipeline_mode = #tpu.pipeline_mode<synchronous>, transform_indices = @transform_9, window_bounds = array<i64: 512, 128>}, {pipeline_mode = #tpu.pipeline_mode<synchronous>, transform_indices = @transform_10, window_bounds = array<i64: 1, 128>}, {pipeline_mode = #tpu.pipeline_mode<synchronous>, transform_indices = @transform_11, window_bounds = array<i64: 8, 128>}]} {
    %c0_i32 = arith.constant 0 : i32
    %0 = arith.cmpi eq, %arg0, %c0_i32 : i32
    %1 = arith.extui %0 : i1 to i32
    %c0_i32_0 = arith.constant 0 : i32
    %2 = arith.cmpi ne, %1, %c0_i32_0 : i32
    scf.if %2 {
      %c0_13 = arith.constant 0 : index
      %c0_14 = arith.constant 0 : index
      %16 = vector.load %arg1[%c0_13, %c0_14] : memref<8x64xbf16, #tpu.memory_space<vmem>>, vector<8x64xbf16>
      %c0_15 = arith.constant 0 : index
      %c0_16 = arith.constant 0 : index
      %17 = vector.load %arg3[%c0_15, %c0_16] : memref<64x768xbf16, #tpu.memory_space<vmem>>, vector<64x768xbf16>
      %cst_17 = arith.constant dense<0.000000e+00> : vector<8x768xf32>
      %18 = tpu.matmul %16, %17, %cst_17 {dimension_numbers = #tpu.dot_dimension_numbers<[1], [0], [0], [1], [0, 0, 1, 1], [], []>} : vector<8x64xbf16>, vector<64x768xbf16>, vector<8x768xf32> -> vector<8x768xf32>
      %19 = arith.truncf %18 : vector<8x768xf32> to vector<8x768xbf16>
      %c0_18 = arith.constant 0 : index
      %c0_19 = arith.constant 0 : index
      %20 = vector.load %arg5[%c0_18, %c0_19] : memref<768x512xbf16, #tpu.memory_space<vmem>>, vector<768x512xbf16>
      %cst_20 = arith.constant dense<0.000000e+00> : vector<8x512xf32>
      %21 = tpu.matmul %19, %20, %cst_20 {dimension_numbers = #tpu.dot_dimension_numbers<[1], [0], [0], [1], [0, 0, 1, 1], [], []>} : vector<8x768xbf16>, vector<768x512xbf16>, vector<8x512xf32> -> vector<8x512xf32>
      %c0_21 = arith.constant 0 : index
      %c0_22 = arith.constant 0 : index
      %22 = vector.load %arg7[%c0_21, %c0_22] : memref<1x512xf32, #tpu.memory_space<vmem>>, vector<1x512xf32>
      %23 = vector.broadcast %22 : vector<1x512xf32> to vector<8x512xf32>
      %24 = arith.addf %21, %23 : vector<8x512xf32>
      %c0_23 = arith.constant 0 : index
      %c0_24 = arith.constant 0 : index
      %25 = vector.load %arg13[%c0_23, %c0_24] : memref<8x512xf32, #tpu.memory_space<vmem>>, vector<8x512xf32>
      tpu.vector_store %arg13[%c0_23, %c0_24], %24 {strides = array<i32>} : memref<8x512xf32, #tpu.memory_space<vmem>>, vector<8x512xf32>,
    } else {
    }
    %c0 = arith.constant 0 : index
    %c0_1 = arith.constant 0 : index
    %3 = vector.load %arg2[%c0, %c0_1] : memref<8x1024xbf16, #tpu.memory_space<vmem>>, vector<8x1024xbf16>
    %c0_2 = arith.constant 0 : index
    %c0_3 = arith.constant 0 : index
    %c0_4 = arith.constant 0 : index
    %4 = vector.load %arg4[%c0_2, %c0_3, %c0_4] : memref<1x1024x1024xbf16, #tpu.memory_space<vmem>>, vector<1x1024x1024xbf16>
    %5 = vector.shape_cast %4 : vector<1x1024x1024xbf16> to vector<1024x1024xbf16>
    %cst = arith.constant dense<0.000000e+00> : vector<8x1024xf32>
    %6 = tpu.matmul %3, %5, %cst {dimension_numbers = #tpu.dot_dimension_numbers<[1], [0], [0], [1], [0, 0, 1, 1], [], []>} : vector<8x1024xbf16>, vector<1024x1024xbf16>, vector<8x1024xf32> -> vector<8x1024xf32>
    %c0_5 = arith.constant 0 : index
    %c0_6 = arith.constant 0 : index
    %7 = vector.load %arg13[%c0_5, %c0_6] : memref<8x512xf32, #tpu.memory_space<vmem>>, vector<8x512xf32>
    %8 = arith.truncf %6 : vector<8x1024xf32> to vector<8x1024xbf16>
    %c0_7 = arith.constant 0 : index
    %c0_8 = arith.constant 0 : index
    %9 = vector.load %arg6[%c0_7, %c0_8] : memref<1024x512xbf16, #tpu.memory_space<vmem>>, vector<1024x512xbf16>
    %cst_9 = arith.constant dense<0.000000e+00> : vector<8x512xf32>
    %10 = tpu.matmul %8, %9, %cst_9 {dimension_numbers = #tpu.dot_dimension_numbers<[1], [0], [0], [1], [0, 0, 1, 1], [], []>} : vector<8x1024xbf16>, vector<1024x512xbf16>, vector<8x512xf32> -> vector<8x512xf32>
    %11 = arith.addf %7, %10 : vector<8x512xf32>
    %c0_10 = arith.constant 0 : index
    %c0_11 = arith.constant 0 : index
    %12 = vector.load %arg13[%c0_10, %c0_11] : memref<8x512xf32, #tpu.memory_space<vmem>>, vector<8x512xf32>
    tpu.vector_store %arg13[%c0_10, %c0_11], %11 {strides = array<i32>} : memref<8x512xf32, #tpu.memory_space<vmem>>, vector<8x512xf32>,
    %c1_i32 = arith.constant 1 : i32
    %13 = arith.cmpi eq, %arg0, %c1_i32 : i32
    %14 = arith.extui %13 : i1 to i32
    %c0_i32_12 = arith.constant 0 : i32
    %15 = arith.cmpi ne, %14, %c0_i32_12 : i32
    scf.if %15 {
      %c0_13 = arith.constant 0 : index
      %c0_14 = arith.constant 0 : index
      %16 = vector.load %arg13[%c0_13, %c0_14] : memref<8x512xf32, #tpu.memory_space<vmem>>, vector<8x512xf32>
      %cst_15 = arith.constant 0.000000e+00 : f32
      %17 = vector.broadcast %cst_15 : f32 to vector<8x512xf32>
      %18 = arith.maximumf %16, %17 : vector<8x512xf32>
      %c0_16 = arith.constant 0 : index
      %c0_17 = arith.constant 0 : index
      %19 = vector.load %arg8[%c0_16, %c0_17] : memref<1x512xf32, #tpu.memory_space<vmem>>, vector<1x512xf32>
      %20 = vector.broadcast %19 : vector<1x512xf32> to vector<8x512xf32>
      %21 = arith.mulf %18, %20 : vector<8x512xf32>
      %c0_18 = arith.constant 0 : index
      %c0_19 = arith.constant 0 : index
      %22 = vector.load %arg9[%c0_18, %c0_19] : memref<1x512xf32, #tpu.memory_space<vmem>>, vector<1x512xf32>
      %23 = vector.broadcast %22 : vector<1x512xf32> to vector<8x512xf32>
      %24 = arith.addf %21, %23 : vector<8x512xf32>
      %25 = arith.truncf %24 : vector<8x512xf32> to vector<8x512xbf16>
      %c0_20 = arith.constant 0 : index
      %c0_21 = arith.constant 0 : index
      %26 = vector.load %arg10[%c0_20, %c0_21] : memref<512x128xbf16, #tpu.memory_space<vmem>>, vector<512x128xbf16>
      %cst_22 = arith.constant dense<0.000000e+00> : vector<8x128xf32>
      %27 = tpu.matmul %25, %26, %cst_22 {dimension_numbers = #tpu.dot_dimension_numbers<[1], [0], [0], [1], [0, 0, 1, 1], [], []>} : vector<8x512xbf16>, vector<512x128xbf16>, vector<8x128xf32> -> vector<8x128xf32>
      %c0_23 = arith.constant 0 : index
      %c0_24 = arith.constant 0 : index
      %28 = vector.load %arg11[%c0_23, %c0_24] : memref<1x128xf32, #tpu.memory_space<vmem>>, vector<1x128xf32>
      %29 = vector.broadcast %28 : vector<1x128xf32> to vector<8x128xf32>
      %30 = arith.addf %27, %29 : vector<8x128xf32>
      %c0_25 = arith.constant 0 : index
      %c0_26 = arith.constant 0 : index
      %31 = vector.load %arg12[%c0_25, %c0_26] : memref<8x128xf32, #tpu.memory_space<vmem>>, vector<8x128xf32>
      tpu.vector_store %arg12[%c0_25, %c0_26], %30 {strides = array<i32>} : memref<8x128xf32, #tpu.memory_space<vmem>>, vector<8x128xf32>,
    } else {
    }
    return
  }
  func.func @transform_0(%arg0: i32) -> (i32, i32) {
    %c0_i32 = arith.constant 0 : i32
    %c0_i32_0 = arith.constant 0 : i32
    %c0_i32_1 = arith.constant 0 : i32
    return %c0_i32, %c0_i32_0 : i32, i32
  }
  func.func @transform_1(%arg0: i32) -> (i32, i32) {
    %c0_i32 = arith.constant 0 : i32
    %c0_i32_0 = arith.constant 0 : i32
    %c0_i32_1 = arith.constant 0 : i32
    return %c0_i32, %c0_i32_0 : i32, i32
  }
  func.func @transform_2(%arg0: i32) -> (i32, i32) {
    %c0_i32 = arith.constant 0 : i32
    %c0_i32_0 = arith.constant 0 : i32
    %c0_i32_1 = arith.constant 0 : i32
    return %c0_i32, %c0_i32_0 : i32, i32
  }
  func.func @transform_3(%arg0: i32) -> (i32, i32, i32) {
    %c0_i32 = arith.constant 0 : i32
    %c0_i32_0 = arith.constant 0 : i32
    %c0_i32_1 = arith.constant 0 : i32
    return %arg0, %c0_i32, %c0_i32_0 : i32, i32, i32
  }
  func.func @transform_4(%arg0: i32) -> (i32, i32) {
    %c0_i32 = arith.constant 0 : i32
    %c0_i32_0 = arith.constant 0 : i32
    %c0_i32_1 = arith.constant 0 : i32
    return %c0_i32, %c0_i32_0 : i32, i32
  }
  func.func @transform_5(%arg0: i32) -> (i32, i32) {
    %c0_i32 = arith.constant 0 : i32
    %c0_i32_0 = arith.constant 0 : i32
    return %arg0, %c0_i32 : i32, i32
  }
  func.func @transform_6(%arg0: i32) -> (i32, i32) {
    %c0_i32 = arith.constant 0 : i32
    %c0_i32_0 = arith.constant 0 : i32
    %c0_i32_1 = arith.constant 0 : i32
    return %c0_i32, %c0_i32_0 : i32, i32
  }
  func.func @transform_7(%arg0: i32) -> (i32, i32) {
    %c0_i32 = arith.constant 0 : i32
    %c0_i32_0 = arith.constant 0 : i32
    %c0_i32_1 = arith.constant 0 : i32
    return %c0_i32, %c0_i32_0 : i32, i32
  }
  func.func @transform_8(%arg0: i32) -> (i32, i32) {
    %c0_i32 = arith.constant 0 : i32
    %c0_i32_0 = arith.constant 0 : i32
    %c0_i32_1 = arith.constant 0 : i32
    return %c0_i32, %c0_i32_0 : i32, i32
  }
  func.func @transform_9(%arg0: i32) -> (i32, i32) {
    %c0_i32 = arith.constant 0 : i32
    %c0_i32_0 = arith.constant 0 : i32
    %c0_i32_1 = arith.constant 0 : i32
    return %c0_i32, %c0_i32_0 : i32, i32
  }
  func.func @transform_10(%arg0: i32) -> (i32, i32) {
    %c0_i32 = arith.constant 0 : i32
    %c0_i32_0 = arith.constant 0 : i32
    %c0_i32_1 = arith.constant 0 : i32
    return %c0_i32, %c0_i32_0 : i32, i32
  }
  func.func @transform_11(%arg0: i32) -> (i32, i32) {
    %c0_i32 = arith.constant 0 : i32
    %c0_i32_0 = arith.constant 0 : i32
    %c0_i32_1 = arith.constant 0 : i32
    return %c0_i32, %c0_i32_0 : i32, i32
  }
}

</mosaic_0001>

<bundles_post_ra>
// kernel: multimodal_forward.1
= control target key start
LH: loop header
LB: loop body
LE: loop exit
PB: predicated region body
PF: predicated region fallthrough
CT: control target
= control target key end

     0   :  { %s12010_s0 = inlined_call_operand.vmem [shape: bf16[8,64], index: 0, kind: input, shape index: {}]   ;;  %s12011_s1 = inlined_call_operand.vmem [shape: bf16[8,1024], index: 1, kind: input, shape index: {}]   ;;  %s12012_s2 = inlined_call_operand.hbm [shape: bf16[64,768], index: 2, kind: input, shape index: {}]   ;;  %s12013_s3 = inlined_call_operand.hbm [shape: bf16[2,1024,1024], index: 3, kind: input, shape index: {}]   ;;  %s12014_s4 = inlined_call_operand.hbm [shape: bf16[768,512], index: 4, kind: input, shape index: {}]   ;;  %s12015_s5 = inlined_call_operand.hbm [shape: bf16[2048,512], index: 5, kind: input, shape index: {}]   ;;  %s12016_s6 = inlined_call_operand.hbm [shape: f32[1,512], index: 6, kind: input, shape index: {}]   ;;  %s12017_s7 = inlined_call_operand.hbm [shape: f32[1,512], index: 7, kind: input, shape index: {}]   ;;  %s12018_s8 = inlined_call_operand.hbm [shape: f32[1,512], index: 8, kind: input, shape index: {}]   ;;  %s12019_s9 = inlined_call_operand.hbm [shape: bf16[512,128], index: 9, kind: input, shape index: {}]   ;;  %s12020_s10 = inlined_call_operand.hbm [shape: f32[1,128], index: 10, kind: input, shape index: {}]   ;;  %s12021_s11 = inlined_call_operand.vmem [shape: f32[8,128], index: 11, kind: output, shape index: {}]  }
   0x1   :  { %12028 = sst [smem:[#allocation24_spill]] %s12012_s2 }
   0x2   :  { %12029 = sst [smem:[#allocation25_spill]] %s12013_s3 }
   0x3   :  { %12030 = sst [smem:[#allocation26_spill]] %s12014_s4 }
   0x4   :  { %12031 = sst [smem:[#allocation27_spill]] %s12016_s6 }
   0x5   :  { %12032 = sst [smem:[#allocation28_spill]] %s12017_s7 }
   0x6   :  { %12033 = sst [smem:[#allocation29_spill]] %s12018_s8 }
   0x7   :  { %16 = vsyncpa [#allocation4], 0 }
   0x8   :  { %17 = vsyncpa [#allocation6], 0 }
   0x9   :  { %19 = vsyncpa [#allocation6 + $0x1], 0 }
   0xa   :  { %20 = vsyncpa [#allocation9], 0 }
   0xb   :  { %22 = vsyncpa [#allocation9 + $0x1], 0 }
   0xc   :  { %23 = vsyncpa [#allocation12], 0 }
   0xd   :  { %24 = vsyncpa [#allocation15], 0  ;;  %s10774_s17 = smov 0   ;;  %s10776_s18 = smov 0  }
   0xe   :  { %s10778_s19 = smov 0   ;;  %s10780_s20 = smov 0  }
   0xf LB: > { %s10696_s21 = smov [#allocation7]   ;;  %s10795_s23 = sadd.s32 4294967295, %s10694_s20   ;;  %s10694_s20 = sphi %s10780_s20, %s12065_s20   ;;  %s10690_s19 = sphi %s10778_s19, %s12064_s19   ;;  %s10686_s18 = sphi %s10776_s18, %s12063_s18   ;;  %s10682_s17 = sphi %s10774_s17, %s12062_s17  }
  0x10   : > { %s328_s22 = sshll.u32 %s10696_s21, 4  ;;  %p8421_p0 = scmp.ge.s32.totalorder %s10694_s20, 1  ;;  %s329_s22 = int_to_ptr.vmem [resolvable:$true] %s328_s22 }
  0x11   : > { %p12024_p1 = scmp.eq.s32.totalorder %s10795_s23, 0  ;;  %p297_p2 = scmp.lt.s32.totalorder %s10694_s20, 3 }
  0x12   : > { %s10697_s25 = smov [#allocation10]   ;;  %s10698_s28 = smov [#allocation11]  }
  0x13   : > { %p10801_p4 = pnand %p8421_p0, %p297_p2  ;;  %s342_s26 = sshll.u32 %s10697_s25, 4  ;;  %s343_s26 = int_to_ptr.vmem [resolvable:$true] %s342_s26 }
  0x14   : > { %s353_s29 = sshll.u32 %s10698_s28, 4  ;;  %s10409_s12 = scalar_lea.vmem %s329_s22, 24576  ;;  %s10813_s29 = int_to_ptr.vmem [resolvable:$true] %s353_s29 }
  0x15   : > { %p9558_p5 = pneg %p10801_p4  ;;  %p10410_p8 = scmp.ne.s32.totalorder %s329_s22, %s10409_s12 }
  0x16   : > { %p10417_p11 = scmp.lt.s32.totalorder %s329_s22, %s329_s22  ;;  %p10418_p12 = scmp.lt.s32.totalorder %s10409_s12, %s10409_s12 }
  0x17   : > { %p10809_p6 = pnand %p9558_p5, %p12024_p1 }
  0x18   : > { %p10419_p13 = por %p10418_p12, %p10417_p11 }
  0x19   : > { %p10817_p7 = pneg %p10809_p6 }
  0x1b   : > { %p10412_p9 = pnand %p10410_p8, %p10817_p7 }
  0x1d   : > { %p10413_p10 = pneg %p10412_p9 }
  0x1f   : > { %p10420_p0 = pnand %p10419_p13, %p10413_p10 }
  0x21   : > { %10423 = shalt.err (!%p10420_p0)
}
  0x22   : > { %s12022_s13 = smov 256   ;;  %s12023_s14 = smov 16  }
  0x23   : > { %s12037_s4 = sld [smem:[#allocation26_spill]]  ;;  %s10435_s21 = scalar_lea.vmem %s343_s26, 64 }
  0x24   : > { %p10436_p2 = scmp.ne.s32.totalorder %s343_s26, %s10435_s21  ;;  %p10443_p9 = scmp.lt.s32.totalorder %s343_s26, %s343_s26 }
  0x25   : > { %p10444_p10 = scmp.lt.s32.totalorder %s10435_s21, %s10435_s21 }
  0x26   : > { %p10438_p5 = pnand %p10436_p2, %p10817_p7 }
  0x27   : > { %p10445_p11 = por %p10444_p10, %p10443_p9 }
  0x28   : > { %p10439_p8 = pneg %p10438_p5 }
  0x29   : > { %9564 = dma.hbm_to_vmem [thread:$0]  (!%p10809_p6), %s12037_s4, 24576, %s329_s22, [#allocation6], %s12022_s13, %s12022_s13, %s12023_s14  }
  0x2a   : > { %p10446_p12 = pnand %p10445_p11, %p10439_p8 }
  0x2c   : > { %10449 = shalt.err (!%p10446_p12)
}
  0x2d   : > { %s12038_s6 = sld [smem:[#allocation27_spill]]  ;;  %s10461_s22 = scalar_lea.vmem %s10813_s29, 64 }
  0x2e   : > { %p10462_p13 = scmp.ne.s32.totalorder %s10813_s29, %s10461_s22  ;;  %p10469_p5 = scmp.lt.s32.totalorder %s10813_s29, %s10813_s29 }
  0x2f   : > { %p10470_p9 = scmp.lt.s32.totalorder %s10461_s22, %s10461_s22 }
  0x30   : > { %p10464_p0 = pnand %p10462_p13, %p10817_p7 }
  0x31   : > { %p10471_p8 = por %p10470_p9, %p10469_p5 }
  0x32   : > { %p10465_p2 = pneg %p10464_p0 }
  0x33   : > { %9567 = dma.hbm_to_vmem [thread:$0]  (!%p10809_p6), %s12038_s6, 64, %s343_s26, [#allocation9]  }
  0x34   : > { %p10472_p10 = pnand %p10471_p8, %p10465_p2 }
  0x36   : > { %10475 = shalt.err (!%p10472_p10)
}
  0x37   : > { %s12039_s7 = sld [smem:[#allocation28_spill]]  ;;  %s10701_s26 = smov [#allocation14]  }
  0x38   : > { %s374_s16 = sshll.u32 %s10701_s26, 4  ;;  %s375_s16 = int_to_ptr.vmem [resolvable:$true] %s374_s16 }
  0x39   : > { %s10487_s21 = scalar_lea.vmem %s375_s16, 4096  ;;  %p10495_p0 = scmp.lt.s32.totalorder %s375_s16, %s375_s16 }
  0x3a   : > { %p10488_p11 = scmp.ne.s32.totalorder %s375_s16, %s10487_s21  ;;  %p10496_p5 = scmp.lt.s32.totalorder %s10487_s21, %s10487_s21 }
  0x3c   : > { %p10490_p12 = pnand %p10488_p11, %p10817_p7  ;;  %p10497_p2 = por %p10496_p5, %p10495_p0 }
  0x3d   : > { %9570 = dma.hbm_to_vmem [thread:$0]  (!%p10809_p6), %s12039_s7, 64, %s10813_s29, [#allocation12]  }
  0x3e   : > { %p10491_p13 = pneg %p10490_p12 }
  0x40   : > { %p10498_p9 = pnand %p10497_p2, %p10491_p13 }
  0x42   : > { %10501 = shalt.err (!%p10498_p9)
}
  0x43   : > { %s10702_s25 = smov 64   ;;  %s10703_s28 = smov 4  }
  0x44   : > { %9576 = dma.hbm_to_vmem [thread:$0]  (!%p10809_p6), %s12019_s9, 4096, %s375_s16, [#allocation15], %s10702_s25, %s10702_s25, %s10703_s28  }
  0x45   : > { %s10704_s12 = smov [#allocation3]  }
  0x46   : > { %s315_s15 = sshll.u32 %s10704_s12, 4  ;;  %s316_s15 = int_to_ptr.vmem [resolvable:$true] %s315_s15 }
  0x47   : > { %s10513_s26 = scalar_lea.vmem %s316_s15, 3072  ;;  %p10521_p12 = scmp.lt.s32.totalorder %s316_s15, %s316_s15 }
  0x48   : > { %p10514_p8 = scmp.ne.s32.totalorder %s316_s15, %s10513_s26  ;;  %p10522_p13 = scmp.lt.s32.totalorder %s10513_s26, %s10513_s26 }
  0x4a   : > { %p10516_p10 = pnand %p10514_p8, %p10817_p7  ;;  %p10523_p0 = por %p10522_p13, %p10521_p12 }
  0x4c   : > { %p10517_p11 = pneg %p10516_p10 }
  0x4e   : > { %p10524_p5 = pnand %p10523_p0, %p10517_p11 }
  0x50   : > { %10527 = shalt.err (!%p10524_p5)
}
  0x51   : > { %s10705_s21 = smov 384   ;;  %s10706_s13 = smov 24  }
  0x52   : > { %s12040_s2 = sld [smem:[#allocation24_spill]]  ;;  %s10707_s25 = smov [#allocation13]  }
  0x53   : > { %s364_s28 = sshll.u32 %s10707_s25, 4  ;;  %s10708_s29 = smov [#allocation16]   ;;  %s365_s28 = int_to_ptr.vmem [resolvable:$true] %s364_s28 }
  0x54   : > { %s388_s12 = sshll.u32 %s10708_s29, 4  ;;  %s10539_s14 = scalar_lea.vmem %s365_s28, 64  ;;  %s389_s12 = int_to_ptr.vmem [resolvable:$true] %s388_s12 }
  0x55   : > { %p10540_p2 = scmp.ne.s32.totalorder %s365_s28, %s10539_s14  ;;  %p10547_p10 = scmp.lt.s32.totalorder %s365_s28, %s365_s28 }
  0x56   : > { %p10548_p11 = scmp.lt.s32.totalorder %s10539_s14, %s10539_s14 }
  0x57   : > { %p10542_p9 = pnand %p10540_p2, %p10817_p7 }
  0x58   : > { %9561 = dma.hbm_to_vmem [thread:$0]  (!%p10809_p6), %s12040_s2, 3072, %s316_s15, [#allocation4], %s10705_s21, %s10705_s21, %s10706_s13  }
  0x59   : > { %p10543_p8 = pneg %p10542_p9  ;;  %p10549_p12 = por %p10548_p11, %p10547_p10 }
  0x5b   : > { %p10550_p13 = pnand %p10549_p12, %p10543_p8 }
  0x5d   : > { %10553 = shalt.err (!%p10550_p13)
}
  0x5e   : > { %s12041_s8 = sld [smem:[#allocation29_spill]]  ;;  %s10565_s13 = scalar_lea.vmem %s389_s12, 16 }
  0x5f   : > { %p10566_p0 = scmp.ne.s32.totalorder %s389_s12, %s10565_s13  ;;  %s10572_s15 = scalar_lea.vmem %s389_s12, 32 }
  0x60   : > { %p10573_p2 = scmp.lt.s32.totalorder %s389_s12, %s389_s12  ;;  %p10574_p9 = scmp.lt.s32.totalorder %s10572_s15, %s10565_s13 }
  0x61   : > { %p10568_p5 = pnand %p10566_p0, %p10817_p7 }
  0x62   : > { %p10575_p1 = por %p10574_p9, %p10573_p2 }
  0x63   : > { %p10569_p3 = pneg %p10568_p5 }
  0x64   : > { %9573 = dma.hbm_to_vmem [thread:$0]  (!%p10809_p6), %s12041_s8, 64, %s365_s28, [#allocation12]  }
  0x65   : > { %p10576_p10 = pnand %p10575_p1, %p10569_p3 }
  0x67   : > { %10579 = shalt.err (!%p10576_p10)
}
  0x68   : > { %9579 = dma.hbm_to_vmem [thread:$0]  (!%p10809_p6), %s12020_s10, 16, %s389_s12, [#allocation15]  }
  0x69   : > { %s10879_s27 = sadd.s32 1, %s10694_s20   ;;  %s100_s16 = sadd.s32 1, %s10690_s19 }
  0x6a   : > { %s97_s30 = ssub.s32 %s10694_s20, %s10879_s27  ;;  %p107_p3 = scmp.ne.s32.totalorder %s10690_s19, %s10686_s18 }
  0x6b   : > { %p98_p1 = scmp.eq.s32.totalorder %s97_s30, 0  ;;  %p108_p7 = scmp.eq.s32.totalorder %s10694_s20, 0 }
  0x6c   : > { %p113_p8 = scmp.ne.s32.totalorder %s10686_s18, %s10682_s17  ;;  %p12042_p12 = scmp.eq.s32.totalorder %s10795_s23, 0 }
  0x6d   : > { %s10890_s25 = scalar_select %p98_p1, %s10690_s19, %s100_s16  }
  0x6e   : > { %p109_p11 = por %p108_p7, %p107_p3  ;;  %p10894_p13 = por %p12042_p12, %p113_p8 }
  0x6f   : > { %p9594_p0 = scmp.lt.s32.totalorder %s10694_s20, 2  ;;  %s12026_s29 = sand.u32 1, %s10694_s20  }
  0x70   : > { %s12043_s28 = scalar_select %p10894_p13, 1, 0 }
  0x71   : > { %s12025_s12 = sand.u32 1, %s10690_s19   ;;  %s9479_s22 = sshll.u32 %s10694_s20, 16 }
  0x72   : > { %s8430_s26 = sshll.u32 %s12025_s12, 12  ;;  %s12044_s3 = sld [smem:[#allocation25_spill]] }
  0x73   : > { %s403_s17 = scalar_lea.vmem [#allocation5], %s8430_s26  ;;  %p10909_p6 = pnand %p9594_p0, %p109_p11 }
  0x74   : > { %s410_s21 = sshll.u32 %s403_s17, 4  ;;  %s10917_s16 = scalar_lea.sflag [#allocation6], %s12026_s29  ;;  %s10913_s21 = int_to_ptr.vmem [resolvable:$true] %s410_s21 }
  0x75   : > { %p10582_p2 = pneg %p10909_p6 }
  0x78   : > { %s10907_s14 = scalar_lea.hbm %s12044_s3, %s9479_s22  ;;  %s10585_s13 = scalar_lea.hbm %s12044_s3, 131072 }
  0x79   : > { %s10580_s12 = scalar_lea.hbm %s10907_s14, 65536  ;;  %p10586_p1 = scmp.lt.s32.totalorder %s10907_s14, %s12044_s3 }
  0x7a   : > { %p10581_p5 = scmp.ne.s32.totalorder %s10907_s14, %s10580_s12  ;;  %p10587_p3 = scmp.lt.s32.totalorder %s10585_s13, %s10580_s12 }
  0x7c   : > { %p10583_p9 = pnand %p10582_p2, %p10581_p5  ;;  %p10588_p7 = por %p10587_p3, %p10586_p1 }
  0x7e   : > { %p10584_p10 = pneg %p10583_p9 }
  0x80   : > { %p10589_p8 = pnand %p10588_p7, %p10584_p10 }
  0x82   : > { %10592 = shalt.err (!%p10589_p8)
}
  0x83   : > { %s10593_s29 = scalar_lea.vmem %s10913_s21, 65536  ;;  %s10709_s26 = smov [#allocation5]  }
  0x84   : > { %p10594_p11 = scmp.ne.s32.totalorder %s10913_s21, %s10593_s29  ;;  %s10598_s22 = sshll.u32 %s10709_s26, 4  ;;  %s10599_s22 = int_to_ptr.vmem [resolvable:$false] %s10598_s22 }
  0x85   : > { %s10600_s2 = scalar_lea.vmem %s10599_s22, 131072  ;;  %p10601_p5 = scmp.lt.s32.totalorder %s10913_s21, %s10599_s22 }
  0x86   : > { %p10596_p12 = pnand %p10594_p11, %p10582_p2  ;;  %p10602_p9 = scmp.lt.s32.totalorder %s10600_s2, %s10593_s29 }
  0x88   : > { %p10597_p0 = pneg %p10596_p12  ;;  %p10603_p13 = por %p10602_p9, %p10601_p5 }
  0x8a   : > { %p10604_p1 = pnand %p10603_p13, %p10597_p0 }
  0x8c   : > { %10607 = shalt.err (!%p10604_p1)
}
  0x8d   : > { %s10710_s12 = smov 512   ;;  %s10711_s13 = smov 32  }
  0x8e   : > { %9583 = dma.hbm_to_vmem [thread:$0]  (!%p10909_p6), %s10907_s14, 65536, %s10913_s21, %s10917_s16, %s10710_s12, %s10710_s12, %s10711_s13  }
  0x8f   : > { %s12046_s15 = sand.u32 1, %s10690_s19   ;;  %s9481_s26 = sshll.u32 %s10694_s20, 15 }
  0x90   : > { %s8433_s17 = sshll.u32 %s12046_s15, 11  ;;  %s10950_s29 = scalar_lea.hbm %s12015_s5, %s9481_s26 }
  0x91   : > { %s424_s3 = scalar_lea.vmem [#allocation8], %s8433_s17  ;;  %s12047_s6 = sand.u32 1, %s10694_s20  }
  0x92   : > { %s432_s4 = sshll.u32 %s424_s3, 4  ;;  %s421_s7 = scalar_lea.sflag [#allocation9], %s12047_s6  ;;  %s10952_s4 = int_to_ptr.vmem [resolvable:$true] %s432_s4 }
  0x93   : > { %s10608_s8 = scalar_lea.hbm %s10950_s29, 32768  ;;  %s10613_s16 = scalar_lea.hbm %s12015_s5, 65536 }
  0x94   : > { %p10609_p13 = scmp.ne.s32.totalorder %s10950_s29, %s10608_s8  ;;  %p10614_p7 = scmp.lt.s32.totalorder %s10950_s29, %s12015_s5 }
  0x95   : > { %p10615_p8 = scmp.lt.s32.totalorder %s10613_s16, %s10608_s8 }
  0x96   : > { %p10611_p10 = pnand %p10609_p13, %p10582_p2 }
  0x97   : > { %p10616_p11 = por %p10615_p8, %p10614_p7 }
  0x98   : > { %p10612_p3 = pneg %p10611_p10 }
  0x9a   : > { %p10617_p12 = pnand %p10616_p11, %p10612_p3 }
  0x9c   : > { %10620 = shalt.err (!%p10617_p12)
}
  0x9d   : > { %s10621_s3 = scalar_lea.vmem %s10952_s4, 32768  ;;  %s10712_s6 = smov [#allocation8]  }
  0x9e   : > { %p10622_p0 = scmp.ne.s32.totalorder %s10952_s4, %s10621_s3  ;;  %s10626_s20 = sshll.u32 %s10712_s6, 4  ;;  %s10627_s20 = int_to_ptr.vmem [resolvable:$false] %s10626_s20 }
  0x9f   : > { %s10628_s15 = scalar_lea.vmem %s10627_s20, 65536  ;;  %p10629_p1 = scmp.lt.s32.totalorder %s10952_s4, %s10627_s20 }
  0xa0   : > { %p10624_p5 = pnand %p10622_p0, %p10582_p2  ;;  %p10630_p13 = scmp.lt.s32.totalorder %s10628_s15, %s10621_s3 }
  0xa2   : > { %p10625_p9 = pneg %p10624_p5  ;;  %p10631_p10 = por %p10630_p13, %p10629_p1 }
  0xa4   : > { %p10632_p7 = pnand %p10631_p10, %p10625_p9 }
  0xa6   : > { %10635 = shalt.err (!%p10632_p7)
}
  0xa7   : > { %s12048_s8 = smov 16   ;;  %s12049_s17 = smov 256  }
  0xa8   : > { %9586 = dma.hbm_to_vmem [thread:$0]  (!%p10909_p6), %s10950_s29, 32768, %s10952_s4, %s421_s7, %s12049_s17, %s12049_s17, %s12048_s8  }
  0xa9   : > { %444 = sbr.rel (%p10801_p4) target bundleno = 2029 (0x7ed), region = 64  ;;  %p12050_p2 = scmp.eq.s32.totalorder (!%p10801_p4), %s10795_s23, 0 }
  0xae   : > { %10653 = dma.done.wait (%p12050_p2), [#allocation4], 3072   ;;  %p12051_p3 = pmov %p12050_p2 }
  0xaf   : > { %s450_s26 = sand.u32 1, %s10795_s23   ;;  %s452_s30 = sand.u32 1, %s10686_s18  }
  0xb0   : > { %10655 = vsyncadd (%p12051_p3), [#allocation4], 4294964224  ;;  %s8439_s22 = sshll.u32 %s452_s30, 12  ;;  %s451_s2 = scalar_lea.sflag [#allocation6], %s450_s26 }
  0xb1   : > { %s10989_s14 = scalar_lea.vmem [#allocation5], %s8439_s22  ;;  %p12052_p8 = scmp.ne.s32.totalorder %s12043_s28, 0 }
  0xb3   : > { %10657 = dma.done.wait (%p12052_p8), %s451_s2, 65536  }
  0xb4   : > { %10659 = vsyncadd (%p12052_p8), %s451_s2, 4294901760  ;;  %p12053_p4 = pmov %p12050_p2 }
  0xb5   : > { %p12054_p6 = pmov %p12050_p2 }
  0xb6   : > { %10661 = dma.done.wait (%p12053_p4), [#allocation6], 24576  }
  0xb7   : > { %10663 = vsyncadd (%p12054_p6), [#allocation6], 4294942720  ;;  %s8441_s4 = sshll.u32 %s452_s30, 11  ;;  %s464_s7 = scalar_lea.sflag [#allocation9], %s450_s26 }
  0xb8   : > { %s10999_s24 = scalar_lea.vmem [#allocation8], %s8441_s4 }
  0xb9   : > { %10665 = dma.done.wait (%p12052_p8), %s464_s7, 32768  }
  0xba   : > { %10667 = vsyncadd (%p12052_p8), %s464_s7, 4294934528  ;;  %p12055_p11 = pmov %p12050_p2 }
  0xbb   : > { %p12056_p12 = pmov %p12050_p2 }
  0xbc   : > { %10669 = dma.done.wait (%p12055_p11), [#allocation9], 64  }
  0xbd   : > { %10671 = vsyncadd (%p12056_p12), [#allocation9], 4294967232  ;;  %p12057_p0 = pmov %p12050_p2 }
  0xbf   : > { %10673 = dma.done.wait (%p12057_p0), [#allocation12], 128   ;;  %p12058_p5 = pmov %p12057_p0 }
  0xc0   : > { %p12059_p9 = pmov %p12057_p0 }
  0xc1   : > { %10675 = vsyncadd (%p12058_p5), [#allocation12], 4294967168 }
  0xc2   : > { %10677 = dma.done.wait (%p12059_p9), [#allocation15], 4112   ;;  %p12060_p1 = pmov %p12057_p0 }
  0xc3   : > { %p12061_p13 = scmp.ne.s32.totalorder %s10795_s23, 0 }
  0xc4   : > { %10679 = vsyncadd (%p12060_p1), [#allocation15], 4294963184 }
  0xc5   : > { %531 = sbr.rel (%p12061_p13) target bundleno = 746 (0x2ea), region = 104 }
  0xca   : > { %v9650_v0 = vld [vmem:[#allocation3 + $0x94] ss:$24 sps:$4 sm:$0xff]   ;;  %v10713_v2 = vmov 0   ;;  %v9654_v3 = vld [vmem:[#allocation3 + $0x90] ss:$24 sps:$4 sm:$0xff]   ;;  %vm677_vm0 = vcmask 523264  }
  0xcb   : > { %v9652_v1 = vld [vmem:[#allocation3 + $0x9c] ss:$24 sps:$4 sm:$0xff]   ;;  %713 = vmatprep.mubr.bf16.mxu0 %v10713_v2  ;;  %754 = vmatprep.mubr.bf16.mxu1 %v10713_v2  ;;  %v9655_v4 = vld [vmem:[#allocation3 + $0x98] ss:$24 sps:$4 sm:$0xff]   ;;  %v9658_v6 = vld [vmem:[#allocation3 + $0x6c] ss:$24 sps:$4 sm:$0xff]  }
  0xcc   : > { %689 = vmatprep.subr.bf16.mxu0 %v9650_v0  ;;  %730 = vmatprep.subr.bf16.mxu1 %v9652_v1  ;;  %v9656_v5 = vld [vmem:[#allocation3 + $0x64] ss:$24 sps:$4 sm:$0xff]   ;;  %v9660_v7 = vld [vmem:[#allocation3 + $0x60] ss:$24 sps:$4 sm:$0xff]   ;;  %v9662_v9 = vld [vmem:[#allocation3 + $0x34] ss:$24 sps:$4 sm:$0xff]  }
  0xcd   : > { %690 = vmatpush1.bf16.msra.mxu0 %v9654_v3  ;;  %731 = vmatpush1.bf16.msra.mxu1 %v9655_v4  ;;  %v9661_v8 = vld [vmem:[#allocation3 + $0x68] ss:$24 sps:$4 sm:$0xff]   ;;  %v9664_v10 = vld [vmem:[#allocation3 + $0x3c] ss:$24 sps:$4 sm:$0xff]   ;;  %v9667_v12 = vld [vmem:[#allocation3 + $0x38] ss:$24 sps:$4 sm:$0xff]  }
  0xce   : > { %691 = vmatprep.subr.bf16.mxu0 %v9656_v5  ;;  %732 = vmatprep.subr.bf16.mxu1 %v9658_v6  ;;  %v9666_v11 = vld [vmem:[#allocation3 + $0x30] ss:$24 sps:$4 sm:$0xff]   ;;  %v9668_v13 = vld [vmem:[#allocation3 + $0x4] ss:$24 sps:$4 sm:$0xff]   ;;  %v9672_v15 = vld [vmem:[#allocation3] ss:$24 sps:$4 sm:$0xff]  }
  0xcf   : > { %v9670_v14 = vld [vmem:[#allocation3 + $0xc] ss:$24 sps:$4 sm:$0xff]   ;;  %v9673_v16 = vld [vmem:[#allocation3 + $0x8] ss:$24 sps:$4 sm:$0xff]  }
  0xd0   : > { %v9676_v17 = vld [vmem:[#allocation3 + $0xa4] ss:$24 sps:$4 sm:$0xff]   ;;  %v532_v18 = vld [vmem:[%s12010_s0] sm:$0xf]  ;;  %v9679_v20 = vld [vmem:[#allocation3 + $0x74] ss:$24 sps:$4 sm:$0xff]  }
  0xd1   : > { %692 = vmatpush1.bf16.msra.mxu0 %v9660_v7  ;;  %733 = vmatpush1.bf16.msra.mxu1 %v9661_v8  ;;  %v9674_v19 = vld [vmem:[#allocation3 + $0xa0] ss:$24 sps:$4 sm:$0xff]   ;;  %v9688_v21 = vld [vmem:[#allocation7 + $0xe4] ss:$16 sps:$4 sm:$0xff]   ;;  %v9677_v23 = vld [vmem:[#allocation3 + $0x70] ss:$24 sps:$4 sm:$0xff]  }
  0xd2   : > { %693 = vmatprep.subr.bf16.mxu0 %v9662_v9  ;;  %734 = vmatprep.subr.bf16.mxu1 %v9664_v10  ;;  %v9686_v22 = vld [vmem:[#allocation7 + $0xe0] ss:$16 sps:$4 sm:$0xff]   ;;  %v9694_v24 = vld [vmem:[#allocation7 + $0xc4] ss:$16 sps:$4 sm:$0xff]  }
  0xd3   : > { %v9682_v25 = vld [vmem:[#allocation3 + $0x44] ss:$24 sps:$4 sm:$0xff]   ;;  %v9692_v26 = vld [vmem:[#allocation7 + $0xc0] ss:$16 sps:$4 sm:$0xff]   ;;  %v9685_v29 = vld [vmem:[#allocation3 + $0x14] ss:$24 sps:$4 sm:$0xff]  }
  0xd4   : > { %v9700_v27 = vld [vmem:[#allocation7 + $0xa4] ss:$16 sps:$4 sm:$0xff]   ;;  %v9680_v28 = vld [vmem:[#allocation3 + $0x40] ss:$24 sps:$4 sm:$0xff]   ;;  %v9683_v32 = vld [vmem:[#allocation3 + $0x10] ss:$24 sps:$4 sm:$0xff]  }
  0xd5   : > { %694 = vmatpush1.bf16.msra.mxu0 %v9666_v11  ;;  %735 = vmatpush1.bf16.msra.mxu1 %v9667_v12  ;;  %v9698_v30 = vld [vmem:[#allocation7 + $0xa0] ss:$16 sps:$4 sm:$0xff]   ;;  %v9706_v31 = vld [vmem:[#allocation7 + $0x84] ss:$16 sps:$4 sm:$0xff]  }
  0xd6   : > { %695 = vmatprep.subr.bf16.mxu0 %v9668_v13  ;;  %736 = vmatprep.subr.bf16.mxu1 %v9670_v14  ;;  %v9691_v33 = vld [vmem:[#allocation7 + $0x2e4] ss:$16 sps:$4 sm:$0xff]   ;;  %v9704_v34 = vld [vmem:[#allocation7 + $0x80] ss:$16 sps:$4 sm:$0xff]  }
  0xd7   : > { %v9712_v35 = vld [vmem:[#allocation7 + $0x64] ss:$16 sps:$4 sm:$0xff]   ;;  %v9689_v36 = vld [vmem:[#allocation7 + $0x2e0] ss:$16 sps:$4 sm:$0xff]  }
  0xd8   : > { %v9697_v37 = vld [vmem:[#allocation7 + $0x2c4] ss:$16 sps:$4 sm:$0xff]   ;;  %v9710_v38 = vld [vmem:[#allocation7 + $0x60] ss:$16 sps:$4 sm:$0xff]  }
  0xd9   : > { %696 = vmatpush1.bf16.msra.mxu0 %v9672_v15  ;;  %737 = vmatpush1.bf16.msra.mxu1 %v9673_v16  ;;  %v9718_v39 = vld [vmem:[#allocation7 + $0x44] ss:$16 sps:$4 sm:$0xff]   ;;  %v9695_v40 = vld [vmem:[#allocation7 + $0x2c0] ss:$16 sps:$4 sm:$0xff]  }
  0xda   : > { %771 = vmatprep.subr.bf16.mxu0 %v9676_v17  ;;  %1984 = vmatprep.subr.bf16.mxu1 %v9688_v21  ;;  %v9703_v41 = vld [vmem:[#allocation7 + $0x2a4] ss:$16 sps:$4 sm:$0xff]   ;;  %v9716_v42 = vld [vmem:[#allocation7 + $0x40] ss:$16 sps:$4 sm:$0xff]  }
  0xdb   : > { %v9724_v43 = vld [vmem:[#allocation7 + $0x24] ss:$16 sps:$4 sm:$0xff]   ;;  %v9701_v44 = vld [vmem:[#allocation7 + $0x2a0] ss:$16 sps:$4 sm:$0xff]  }
  0xdc   : > { %8472 = vmatmul.mubr.msk.bf16.vlgmr.msra.gmra.mxu0 %vm677_vm0, %v532_v18  ;;  %8473 = vmatmul.mubr.msk.bf16.vlgmr.msra.gmra.mxu1 %vm677_vm0, %v532_v18  ;;  %v9709_v45 = vld [vmem:[#allocation7 + $0x284] ss:$16 sps:$4 sm:$0xff]   ;;  %v9722_v46 = vld [vmem:[#allocation7 + $0x20] ss:$16 sps:$4 sm:$0xff]  }
  0xdd   : > { %772 = vmatpush1.bf16.msra.mxu0 %v9674_v19  ;;  %795 = vmatprep.mubr.bf16.mxu0 %v10713_v2  ;;  %v9730_v47 = vld [vmem:[#allocation7 + $0x4] ss:$16 sps:$4 sm:$0xff]   ;;  %v9707_v48 = vld [vmem:[#allocation7 + $0x280] ss:$16 sps:$4 sm:$0xff]  }
  0xde   : > { %773 = vmatprep.subr.bf16.mxu0 %v9679_v20  ;;  %1985 = vmatpush1.bf16.msra.mxu1 %v9686_v22  ;;  %v9715_v49 = vld [vmem:[#allocation7 + $0x264] ss:$16 sps:$4 sm:$0xff]   ;;  %v9728_v50 = vld [vmem:[#allocation7] ss:$16 sps:$4 sm:$0xff]  }
  0xdf   : > { %1986 = vmatprep.subr.bf16.mxu1 %v9694_v24  ;;  %v9736_v51 = vld [vmem:[#allocation7 + $0x1e4] ss:$16 sps:$4 sm:$0xff]   ;;  %v9713_v52 = vld [vmem:[#allocation7 + $0x260] ss:$16 sps:$4 sm:$0xff]  }
  0xe0   : > { %v9721_v53 = vld [vmem:[#allocation7 + $0x244] ss:$16 sps:$4 sm:$0xff]   ;;  %v9734_v54 = vld [vmem:[#allocation7 + $0x1e0] ss:$16 sps:$4 sm:$0xff]  }
  0xe1   : > { %774 = vmatpush1.bf16.msra.mxu0 %v9677_v23  ;;  %v9742_v55 = vld [vmem:[#allocation7 + $0x1c4] ss:$16 sps:$4 sm:$0xff]   ;;  %v9719_v56 = vld [vmem:[#allocation7 + $0x240] ss:$16 sps:$4 sm:$0xff]  }
  0xe2   : > { %775 = vmatprep.subr.bf16.mxu0 %v9682_v25  ;;  %1987 = vmatpush1.bf16.msra.mxu1 %v9692_v26  ;;  %v9727_v57 = vld [vmem:[#allocation7 + $0x224] ss:$16 sps:$4 sm:$0xff]   ;;  %v9725_v58 = vld [vmem:[#allocation7 + $0x220] ss:$16 sps:$4 sm:$0xff]  }
  0xe3   : > { %1988 = vmatprep.subr.bf16.mxu1 %v9700_v27  ;;  %v9740_v59 = vld [vmem:[#allocation7 + $0x1c0] ss:$16 sps:$4 sm:$0xff]   ;;  %v9733_v60 = vld [vmem:[#allocation7 + $0x204] ss:$16 sps:$4 sm:$0xff]   ;;  %v9787_v27 = vld [vmem:[#allocation7 + $0xec] ss:$16 sps:$4 sm:$0xff]  }
  0xe4   : > { %v9748_v61 = vld [vmem:[#allocation7 + $0x1a4] ss:$16 sps:$4 sm:$0xff]   ;;  %v9746_v62 = vld [vmem:[#allocation7 + $0x1a0] ss:$16 sps:$4 sm:$0xff]  }
  0xe5   : > { %776 = vmatpush1.bf16.msra.mxu0 %v9680_v28  ;;  %v9754_v63 = vld [vmem:[#allocation7 + $0x184] ss:$16 sps:$4 sm:$0xff]   ;;  %v9731_v0 = vld [vmem:[#allocation7 + $0x200] ss:$16 sps:$4 sm:$0xff]  }
  0xe6   : > { %777 = vmatprep.subr.bf16.mxu0 %v9685_v29  ;;  %1989 = vmatpush1.bf16.msra.mxu1 %v9698_v30  ;;  %v9739_v1 = vld [vmem:[#allocation7 + $0x3e4] ss:$16 sps:$4 sm:$0xff]   ;;  %v9752_v2 = vld [vmem:[#allocation7 + $0x180] ss:$16 sps:$4 sm:$0xff]  }
  0xe7   : > { %1990 = vmatprep.subr.bf16.mxu1 %v9706_v31  ;;  %v9760_v3 = vld [vmem:[#allocation7 + $0x164] ss:$16 sps:$4 sm:$0xff]   ;;  %v9737_v4 = vld [vmem:[#allocation7 + $0x3e0] ss:$16 sps:$4 sm:$0xff]  }
  0xe8   : > { %v9745_v5 = vld [vmem:[#allocation7 + $0x3c4] ss:$16 sps:$4 sm:$0xff]   ;;  %v9758_v6 = vld [vmem:[#allocation7 + $0x160] ss:$16 sps:$4 sm:$0xff]  }
  0xe9   : > { %778 = vmatpush1.bf16.msra.mxu0 %v9683_v32  ;;  %v9766_v7 = vld [vmem:[#allocation7 + $0x144] ss:$16 sps:$4 sm:$0xff]   ;;  %v9743_v8 = vld [vmem:[#allocation7 + $0x3c0] ss:$16 sps:$4 sm:$0xff]  }
  0xea   : > { %2025 = vmatprep.subr.bf16.mxu0 %v9691_v33  ;;  %1991 = vmatpush1.bf16.msra.mxu1 %v9704_v34  ;;  %v9751_v9 = vld [vmem:[#allocation7 + $0x3a4] ss:$16 sps:$4 sm:$0xff]   ;;  %v9764_v10 = vld [vmem:[#allocation7 + $0x140] ss:$16 sps:$4 sm:$0xff]  }
  0xeb   : > { %1992 = vmatprep.subr.bf16.mxu1 %v9712_v35  ;;  %v9772_v11 = vld [vmem:[#allocation7 + $0x124] ss:$16 sps:$4 sm:$0xff]   ;;  %v9749_v12 = vld [vmem:[#allocation7 + $0x3a0] ss:$16 sps:$4 sm:$0xff]   ;;  %v9785_v35 = vld [vmem:[#allocation7 + $0xe8] ss:$16 sps:$4 sm:$0xff]  }
  0xec   : > { %8474 = vmatmul.mubr.msk.bf16.vlgmr.msra.gmra.mxu0 %vm677_vm0, %v532_v18  ;;  %v9757_v13 = vld [vmem:[#allocation7 + $0x384] ss:$16 sps:$4 sm:$0xff]   ;;  %v9770_v14 = vld [vmem:[#allocation7 + $0x120] ss:$16 sps:$4 sm:$0xff]  }
  0xed   : > { %2026 = vmatpush1.bf16.msra.mxu0 %v9689_v36  ;;  %v9755_v15 = vld [vmem:[#allocation7 + $0x380] ss:$16 sps:$4 sm:$0xff]   ;;  %v9763_v16 = vld [vmem:[#allocation7 + $0x364] ss:$16 sps:$4 sm:$0xff]  }
  0xee   : > { %2027 = vmatprep.subr.bf16.mxu0 %v9697_v37  ;;  %1993 = vmatpush1.bf16.msra.mxu1 %v9710_v38  ;;  %v9761_v17 = vld [vmem:[#allocation7 + $0x360] ss:$16 sps:$4 sm:$0xff]   ;;  %v9769_v18 = vld [vmem:[#allocation7 + $0x344] ss:$16 sps:$4 sm:$0xff]  }
  0xef   : > { %1994 = vmatprep.subr.bf16.mxu1 %v9718_v39  ;;  %v9767_v19 = vld [vmem:[#allocation7 + $0x340] ss:$16 sps:$4 sm:$0xff]   ;;  %v9778_v20 = vld [vmem:[#allocation7 + $0x104] ss:$16 sps:$4 sm:$0xff]  }
  0xf0   : > { %v9775_v21 = vld [vmem:[#allocation7 + $0x324] ss:$16 sps:$4 sm:$0xff]   ;;  %v9776_v22 = vld [vmem:[#allocation7 + $0x100] ss:$16 sps:$4 sm:$0xff]  }
  0xf1   : > { %2028 = vmatpush1.bf16.msra.mxu0 %v9695_v40  ;;  %v9784_v23 = vld [vmem:[#allocation7 + $0x4e4] ss:$16 sps:$4 sm:$0xff]   ;;  %v9773_v24 = vld [vmem:[#allocation7 + $0x320] ss:$16 sps:$4 sm:$0xff]  }
  0xf2   : > { %2029 = vmatprep.subr.bf16.mxu0 %v9703_v41  ;;  %1995 = vmatpush1.bf16.msra.mxu1 %v9716_v42  ;;  %v9781_v25 = vld [vmem:[#allocation7 + $0x304] ss:$16 sps:$4 sm:$0xff]   ;;  %v9779_v26 = vld [vmem:[#allocation7 + $0x300] ss:$16 sps:$4 sm:$0xff]   ;;  %v9793_v41 = vld [vmem:[#allocation7 + $0xcc] ss:$16 sps:$4 sm:$0xff]  }
  0xf3   : > { %1996 = vmatprep.subr.bf16.mxu1 %v9724_v43  ;;  %v9782_v34 = vld [vmem:[#allocation7 + $0x4e0] ss:$16 sps:$4 sm:$0xff]   ;;  %v9790_v40 = vld [vmem:[#allocation7 + $0x4c4] ss:$16 sps:$4 sm:$0xff]  }
  0xf5   : > { %2030 = vmatpush1.bf16.msra.mxu0 %v9701_v44  ;;  %v9788_v44 = vld [vmem:[#allocation7 + $0x4c0] ss:$16 sps:$4 sm:$0xff]  }
  0xf6   : > { %2031 = vmatprep.subr.bf16.mxu0 %v9709_v45  ;;  %1997 = vmatpush1.bf16.msra.mxu1 %v9722_v46  ;;  %v9791_v45 = vld [vmem:[#allocation7 + $0xc8] ss:$16 sps:$4 sm:$0xff]   ;;  %v9796_v46 = vld [vmem:[#allocation7 + $0x4a4] ss:$16 sps:$4 sm:$0xff]  }
  0xf7   : > { %1998 = vmatprep.subr.bf16.mxu1 %v9730_v47  ;;  %v9799_v47 = vld [vmem:[#allocation7 + $0xac] ss:$16 sps:$4 sm:$0xff]  }
  0xf9   : > { %2032 = vmatpush1.bf16.msra.mxu0 %v9707_v48  ;;  %v9794_v48 = vld [vmem:[#allocation7 + $0x4a0] ss:$16 sps:$4 sm:$0xff]  }
  0xfa   : > { %2033 = vmatprep.subr.bf16.mxu0 %v9715_v49  ;;  %1999 = vmatpush1.bf16.msra.mxu1 %v9728_v50  ;;  %v9797_v49 = vld [vmem:[#allocation7 + $0xa8] ss:$16 sps:$4 sm:$0xff]   ;;  %v9802_v50 = vld [vmem:[#allocation7 + $0x484] ss:$16 sps:$4 sm:$0xff]  }
  0xfb   : > { %2000 = vmatprep.subr.bf16.mxu1 %v9736_v51  ;;  %v9805_v51 = vld [vmem:[#allocation7 + $0x8c] ss:$16 sps:$4 sm:$0xff]  }
  0xfd   : > { %2034 = vmatpush1.bf16.msra.mxu0 %v9713_v52  ;;  %v9800_v52 = vld [vmem:[#allocation7 + $0x480] ss:$16 sps:$4 sm:$0xff]  }
  0xfe   : > { %2035 = vmatprep.subr.bf16.mxu0 %v9721_v53  ;;  %2001 = vmatpush2.bf16.msra.mxu1 %v9734_v54  ;;  %v9803_v53 = vld [vmem:[#allocation7 + $0x88] ss:$16 sps:$4 sm:$0xff]   ;;  %v9808_v54 = vld [vmem:[#allocation7 + $0x464] ss:$16 sps:$4 sm:$0xff]  }
  0xff   : > { %2002 = vmatprep.subr.bf16.mxu1 %v9742_v55  ;;  %v9811_v55 = vld [vmem:[#allocation7 + $0x6c] ss:$16 sps:$4 sm:$0xff]  }
 0x101   : > { %2036 = vmatpush1.bf16.msra.mxu0 %v9719_v56 }
 0x102   : > { %2037 = vmatprep.subr.bf16.mxu0 %v9727_v57  ;;  %2003 = vmatpush2.bf16.msra.mxu1 %v9740_v59  ;;  %v9809_v59 = vld [vmem:[#allocation7 + $0x68] ss:$16 sps:$4 sm:$0xff]  }
 0x103   : > { %2004 = vmatprep.subr.bf16.mxu1 %v9748_v61  ;;  %v9814_v61 = vld [vmem:[#allocation7 + $0x444] ss:$16 sps:$4 sm:$0xff]  }
 0x105   : > { %2038 = vmatpush1.bf16.msra.mxu0 %v9725_v58  ;;  %v9806_v58 = vld [vmem:[#allocation7 + $0x460] ss:$16 sps:$4 sm:$0xff]  }
 0x106   : > { %2039 = vmatprep.subr.bf16.mxu0 %v9733_v60  ;;  %2005 = vmatpush2.bf16.msra.mxu1 %v9746_v62  ;;  %v9817_v62 = vld [vmem:[#allocation7 + $0x4c] ss:$16 sps:$4 sm:$0xff]  }
 0x107   : > { %2006 = vmatprep.subr.bf16.mxu1 %v9754_v63 }
 0x109   : > { %2040 = vmatpush1.bf16.msra.mxu0 %v9731_v0 }
 0x10a   : > { %2041 = vmatprep.subr.bf16.mxu0 %v9739_v1  ;;  %2007 = vmatpush2.bf16.msra.mxu1 %v9752_v2  ;;  %v9812_v1 = vld [vmem:[#allocation7 + $0x440] ss:$16 sps:$4 sm:$0xff]   ;;  %v9815_v2 = vld [vmem:[#allocation7 + $0x48] ss:$16 sps:$4 sm:$0xff]  }
 0x10b   : > { %2008 = vmatprep.subr.bf16.mxu1 %v9760_v3  ;;  %v9820_v3 = vld [vmem:[#allocation7 + $0x424] ss:$16 sps:$4 sm:$0xff]  }
 0x10d   : > { %2042 = vmatpush2.bf16.msra.mxu0 %v9737_v4  ;;  %v9823_v4 = vld [vmem:[#allocation7 + $0x2c] ss:$16 sps:$4 sm:$0xff]  }
 0x10e   : > { %2043 = vmatprep.subr.bf16.mxu0 %v9745_v5  ;;  %2009 = vmatpush2.bf16.msra.mxu1 %v9758_v6  ;;  %v9818_v5 = vld [vmem:[#allocation7 + $0x420] ss:$16 sps:$4 sm:$0xff]   ;;  %v9821_v6 = vld [vmem:[#allocation7 + $0x28] ss:$16 sps:$4 sm:$0xff]  }
 0x10f   : > { %2010 = vmatprep.subr.bf16.mxu1 %v9766_v7  ;;  %v9826_v7 = vld [vmem:[#allocation7 + $0x404] ss:$16 sps:$4 sm:$0xff]  }
 0x111   : > { %2044 = vmatpush2.bf16.msra.mxu0 %v9743_v8  ;;  %v9829_v8 = vld [vmem:[#allocation7 + $0xc] ss:$16 sps:$4 sm:$0xff]  }
 0x112   : > { %2045 = vmatprep.subr.bf16.mxu0 %v9751_v9  ;;  %2011 = vmatpush2.bf16.msra.mxu1 %v9764_v10  ;;  %v9824_v9 = vld [vmem:[#allocation7 + $0x400] ss:$16 sps:$4 sm:$0xff]   ;;  %v9827_v10 = vld [vmem:[#allocation7 + $0x8] ss:$16 sps:$4 sm:$0xff]  }
 0x113   : > { %2012 = vmatprep.subr.bf16.mxu1 %v9772_v11  ;;  %v9832_v11 = vld [vmem:[#allocation7 + $0x5e4] ss:$16 sps:$4 sm:$0xff]  }
 0x115   : > { %2046 = vmatpush2.bf16.msra.mxu0 %v9749_v12  ;;  %v9835_v12 = vld [vmem:[#allocation7 + $0x1ec] ss:$16 sps:$4 sm:$0xff]  }
 0x116   : > { %2047 = vmatprep.subr.bf16.mxu0 %v9757_v13  ;;  %2013 = vmatpush2.bf16.msra.mxu1 %v9770_v14  ;;  %v9830_v13 = vld [vmem:[#allocation7 + $0x5e0] ss:$16 sps:$4 sm:$0xff]   ;;  %v9833_v14 = vld [vmem:[#allocation7 + $0x1e8] ss:$16 sps:$4 sm:$0xff]  }
 0x117   : > { %2014 = vmatprep.subr.bf16.mxu1 %v9778_v20  ;;  %v9847_v20 = vld [vmem:[#allocation7 + $0x1ac] ss:$16 sps:$4 sm:$0xff]  }
 0x119   : > { %2048 = vmatpush2.bf16.msra.mxu0 %v9755_v15  ;;  %v9838_v15 = vld [vmem:[#allocation7 + $0x5c4] ss:$16 sps:$4 sm:$0xff]  }
 0x11a   : > { %2049 = vmatprep.subr.bf16.mxu0 %v9763_v16  ;;  %2015 = vmatpush2.bf16.msra.mxu1 %v9776_v22  ;;  %v9841_v16 = vld [vmem:[#allocation7 + $0x1cc] ss:$16 sps:$4 sm:$0xff]   ;;  %v9845_v22 = vld [vmem:[#allocation7 + $0x1a8] ss:$16 sps:$4 sm:$0xff]  }
 0x11b   : > { %2066 = vmatprep.subr.bf16.mxu1 %v9784_v23  ;;  %v9850_v23 = vld [vmem:[#allocation7 + $0x584] ss:$16 sps:$4 sm:$0xff]  }
 0x11d   : > { %2050 = vmatpush2.bf16.msra.mxu0 %v9761_v17  ;;  %v9836_v17 = vld [vmem:[#allocation7 + $0x5c0] ss:$16 sps:$4 sm:$0xff]  }
 0x11e   : > { %2051 = vmatprep.subr.bf16.mxu0 %v9769_v18  ;;  %v9839_v18 = vld [vmem:[#allocation7 + $0x1c8] ss:$16 sps:$4 sm:$0xff]  }
 0x121   : > { %2052 = vmatpush2.bf16.msra.mxu0 %v9767_v19  ;;  %v9844_v19 = vld [vmem:[#allocation7 + $0x5a4] ss:$16 sps:$4 sm:$0xff]  }
 0x122   : > { %2053 = vmatprep.subr.bf16.mxu0 %v9775_v21  ;;  %v9842_v21 = vld [vmem:[#allocation7 + $0x5a0] ss:$16 sps:$4 sm:$0xff]  }
 0x125   : > { %2054 = vmatpush2.bf16.msra.mxu0 %v9773_v24  ;;  %v9853_v24 = vld [vmem:[#allocation7 + $0x18c] ss:$16 sps:$4 sm:$0xff]  }
 0x126   : > { %2055 = vmatprep.subr.bf16.mxu0 %v9781_v25  ;;  %v9848_v25 = vld [vmem:[#allocation7 + $0x580] ss:$16 sps:$4 sm:$0xff]  }
 0x129   : > { %2056 = vmatpush2.bf16.msra.mxu0 %v9779_v26  ;;  %v9851_v26 = vld [vmem:[#allocation7 + $0x188] ss:$16 sps:$4 sm:$0xff]  }
 0x12a   : > { %2107 = vmatprep.subr.bf16.mxu0 %v9787_v27  ;;  %v9856_v27 = vld [vmem:[#allocation7 + $0x564] ss:$16 sps:$4 sm:$0xff]  }
 0x19c   : > { %v715_v28 = vpop.f32.mrf.mxu0  ;;  %v756_v29 = vpop.f32.mrf.mxu1 }
 0x19d   : > { %v11027_v36 = vpack.c.bf16 %v715_v28, %v715_v28  ;;  %v11029_v37 = vpack.c.bf16 %v756_v29, %v756_v29  ;;  %v9859_v28 = vld [vmem:[#allocation7 + $0x16c] ss:$16 sps:$4 sm:$0xff]   ;;  %v9854_v29 = vld [vmem:[#allocation7 + $0x560] ss:$16 sps:$4 sm:$0xff]  }
 0x19e   : > { %v717_v30 = vpop.f32.mrf.mxu0  ;;  %v758_v31 = vpop.f32.mrf.mxu1 }
 0x19f   : > { %v805_v32 = vpack.c.bf16 %v717_v30, %v717_v30  ;;  %v11025_v33 = vpack.c.bf16 %v758_v31, %v758_v31  ;;  %v9857_v30 = vld [vmem:[#allocation7 + $0x168] ss:$16 sps:$4 sm:$0xff]   ;;  %v9862_v31 = vld [vmem:[#allocation7 + $0x544] ss:$16 sps:$4 sm:$0xff]  }
 0x1a0   : > { %v719_v38 = vpop.f32.mrf.mxu0  ;;  %v760_v39 = vpop.f32.mrf.mxu1 }
 0x1a1   : > { %2016 = vmatprep.mubr.bf16.mxu1 %v805_v32  ;;  %2057 = vmatprep.mubr.bf16.mxu0 %v11025_v33  ;;  %v9868_v38 = vld [vmem:[#allocation7 + $0x524] ss:$16 sps:$4 sm:$0xff]   ;;  %v9871_v39 = vld [vmem:[#allocation7 + $0x12c] ss:$16 sps:$4 sm:$0xff]  }
 0x1a2   : > { %v720_v42 = vpop.f32.mrf.mxu0  ;;  %v761_v43 = vpop.f32.mrf.mxu1  ;;  %2017 = vmatmul.mubr.bf16.vlgmr.msra.gmra.mxu1 %v11027_v36  ;;  %2058 = vmatmul.mubr.bf16.vlgmr.msra.gmra.mxu0 %v11029_v37 }
 0x1a3   : > { %2067 = vmatpush1.bf16.msra.mxu1 %v9782_v34  ;;  %2108 = vmatpush1.bf16.msra.mxu0 %v9785_v35  ;;  %v9860_v34 = vld [vmem:[#allocation7 + $0x540] ss:$16 sps:$4 sm:$0xff]   ;;  %v9863_v35 = vld [vmem:[#allocation7 + $0x148] ss:$16 sps:$4 sm:$0xff]   ;;  %v9874_v42 = vld [vmem:[#allocation7 + $0x504] ss:$16 sps:$4 sm:$0xff]  }
 0x1a4   : > { %2139 = vmatprep.mubr.bf16.mxu0 %v805_v32  ;;  %2068 = vmatprep.subr.bf16.mxu1 %v9790_v40  ;;  %v9865_v32 = vld [vmem:[#allocation7 + $0x14c] ss:$16 sps:$4 sm:$0xff]   ;;  %v9866_v40 = vld [vmem:[#allocation7 + $0x520] ss:$16 sps:$4 sm:$0xff]  }
 0x1a5   : > { %2109 = vmatprep.subr.bf16.mxu0 %v9793_v41  ;;  %v9869_v41 = vld [vmem:[#allocation7 + $0x128] ss:$16 sps:$4 sm:$0xff]   ;;  %v9877_v43 = vld [vmem:[#allocation7 + $0x10c] ss:$16 sps:$4 sm:$0xff]  }
 0x1a7   : > { %2069 = vmatpush1.bf16.msra.mxu1 %v9788_v44  ;;  %2110 = vmatpush1.bf16.msra.mxu0 %v9791_v45  ;;  %v9872_v44 = vld [vmem:[#allocation7 + $0x500] ss:$16 sps:$4 sm:$0xff]   ;;  %v9875_v45 = vld [vmem:[#allocation7 + $0x108] ss:$16 sps:$4 sm:$0xff]  }
 0x1a8   : > { %2070 = vmatprep.subr.bf16.mxu1 %v9796_v46  ;;  %2111 = vmatprep.subr.bf16.mxu0 %v9799_v47  ;;  %v9880_v46 = vld [vmem:[#allocation7 + $0x2ec] ss:$16 sps:$4 sm:$0xff]  }
 0x1a9   : > { %v9883_v47 = vld [vmem:[#allocation7 + $0x4ec] ss:$16 sps:$4 sm:$0xff]  }
 0x1ab   : > { %2071 = vmatpush1.bf16.msra.mxu1 %v9794_v48  ;;  %2112 = vmatpush1.bf16.msra.mxu0 %v9797_v49  ;;  %v9878_v48 = vld [vmem:[#allocation7 + $0x2e8] ss:$16 sps:$4 sm:$0xff]  }
 0x1ac   : > { %2072 = vmatprep.subr.bf16.mxu1 %v9802_v50  ;;  %2113 = vmatprep.subr.bf16.mxu0 %v9805_v51  ;;  %v11034_v56 = vpop.f32.mrf.mxu0  ;;  %v9881_v50 = vld [vmem:[#allocation7 + $0x4e8] ss:$16 sps:$4 sm:$0xff]   ;;  %v9886_v51 = vld [vmem:[#allocation7 + $0x2cc] ss:$16 sps:$4 sm:$0xff]  }
 0x1ad   : > { %v11041_v49 = vpack.c.bf16 %v11034_v56, %v11034_v56  ;;  %v9895_v56 = vld [vmem:[#allocation7 + $0x4ac] ss:$16 sps:$4 sm:$0xff]  }
 0x1ae   : > { %v799_v57 = vpop.f32.mrf.mxu0 }
 0x1af   : > { %2073 = vmatpush1.bf16.msra.mxu1 %v9800_v52  ;;  %2114 = vmatpush1.bf16.msra.mxu0 %v9803_v53  ;;  %v11036_v60 = vpack.c.bf16 %v799_v57, %v799_v57  ;;  %v9889_v52 = vld [vmem:[#allocation7 + $0x4cc] ss:$16 sps:$4 sm:$0xff]   ;;  %v9884_v53 = vld [vmem:[#allocation7 + $0x2c8] ss:$16 sps:$4 sm:$0xff]  }
 0x1b0   : > { %2074 = vmatprep.subr.bf16.mxu1 %v9808_v54  ;;  %2115 = vmatprep.subr.bf16.mxu0 %v9811_v55  ;;  %v801_v63 = vpop.f32.mrf.mxu0  ;;  %v9887_v54 = vld [vmem:[#allocation7 + $0x4c8] ss:$16 sps:$4 sm:$0xff]   ;;  %v9892_v55 = vld [vmem:[#allocation7 + $0x2ac] ss:$16 sps:$4 sm:$0xff]  }
 0x1b1   : > { %2098 = vmatprep.mubr.bf16.mxu1 %v11036_v60  ;;  %v9890_v57 = vld [vmem:[#allocation7 + $0x2a8] ss:$16 sps:$4 sm:$0xff]  }
 0x1b2   : > { %v802_v0 = vpop.f32.mrf.mxu0  ;;  %v9902_v63 = vld [vmem:[#allocation7 + $0x268] ss:$16 sps:$4 sm:$0xff]  }
 0x1b3   : > { %2075 = vmatpush1.bf16.msra.mxu1 %v9806_v58  ;;  %2116 = vmatpush1.bf16.msra.mxu0 %v9809_v59  ;;  %v9893_v58 = vld [vmem:[#allocation7 + $0x4a8] ss:$16 sps:$4 sm:$0xff]   ;;  %v9898_v59 = vld [vmem:[#allocation7 + $0x28c] ss:$16 sps:$4 sm:$0xff]  }
 0x1b4   : > { %2076 = vmatprep.subr.bf16.mxu1 %v9814_v61  ;;  %2117 = vmatprep.subr.bf16.mxu0 %v9817_v62  ;;  %v9896_v61 = vld [vmem:[#allocation7 + $0x288] ss:$16 sps:$4 sm:$0xff]   ;;  %v9904_v62 = vld [vmem:[#allocation7 + $0x26c] ss:$16 sps:$4 sm:$0xff]  }
 0x1b5   : > { %v9905_v0 = vld [vmem:[#allocation7 + $0x468] ss:$16 sps:$4 sm:$0xff]  }
 0x1b7   : > { %2077 = vmatpush1.bf16.msra.mxu1 %v9812_v1  ;;  %2118 = vmatpush1.bf16.msra.mxu0 %v9815_v2  ;;  %v9910_v1 = vld [vmem:[#allocation7 + $0x24c] ss:$16 sps:$4 sm:$0xff]  }
 0x1b8   : > { %2078 = vmatprep.subr.bf16.mxu1 %v9820_v3  ;;  %2119 = vmatprep.subr.bf16.mxu0 %v9823_v4  ;;  %v9913_v2 = vld [vmem:[#allocation7 + $0x44c] ss:$16 sps:$4 sm:$0xff]   ;;  %v9908_v3 = vld [vmem:[#allocation7 + $0x248] ss:$16 sps:$4 sm:$0xff]  }
 0x1b9   : > { %v9911_v4 = vld [vmem:[#allocation7 + $0x448] ss:$16 sps:$4 sm:$0xff]  }
 0x1bb   : > { %2079 = vmatpush1.bf16.msra.mxu1 %v9818_v5  ;;  %2120 = vmatpush1.bf16.msra.mxu0 %v9821_v6  ;;  %v9916_v5 = vld [vmem:[#allocation7 + $0x22c] ss:$16 sps:$4 sm:$0xff]  }
 0x1bc   : > { %2080 = vmatprep.subr.bf16.mxu1 %v9826_v7  ;;  %2121 = vmatprep.subr.bf16.mxu0 %v9829_v8  ;;  %v9919_v6 = vld [vmem:[#allocation7 + $0x42c] ss:$16 sps:$4 sm:$0xff]   ;;  %v9914_v7 = vld [vmem:[#allocation7 + $0x228] ss:$16 sps:$4 sm:$0xff]  }
 0x1bd   : > { %v9917_v8 = vld [vmem:[#allocation7 + $0x428] ss:$16 sps:$4 sm:$0xff]  }
 0x1bf   : > { %2081 = vmatpush1.bf16.msra.mxu1 %v9824_v9  ;;  %2122 = vmatpush1.bf16.msra.mxu0 %v9827_v10  ;;  %v9922_v9 = vld [vmem:[#allocation7 + $0x20c] ss:$16 sps:$4 sm:$0xff]  }
 0x1c0   : > { %2082 = vmatprep.subr.bf16.mxu1 %v9832_v11  ;;  %2123 = vmatprep.subr.bf16.mxu0 %v9835_v12  ;;  %v9925_v10 = vld [vmem:[#allocation7 + $0x40c] ss:$16 sps:$4 sm:$0xff]   ;;  %v9920_v11 = vld [vmem:[#allocation7 + $0x208] ss:$16 sps:$4 sm:$0xff]  }
 0x1c1   : > { %v9923_v12 = vld [vmem:[#allocation7 + $0x408] ss:$16 sps:$4 sm:$0xff]  }
 0x1c3   : > { %2083 = vmatpush2.bf16.msra.mxu1 %v9830_v13  ;;  %2124 = vmatpush2.bf16.msra.mxu0 %v9833_v14  ;;  %v9928_v13 = vld [vmem:[#allocation7 + $0x3ec] ss:$16 sps:$4 sm:$0xff]  }
 0x1c4   : > { %2084 = vmatprep.subr.bf16.mxu1 %v9838_v15  ;;  %2125 = vmatprep.subr.bf16.mxu0 %v9841_v16  ;;  %v9931_v14 = vld [vmem:[#allocation7 + $0x5ec] ss:$16 sps:$4 sm:$0xff]   ;;  %v9926_v15 = vld [vmem:[#allocation7 + $0x3e8] ss:$16 sps:$4 sm:$0xff]  }
 0x1c5   : > { %v9929_v16 = vld [vmem:[#allocation7 + $0x5e8] ss:$16 sps:$4 sm:$0xff]  }
 0x1c7   : > { %2085 = vmatpush2.bf16.msra.mxu1 %v9836_v17  ;;  %2126 = vmatpush2.bf16.msra.mxu0 %v9839_v18  ;;  %v9934_v17 = vld [vmem:[#allocation7 + $0x3cc] ss:$16 sps:$4 sm:$0xff]  }
 0x1c8   : > { %2086 = vmatprep.subr.bf16.mxu1 %v9844_v19  ;;  %2127 = vmatprep.subr.bf16.mxu0 %v9847_v20  ;;  %v9937_v18 = vld [vmem:[#allocation7 + $0x5cc] ss:$16 sps:$4 sm:$0xff]   ;;  %v9932_v19 = vld [vmem:[#allocation7 + $0x3c8] ss:$16 sps:$4 sm:$0xff]  }
 0x1c9   : > { %v9935_v20 = vld [vmem:[#allocation7 + $0x5c8] ss:$16 sps:$4 sm:$0xff]  }
 0x1cb   : > { %2087 = vmatpush2.bf16.msra.mxu1 %v9842_v21  ;;  %2128 = vmatpush2.bf16.msra.mxu0 %v9845_v22  ;;  %v9940_v21 = vld [vmem:[#allocation7 + $0x3ac] ss:$16 sps:$4 sm:$0xff]  }
 0x1cc   : > { %2088 = vmatprep.subr.bf16.mxu1 %v9850_v23  ;;  %2129 = vmatprep.subr.bf16.mxu0 %v9853_v24  ;;  %v9943_v22 = vld [vmem:[#allocation7 + $0x5ac] ss:$16 sps:$4 sm:$0xff]   ;;  %v9938_v23 = vld [vmem:[#allocation7 + $0x3a8] ss:$16 sps:$4 sm:$0xff]  }
 0x1cd   : > { %v9941_v24 = vld [vmem:[#allocation7 + $0x5a8] ss:$16 sps:$4 sm:$0xff]  }
 0x1cf   : > { %2089 = vmatpush2.bf16.msra.mxu1 %v9848_v25  ;;  %2130 = vmatpush2.bf16.msra.mxu0 %v9851_v26  ;;  %v9946_v25 = vld [vmem:[#allocation7 + $0x38c] ss:$16 sps:$4 sm:$0xff]  }
 0x1d0   : > { %2090 = vmatprep.subr.bf16.mxu1 %v9856_v27  ;;  %2131 = vmatprep.subr.bf16.mxu0 %v9859_v28  ;;  %v9949_v26 = vld [vmem:[#allocation7 + $0x58c] ss:$16 sps:$4 sm:$0xff]   ;;  %v9944_v27 = vld [vmem:[#allocation7 + $0x388] ss:$16 sps:$4 sm:$0xff]  }
 0x1d1   : > { %v9947_v28 = vld [vmem:[#allocation7 + $0x588] ss:$16 sps:$4 sm:$0xff]  }
 0x1d3   : > { %2091 = vmatpush2.bf16.msra.mxu1 %v9854_v29  ;;  %2132 = vmatpush2.bf16.msra.mxu0 %v9857_v30  ;;  %v9952_v29 = vld [vmem:[#allocation7 + $0x36c] ss:$16 sps:$4 sm:$0xff]  }
 0x1d4   : > { %2092 = vmatprep.subr.bf16.mxu1 %v9862_v31  ;;  %2133 = vmatprep.subr.bf16.mxu0 %v9865_v32  ;;  %v9955_v30 = vld [vmem:[#allocation7 + $0x56c] ss:$16 sps:$4 sm:$0xff]   ;;  %v9950_v31 = vld [vmem:[#allocation7 + $0x368] ss:$16 sps:$4 sm:$0xff]  }
 0x1d5   : > { %v9953_v32 = vld [vmem:[#allocation7 + $0x568] ss:$16 sps:$4 sm:$0xff]  }
 0x1d7   : > { %2093 = vmatpush2.bf16.msra.mxu1 %v9860_v34  ;;  %2134 = vmatpush2.bf16.msra.mxu0 %v9863_v35  ;;  %v9958_v34 = vld [vmem:[#allocation7 + $0x34c] ss:$16 sps:$4 sm:$0xff]  }
 0x1d8   : > { %2094 = vmatprep.subr.bf16.mxu1 %v9868_v38  ;;  %2135 = vmatprep.subr.bf16.mxu0 %v9871_v39  ;;  %v9961_v35 = vld [vmem:[#allocation7 + $0x54c] ss:$16 sps:$4 sm:$0xff]   ;;  %v9956_v38 = vld [vmem:[#allocation7 + $0x348] ss:$16 sps:$4 sm:$0xff]  }
 0x1d9   : > { %v9959_v39 = vld [vmem:[#allocation7 + $0x548] ss:$16 sps:$4 sm:$0xff]  }
 0x1db   : > { %2095 = vmatpush2.bf16.msra.mxu1 %v9866_v40  ;;  %2136 = vmatpush2.bf16.msra.mxu0 %v9869_v41  ;;  %v9964_v40 = vld [vmem:[#allocation7 + $0x32c] ss:$16 sps:$4 sm:$0xff]  }
 0x1dc   : > { %2096 = vmatprep.subr.bf16.mxu1 %v9874_v42  ;;  %2137 = vmatprep.subr.bf16.mxu0 %v9877_v43  ;;  %v9967_v41 = vld [vmem:[#allocation7 + $0x52c] ss:$16 sps:$4 sm:$0xff]   ;;  %v9962_v42 = vld [vmem:[#allocation7 + $0x328] ss:$16 sps:$4 sm:$0xff]  }
 0x1dd   : > { %v9965_v43 = vld [vmem:[#allocation7 + $0x528] ss:$16 sps:$4 sm:$0xff]  }
 0x1df   : > { %2097 = vmatpush2.bf16.msra.mxu1 %v9872_v44  ;;  %2138 = vmatpush2.bf16.msra.mxu0 %v9875_v45  ;;  %v9970_v44 = vld [vmem:[#allocation7 + $0x30c] ss:$16 sps:$4 sm:$0xff]  }
 0x1e0   : > { %2148 = vmatprep.subr.bf16.mxu1 %v9880_v46  ;;  %2189 = vmatprep.subr.bf16.mxu0 %v9883_v47  ;;  %v9973_v45 = vld [vmem:[#allocation7 + $0x50c] ss:$16 sps:$4 sm:$0xff]   ;;  %v9968_v46 = vld [vmem:[#allocation7 + $0x308] ss:$16 sps:$4 sm:$0xff]  }
 0x1e1   : > { %v9971_v47 = vld [vmem:[#allocation7 + $0x508] ss:$16 sps:$4 sm:$0xff]  }
 0x1e2   : > { %2099 = vmatmul.mubr.bf16.vlgmr.msra.gmra.mxu1 %v11041_v49  ;;  %2140 = vmatmul.mubr.bf16.vlgmr.msra.gmra.mxu0 %v11027_v36  ;;  %v9901_v36 = vld [vmem:[#allocation7 + $0x48c] ss:$16 sps:$4 sm:$0xff]  }
 0x1e3   : > { %2149 = vmatpush1.bf16.msra.mxu1 %v9878_v48  ;;  %2180 = vmatprep.mubr.bf16.mxu1 %v11025_v33  ;;  %v9899_v33 = vld [vmem:[#allocation7 + $0x488] ss:$16 sps:$4 sm:$0xff]  }
 0x1e4   : > { %2190 = vmatpush1.bf16.msra.mxu0 %v9881_v50  ;;  %2221 = vmatprep.mubr.bf16.mxu0 %v11036_v60  ;;  %v9907_v60 = vld [vmem:[#allocation7 + $0x46c] ss:$16 sps:$4 sm:$0xff]  }
 0x1e5   : > { %2150 = vmatprep.subr.bf16.mxu1 %v9886_v51  ;;  %2191 = vmatprep.subr.bf16.mxu0 %v9889_v52 }
 0x1e7   : > { %2151 = vmatpush1.bf16.msra.mxu1 %v9884_v53 }
 0x1e8   : > { %2192 = vmatpush1.bf16.msra.mxu0 %v9887_v54  ;;  %2152 = vmatprep.subr.bf16.mxu1 %v9892_v55 }
 0x1e9   : > { %2193 = vmatprep.subr.bf16.mxu0 %v9895_v56 }
 0x1eb   : > { %2153 = vmatpush1.bf16.msra.mxu1 %v9890_v57  ;;  %v1004_v57 = vlaneseq }
 0x1ec   : > { %2194 = vmatpush1.bf16.msra.mxu0 %v9893_v58  ;;  %2154 = vmatprep.subr.bf16.mxu1 %v9898_v59 }
 0x1ed   : > { %2195 = vmatprep.subr.bf16.mxu0 %v9901_v36  ;;  %v1005_v58 = vshrl.u32 %v1004_v57, 7  ;;  %v1002_v36 = vld [vmem:[#allocation10] sm:$0xf] }
 0x1ef   : > { %2155 = vmatpush1.bf16.msra.mxu1 %v9896_v61  ;;  %v1006_v59 = vsub.s32 0, %v1005_v58  ;;  %v1010_v61 = vsub.s32 1, %v1005_v58 }
 0x1f0   : > { %2196 = vmatpush1.bf16.msra.mxu0 %v9899_v33  ;;  %2156 = vmatprep.subr.bf16.mxu1 %v9904_v62 }
 0x1f1   : > { %2197 = vmatprep.subr.bf16.mxu0 %v9907_v60  ;;  %v1007_v33 = vrot.slane %v1002_v36, %v1006_v59  ;;  %v1011_v62 = vrot.slane %v1002_v36, %v1010_v61 }
 0x1f3   : > { %2157 = vmatpush1.bf16.msra.mxu1 %v9902_v63 }
 0x1f4   : > { %2198 = vmatpush1.bf16.msra.mxu0 %v9905_v0  ;;  %2158 = vmatprep.subr.bf16.mxu1 %v9910_v1 }
 0x1f5   : > { %2199 = vmatprep.subr.bf16.mxu0 %v9913_v2 }
 0x1f7   : > { %2159 = vmatpush1.bf16.msra.mxu1 %v9908_v3 }
 0x1f8   : > { %2200 = vmatpush1.bf16.msra.mxu0 %v9911_v4  ;;  %2160 = vmatprep.subr.bf16.mxu1 %v9916_v5 }
 0x1f9   : > { %2201 = vmatprep.subr.bf16.mxu0 %v9919_v6 }
 0x1fb   : > { %2161 = vmatpush1.bf16.msra.mxu1 %v9914_v7 }
 0x1fc   : > { %2202 = vmatpush1.bf16.msra.mxu0 %v9917_v8  ;;  %2162 = vmatprep.subr.bf16.mxu1 %v9922_v9 }
 0x1fd   : > { %2203 = vmatprep.subr.bf16.mxu0 %v9925_v10  ;;  %v1014_v10 = vsub.s32 2, %v1005_v58 }
 0x1ff   : > { %2163 = vmatpush1.bf16.msra.mxu1 %v9920_v11  ;;  %v1018_v11 = vsub.s32 3, %v1005_v58 }
 0x200   : > { %2204 = vmatpush1.bf16.msra.mxu0 %v9923_v12  ;;  %2164 = vmatprep.subr.bf16.mxu1 %v9928_v13  ;;  %v1015_v12 = vrot.slane %v1002_v36, %v1014_v10 }
 0x201   : > { %2205 = vmatprep.subr.bf16.mxu0 %v9931_v14  ;;  %v1019_v13 = vrot.slane %v1002_v36, %v1018_v11 }
 0x203   : > { %2165 = vmatpush2.bf16.msra.mxu1 %v9926_v15 }
 0x204   : > { %2206 = vmatpush2.bf16.msra.mxu0 %v9929_v16  ;;  %2166 = vmatprep.subr.bf16.mxu1 %v9934_v17 }
 0x205   : > { %2207 = vmatprep.subr.bf16.mxu0 %v9937_v18 }
 0x207   : > { %2167 = vmatpush2.bf16.msra.mxu1 %v9932_v19 }
 0x208   : > { %2208 = vmatpush2.bf16.msra.mxu0 %v9935_v20  ;;  %2168 = vmatprep.subr.bf16.mxu1 %v9940_v21 }
 0x209   : > { %2209 = vmatprep.subr.bf16.mxu0 %v9943_v22 }
 0x20b   : > { %2169 = vmatpush2.bf16.msra.mxu1 %v9938_v23 }
 0x20c   : > { %2210 = vmatpush2.bf16.msra.mxu0 %v9941_v24  ;;  %2170 = vmatprep.subr.bf16.mxu1 %v9946_v25 }
 0x20d   : > { %2211 = vmatprep.subr.bf16.mxu0 %v9949_v26 }
 0x20f   : > { %2171 = vmatpush2.bf16.msra.mxu1 %v9944_v27 }
 0x210   : > { %2212 = vmatpush2.bf16.msra.mxu0 %v9947_v28  ;;  %2172 = vmatprep.subr.bf16.mxu1 %v9952_v29 }
 0x211   : > { %2213 = vmatprep.subr.bf16.mxu0 %v9955_v30 }
 0x213   : > { %2173 = vmatpush2.bf16.msra.mxu1 %v9950_v31 }
 0x214   : > { %2214 = vmatpush2.bf16.msra.mxu0 %v9953_v32  ;;  %2174 = vmatprep.subr.bf16.mxu1 %v9958_v34 }
 0x215   : > { %2215 = vmatprep.subr.bf16.mxu0 %v9961_v35 }
 0x217   : > { %2175 = vmatpush2.bf16.msra.mxu1 %v9956_v38 }
 0x218   : > { %2216 = vmatpush2.bf16.msra.mxu0 %v9959_v39  ;;  %2176 = vmatprep.subr.bf16.mxu1 %v9964_v40 }
 0x219   : > { %2217 = vmatprep.subr.bf16.mxu0 %v9967_v41 }
 0x21b   : > { %2177 = vmatpush2.bf16.msra.mxu1 %v9962_v42 }
 0x21c   : > { %2218 = vmatpush2.bf16.msra.mxu0 %v9965_v43  ;;  %2178 = vmatprep.subr.bf16.mxu1 %v9970_v44 }
 0x21d   : > { %2219 = vmatprep.subr.bf16.mxu0 %v9973_v45 }
 0x21f   : > { %2179 = vmatpush2.bf16.msra.mxu1 %v9968_v46 }
 0x220   : > { %2220 = vmatpush2.bf16.msra.mxu0 %v9971_v47 }
 0x222   : > { %2181 = vmatmul.mubr.bf16.vlgmr.msra.gmra.mxu1 %v11029_v37 }
 0x223   : > { %2222 = vmatmul.mubr.bf16.vlgmr.msra.gmra.mxu0 %v11041_v49 }
 0x262   : > { %v2018_v48 = vpop.f32.mrf.mxu1  ;;  %v2059_v50 = vpop.f32.mrf.mxu0 }
 0x263   : > { %v2019_v60 = vadd.f32 %v2018_v48, %v1007_v33 }
 0x264   : > { %v2020_v51 = vpop.f32.mrf.mxu1  ;;  %v2061_v52 = vpop.f32.mrf.mxu0 }
 0x265   : > { %v2021_v63 = vadd.f32 %v2020_v51, %v1011_v62  ;;  %v2060_v37 = vadd.f32 %v2059_v50, %v2019_v60 }
 0x266   : > { %v2022_v53 = vpop.f32.mrf.mxu1  ;;  %v2063_v54 = vpop.f32.mrf.mxu0 }
 0x267   : > { %v2062_v1 = vadd.f32 %v2061_v52, %v2021_v63 }
 0x268   : > { %v2023_v55 = vpop.f32.mrf.mxu1  ;;  %v2064_v56 = vpop.f32.mrf.mxu0 }
 0x2a2   : > { %v2100_v0 = vpop.f32.mrf.mxu1  ;;  %v2141_v49 = vpop.f32.mrf.mxu0 }
 0x2a3   : > { %v2101_v2 = vadd.f32 %v2100_v0, %v2060_v37  ;;  %v2142_v14 = vadd.f32 %v2141_v49, %v1015_v12 }
 0x2a4   : > { %v2102_v3 = vpop.f32.mrf.mxu1  ;;  %v2143_v4 = vpop.f32.mrf.mxu0 }
 0x2a5   : > { %2230 = vst [vmem:[#allocation2 + $0x10] sm:$0xff] %v2101_v2  ;;  %v2103_v5 = vadd.f32 %v2102_v3, %v2062_v1  ;;  %v2144_v16 = vadd.f32 %v2143_v4, %v1019_v13 }
 0x2a6   : > { %v2104_v6 = vpop.f32.mrf.mxu1  ;;  %v2145_v7 = vpop.f32.mrf.mxu0 }
 0x2a7   : > { %2231 = vst [vmem:[#allocation2] sm:$0xff] %v2103_v5 }
 0x2a8   : > { %v2105_v8 = vpop.f32.mrf.mxu1  ;;  %v2146_v9 = vpop.f32.mrf.mxu0 }
 0x2e2   : > { %v2182_v15 = vpop.f32.mrf.mxu1 }
 0x2e3   : > { %v2183_v17 = vadd.f32 %v2182_v15, %v2142_v14  ;;  %v2223_v18 = vpop.f32.mrf.mxu0 }
 0x2e4   : > { %v2184_v19 = vpop.f32.mrf.mxu1 }
 0x2e5   : > { %v2224_v20 = vadd.f32 %v2223_v18, %v2183_v17  ;;  %v2185_v21 = vadd.f32 %v2184_v19, %v2144_v16  ;;  %v2225_v22 = vpop.f32.mrf.mxu0 }
 0x2e6   : > { %v2186_v23 = vpop.f32.mrf.mxu1 }
 0x2e7   : > { %2232 = vst [vmem:[#allocation2 + $0x18] sm:$0xff] %v2224_v20  ;;  %v2226_v24 = vadd.f32 %v2225_v22, %v2185_v21  ;;  %v2227_v25 = vpop.f32.mrf.mxu0 }
 0x2e8   : > { %v2187_v26 = vpop.f32.mrf.mxu1 }
 0x2e9   : > { %2233 = vst [vmem:[#allocation2 + $0x8] sm:$0xff] %v2226_v24  ;;  %v2228_v27 = vpop.f32.mrf.mxu0 }
 0x2ea PF: > { %v2294_v28 = vld [vmem:[%s10989_s14 + $0x1c0] sm:$0xff]  ;;  %v11085_v18 = vld [vmem:[%s12011_s1 + $0x8] sm:$0xff]  ;;  %p9443_p10 = scmp.ne.s32.totalorder %s10795_s23, 1 }
 0x2eb   : > { %v2298_v29 = vld [vmem:[%s10989_s14 + $0x1e0] sm:$0xff]  ;;  %v11095_v23 = vcombine.high %v11085_v18, %v11085_v18 }
 0x2ec   : > { %v2422_v30 = vld [vmem:[%s10989_s14 + $0x5c0] sm:$0xff]  ;;  %v8732_v31 = vcombine.high %v2294_v28, %v2298_v29  ;;  %v8731_v34 = vcombine.low %v2294_v28, %v2298_v29 }
 0x2ed   : > { %v2426_v32 = vld [vmem:[%s10989_s14 + $0x5e0] sm:$0xff]  ;;  %5411 = vmatprep.mubr.bf16.mxu1 %v11095_v23 }
 0x2ee   : > { %v2286_v35 = vld [vmem:[%s10989_s14 + $0x180] sm:$0xff]  ;;  %v8860_v39 = vcombine.high %v2422_v30, %v2426_v32  ;;  %v8859_v40 = vcombine.low %v2422_v30, %v2426_v32  ;;  %5338 = vmatprep.subr.bf16.mxu0 %v8732_v31 }
 0x2ef   : > { %v2290_v38 = vld [vmem:[%s10989_s14 + $0x1a0] sm:$0xff]  ;;  %5339 = vmatpush1.bf16.msra.mxu0 %v8731_v34 }
 0x2f0   : > { %v8724_v41 = vcombine.high %v2286_v35, %v2290_v38  ;;  %v2414_v42 = vld [vmem:[%s10989_s14 + $0x580] sm:$0xff]  ;;  %5379 = vmatprep.subr.bf16.mxu1 %v8860_v39  ;;  %v8723_v50 = vcombine.low %v2286_v35, %v2290_v38 }
 0x2f1   : > { %v2418_v43 = vld [vmem:[%s10989_s14 + $0x5a0] sm:$0xff]  ;;  %5380 = vmatpush1.bf16.msra.mxu1 %v8859_v40 }
 0x2f2   : > { %v2278_v44 = vld [vmem:[%s10989_s14 + $0x140] sm:$0xff]  ;;  %v8852_v45 = vcombine.high %v2414_v42, %v2418_v43  ;;  %5340 = vmatprep.subr.bf16.mxu0 %v8724_v41  ;;  %v8851_v51 = vcombine.low %v2414_v42, %v2418_v43 }
 0x2f3   : > { %v2282_v46 = vld [vmem:[%s10989_s14 + $0x160] sm:$0xff]  ;;  %5341 = vmatpush1.bf16.msra.mxu0 %v8723_v50 }
 0x2f4   : > { %v2406_v47 = vld [vmem:[%s10989_s14 + $0x540] sm:$0xff]  ;;  %v8716_v52 = vcombine.high %v2278_v44, %v2282_v46  ;;  %5381 = vmatprep.subr.bf16.mxu1 %v8852_v45  ;;  %v8715_v58 = vcombine.low %v2278_v44, %v2282_v46 }
 0x2f5   : > { %v2410_v48 = vld [vmem:[%s10989_s14 + $0x560] sm:$0xff]  ;;  %5382 = vmatpush1.bf16.msra.mxu1 %v8851_v51 }
 0x2f6   : > { %v8844_v53 = vcombine.high %v2406_v47, %v2410_v48  ;;  %v2270_v54 = vld [vmem:[%s10989_s14 + $0x100] sm:$0xff]  ;;  %5342 = vmatprep.subr.bf16.mxu0 %v8716_v52  ;;  %v8843_v59 = vcombine.low %v2406_v47, %v2410_v48 }
 0x2f7   : > { %v2274_v55 = vld [vmem:[%s10989_s14 + $0x120] sm:$0xff]  ;;  %5343 = vmatpush1.bf16.msra.mxu0 %v8715_v58 }
 0x2f8   : > { %v2398_v56 = vld [vmem:[%s10989_s14 + $0x500] sm:$0xff]  ;;  %v8708_v36 = vcombine.high %v2270_v54, %v2274_v55  ;;  %5383 = vmatprep.subr.bf16.mxu1 %v8844_v53  ;;  %v8707_v37 = vcombine.low %v2270_v54, %v2274_v55 }
 0x2f9   : > { %v2402_v57 = vld [vmem:[%s10989_s14 + $0x520] sm:$0xff]  ;;  %5384 = vmatpush1.bf16.msra.mxu1 %v8843_v59 }
 0x2fa   : > { %v8836_v61 = vcombine.high %v2398_v56, %v2402_v57  ;;  %v2262_v33 = vld [vmem:[%s10989_s14 + $0xc0] sm:$0xff]  ;;  %5344 = vmatprep.subr.bf16.mxu0 %v8708_v36  ;;  %v8835_v0 = vcombine.low %v2398_v56, %v2402_v57 }
 0x2fb   : > { %v2266_v62 = vld [vmem:[%s10989_s14 + $0xe0] sm:$0xff]  ;;  %5345 = vmatpush1.bf16.msra.mxu0 %v8707_v37 }
 0x2fc   : > { %v2390_v60 = vld [vmem:[%s10989_s14 + $0x4c0] sm:$0xff]  ;;  %v8700_v49 = vcombine.high %v2262_v33, %v2266_v62  ;;  %5385 = vmatprep.subr.bf16.mxu1 %v8836_v61  ;;  %v8699_v6 = vcombine.low %v2262_v33, %v2266_v62 }
 0x2fd   : > { %v2394_v63 = vld [vmem:[%s10989_s14 + $0x4e0] sm:$0xff]  ;;  %5386 = vmatpush1.bf16.msra.mxu1 %v8835_v0 }
 0x2fe   : > { %v8828_v1 = vcombine.high %v2390_v60, %v2394_v63  ;;  %v2254_v2 = vld [vmem:[%s10989_s14 + $0x80] sm:$0xff]  ;;  %5346 = vmatprep.subr.bf16.mxu0 %v8700_v49  ;;  %v8827_v7 = vcombine.low %v2390_v60, %v2394_v63 }
 0x2ff   : > { %v2258_v3 = vld [vmem:[%s10989_s14 + $0xa0] sm:$0xff]  ;;  %5347 = vmatpush1.bf16.msra.mxu0 %v8699_v6 }
 0x300   : > { %v2382_v4 = vld [vmem:[%s10989_s14 + $0x480] sm:$0xff]  ;;  %v8692_v8 = vcombine.high %v2254_v2, %v2258_v3  ;;  %5387 = vmatprep.subr.bf16.mxu1 %v8828_v1  ;;  %v8691_v14 = vcombine.low %v2254_v2, %v2258_v3 }
 0x301   : > { %v2386_v5 = vld [vmem:[%s10989_s14 + $0x4a0] sm:$0xff]  ;;  %5388 = vmatpush1.bf16.msra.mxu1 %v8827_v7 }
 0x302   : > { %v8820_v9 = vcombine.high %v2382_v4, %v2386_v5  ;;  %v2246_v10 = vld [vmem:[%s10989_s14 + $0x40] sm:$0xff]  ;;  %5348 = vmatprep.subr.bf16.mxu0 %v8692_v8  ;;  %v8819_v15 = vcombine.low %v2382_v4, %v2386_v5 }
 0x303   : > { %v2250_v11 = vld [vmem:[%s10989_s14 + $0x60] sm:$0xff]  ;;  %5349 = vmatpush1.bf16.msra.mxu0 %v8691_v14 }
 0x304   : > { %v2374_v12 = vld [vmem:[%s10989_s14 + $0x440] sm:$0xff]  ;;  %v8684_v16 = vcombine.high %v2246_v10, %v2250_v11  ;;  %5389 = vmatprep.subr.bf16.mxu1 %v8820_v9  ;;  %v8683_v26 = vcombine.low %v2246_v10, %v2250_v11 }
 0x305   : > { %v2378_v13 = vld [vmem:[%s10989_s14 + $0x460] sm:$0xff]  ;;  %5390 = vmatpush1.bf16.msra.mxu1 %v8819_v15 }
 0x306   : > { %v11080_v17 = vld [vmem:[%s12011_s1] sm:$0xff]  ;;  %v8812_v19 = vcombine.high %v2374_v12, %v2378_v13  ;;  %5350 = vmatprep.subr.bf16.mxu0 %v8684_v16  ;;  %v8811_v27 = vcombine.low %v2374_v12, %v2378_v13 }
 0x307   : > { %v2238_v20 = vld [vmem:[%s10989_s14] sm:$0xff]  ;;  %v11091_v22 = vcombine.high %v11080_v17, %v11080_v17  ;;  %5351 = vmatpush1.bf16.msra.mxu0 %v8683_v26 }
 0x308   : > { %v2242_v21 = vld [vmem:[%s10989_s14 + $0x20] sm:$0xff]  ;;  %5391 = vmatprep.subr.bf16.mxu1 %v8812_v19 }
 0x309   : > { %v2366_v24 = vld [vmem:[%s10989_s14 + $0x400] sm:$0xff]  ;;  %5370 = vmatprep.mubr.bf16.mxu0 %v11091_v22  ;;  %v8676_v28 = vcombine.high %v2238_v20, %v2242_v21  ;;  %v8675_v35 = vcombine.low %v2238_v20, %v2242_v21  ;;  %5392 = vmatpush1.bf16.msra.mxu1 %v8811_v27 }
 0x30a   : > { %v2370_v25 = vld [vmem:[%s10989_s14 + $0x420] sm:$0xff] }
 0x30b   : > { %v8804_v29 = vcombine.high %v2366_v24, %v2370_v25  ;;  %v2358_v30 = vld [vmem:[%s10989_s14 + $0x3c0] sm:$0xff]  ;;  %5352 = vmatprep.subr.bf16.mxu0 %v8676_v28  ;;  %v8803_v38 = vcombine.low %v2366_v24, %v2370_v25 }
 0x30c   : > { %v2362_v31 = vld [vmem:[%s10989_s14 + $0x3e0] sm:$0xff]  ;;  %5353 = vmatpush1.bf16.msra.mxu0 %v8675_v35 }
 0x30d   : > { %v2486_v32 = vld [vmem:[%s10989_s14 + $0x7c0] sm:$0xff]  ;;  %v8796_v39 = vcombine.high %v2358_v30, %v2362_v31  ;;  %5393 = vmatprep.subr.bf16.mxu1 %v8804_v29  ;;  %v8795_v45 = vcombine.low %v2358_v30, %v2362_v31 }
 0x30e   : > { %v2490_v34 = vld [vmem:[%s10989_s14 + $0x7e0] sm:$0xff]  ;;  %5394 = vmatpush1.bf16.msra.mxu1 %v8803_v38 }
 0x30f   : > { %v8924_v40 = vcombine.high %v2486_v32, %v2490_v34  ;;  %v2350_v41 = vld [vmem:[%s10989_s14 + $0x380] sm:$0xff]  ;;  %5354 = vmatprep.subr.bf16.mxu0 %v8796_v39  ;;  %v8923_v46 = vcombine.low %v2486_v32, %v2490_v34 }
 0x310   : > { %v2354_v42 = vld [vmem:[%s10989_s14 + $0x3a0] sm:$0xff]  ;;  %5355 = vmatpush2.bf16.msra.mxu0 %v8795_v45 }
 0x311   : > { %v2478_v43 = vld [vmem:[%s10989_s14 + $0x780] sm:$0xff]  ;;  %v8788_v47 = vcombine.high %v2350_v41, %v2354_v42  ;;  %5395 = vmatprep.subr.bf16.mxu1 %v8924_v40  ;;  %v8787_v54 = vcombine.low %v2350_v41, %v2354_v42 }
 0x312   : > { %v2482_v44 = vld [vmem:[%s10989_s14 + $0x7a0] sm:$0xff]  ;;  %5396 = vmatpush2.bf16.msra.mxu1 %v8923_v46 }
 0x313   : > { %v8916_v48 = vcombine.high %v2478_v43, %v2482_v44  ;;  %v2342_v50 = vld [vmem:[%s10989_s14 + $0x340] sm:$0xff]  ;;  %5356 = vmatprep.subr.bf16.mxu0 %v8788_v47  ;;  %v8915_v55 = vcombine.low %v2478_v43, %v2482_v44  ;;  %v11141_v47 = vcombine.low %v11080_v17, %v11080_v17  ;;  %v11157_v17 = vld [vmem:[%s12011_s1 + $0x18] sm:$0xff] }
 0x314   : > { %v2346_v51 = vld [vmem:[%s10989_s14 + $0x360] sm:$0xff]  ;;  %5357 = vmatpush2.bf16.msra.mxu0 %v8787_v54 }
 0x315   : > { %v2470_v52 = vld [vmem:[%s10989_s14 + $0x740] sm:$0xff]  ;;  %v8780_v56 = vcombine.high %v2342_v50, %v2346_v51  ;;  %5397 = vmatprep.subr.bf16.mxu1 %v8916_v48  ;;  %v8779_v33 = vcombine.low %v2342_v50, %v2346_v51  ;;  %v11148_v51 = vld [vmem:[%s12011_s1 + $0x10] sm:$0xff] }
 0x316   : > { %v2474_v53 = vld [vmem:[%s10989_s14 + $0x760] sm:$0xff]  ;;  %5398 = vmatpush2.bf16.msra.mxu1 %v8915_v55 }
 0x317   : > { %v8908_v57 = vcombine.high %v2470_v52, %v2474_v53  ;;  %v2334_v58 = vld [vmem:[%s10989_s14 + $0x300] sm:$0xff]  ;;  %5358 = vmatprep.subr.bf16.mxu0 %v8780_v56  ;;  %v8907_v62 = vcombine.low %v2470_v52, %v2474_v53  ;;  %v11152_v52 = vcombine.low %v11085_v18, %v11085_v18 }
 0x318   : > { %v2338_v59 = vld [vmem:[%s10989_s14 + $0x320] sm:$0xff]  ;;  %5359 = vmatpush2.bf16.msra.mxu0 %v8779_v33 }
 0x319   : > { %v2462_v36 = vld [vmem:[%s10989_s14 + $0x700] sm:$0xff]  ;;  %v8772_v60 = vcombine.high %v2334_v58, %v2338_v59  ;;  %5399 = vmatprep.subr.bf16.mxu1 %v8908_v57  ;;  %v8771_v2 = vcombine.low %v2334_v58, %v2338_v59 }
 0x31a   : > { %v2466_v61 = vld [vmem:[%s10989_s14 + $0x720] sm:$0xff]  ;;  %5400 = vmatpush2.bf16.msra.mxu1 %v8907_v62 }
 0x31b   : > { %v8900_v63 = vcombine.high %v2462_v36, %v2466_v61  ;;  %v2326_v37 = vld [vmem:[%s10989_s14 + $0x2c0] sm:$0xff]  ;;  %5360 = vmatprep.subr.bf16.mxu0 %v8772_v60  ;;  %v8899_v3 = vcombine.low %v2462_v36, %v2466_v61  ;;  %v11165_v36 = vcombine.high %v11148_v51, %v11148_v51  ;;  %v11170_v61 = vcombine.high %v11157_v17, %v11157_v17 }
 0x31c   : > { %v2330_v0 = vld [vmem:[%s10989_s14 + $0x2e0] sm:$0xff]  ;;  %5361 = vmatpush2.bf16.msra.mxu0 %v8771_v2 }
 0x31d   : > { %v2454_v49 = vld [vmem:[%s10989_s14 + $0x6c0] sm:$0xff]  ;;  %v8764_v4 = vcombine.high %v2326_v37, %v2330_v0  ;;  %5401 = vmatprep.subr.bf16.mxu1 %v8900_v63  ;;  %v8763_v10 = vcombine.low %v2326_v37, %v2330_v0 }
 0x31e   : > { %v2458_v1 = vld [vmem:[%s10989_s14 + $0x6e0] sm:$0xff]  ;;  %5402 = vmatpush2.bf16.msra.mxu1 %v8899_v3 }
 0x31f   : > { %v8892_v5 = vcombine.high %v2454_v49, %v2458_v1  ;;  %v2318_v6 = vld [vmem:[%s10989_s14 + $0x280] sm:$0xff]  ;;  %5362 = vmatprep.subr.bf16.mxu0 %v8764_v4  ;;  %v8891_v11 = vcombine.low %v2454_v49, %v2458_v1 }
 0x320   : > { %v2322_v7 = vld [vmem:[%s10989_s14 + $0x2a0] sm:$0xff]  ;;  %5363 = vmatpush2.bf16.msra.mxu0 %v8763_v10 }
 0x321   : > { %v2446_v8 = vld [vmem:[%s10989_s14 + $0x680] sm:$0xff]  ;;  %v8756_v12 = vcombine.high %v2318_v6, %v2322_v7  ;;  %5403 = vmatprep.subr.bf16.mxu1 %v8892_v5  ;;  %v8755_v20 = vcombine.low %v2318_v6, %v2322_v7 }
 0x322   : > { %v2450_v9 = vld [vmem:[%s10989_s14 + $0x6a0] sm:$0xff]  ;;  %5404 = vmatpush2.bf16.msra.mxu1 %v8891_v11 }
 0x323   : > { %v8884_v13 = vcombine.high %v2446_v8, %v2450_v9  ;;  %v2310_v14 = vld [vmem:[%s10989_s14 + $0x240] sm:$0xff]  ;;  %5364 = vmatprep.subr.bf16.mxu0 %v8756_v12  ;;  %v8883_v21 = vcombine.low %v2446_v8, %v2450_v9 }
 0x324   : > { %v2314_v15 = vld [vmem:[%s10989_s14 + $0x260] sm:$0xff]  ;;  %5365 = vmatpush2.bf16.msra.mxu0 %v8755_v20 }
 0x325   : > { %v2438_v16 = vld [vmem:[%s10989_s14 + $0x640] sm:$0xff]  ;;  %v8748_v24 = vcombine.high %v2310_v14, %v2314_v15  ;;  %5405 = vmatprep.subr.bf16.mxu1 %v8884_v13  ;;  %v8747_v30 = vcombine.low %v2310_v14, %v2314_v15 }
 0x326   : > { %v2442_v19 = vld [vmem:[%s10989_s14 + $0x660] sm:$0xff]  ;;  %5406 = vmatpush2.bf16.msra.mxu1 %v8883_v21 }
 0x327   : > { %v8876_v25 = vcombine.high %v2438_v16, %v2442_v19  ;;  %v2302_v26 = vld [vmem:[%s10989_s14 + $0x200] sm:$0xff]  ;;  %5366 = vmatprep.subr.bf16.mxu0 %v8748_v24  ;;  %v8875_v31 = vcombine.low %v2438_v16, %v2442_v19 }
 0x328   : > { %v2306_v27 = vld [vmem:[%s10989_s14 + $0x220] sm:$0xff]  ;;  %5367 = vmatpush2.bf16.msra.mxu0 %v8747_v30 }
 0x329   : > { %v2430_v28 = vld [vmem:[%s10989_s14 + $0x600] sm:$0xff]  ;;  %v8740_v32 = vcombine.high %v2302_v26, %v2306_v27  ;;  %5407 = vmatprep.subr.bf16.mxu1 %v8876_v25  ;;  %v8739_v41 = vcombine.low %v2302_v26, %v2306_v27 }
 0x32a   : > { %v2434_v29 = vld [vmem:[%s10989_s14 + $0x620] sm:$0xff]  ;;  %5408 = vmatpush2.bf16.msra.mxu1 %v8875_v31 }
 0x32b   : > { %v8868_v34 = vcombine.high %v2430_v28, %v2434_v29  ;;  %v2550_v35 = vld [vmem:[%s10989_s14 + $0x9c0] sm:$0xff]  ;;  %5368 = vmatprep.subr.bf16.mxu0 %v8740_v32  ;;  %v8867_v42 = vcombine.low %v2430_v28, %v2434_v29 }
 0x32c   : > { %v2554_v38 = vld [vmem:[%s10989_s14 + $0x9e0] sm:$0xff]  ;;  %5369 = vmatpush2.bf16.msra.mxu0 %v8739_v41 }
 0x32d   : > { %v2678_v39 = vld [vmem:[%s10989_s14 + $0xdc0] sm:$0xff]  ;;  %v8988_v43 = vcombine.high %v2550_v35, %v2554_v38  ;;  %5409 = vmatprep.subr.bf16.mxu1 %v8868_v34  ;;  %v8987_v53 = vcombine.low %v2550_v35, %v2554_v38 }
 0x32e   : > { %v2682_v40 = vld [vmem:[%s10989_s14 + $0xde0] sm:$0xff]  ;;  %5410 = vmatpush2.bf16.msra.mxu1 %v8867_v42 }
 0x32f   : > { %v9116_v44 = vcombine.high %v2678_v39, %v2682_v40  ;;  %v2542_v45 = vld [vmem:[%s10989_s14 + $0x980] sm:$0xff]  ;;  %5420 = vmatprep.subr.bf16.mxu0 %v8988_v43  ;;  %v9115_v54 = vcombine.low %v2678_v39, %v2682_v40  ;;  %5371 = vmatmul.mubr.bf16.vlgmr.msra.gmra.mxu0 %v11141_v47 }
 0x330   : > { %v2546_v46 = vld [vmem:[%s10989_s14 + $0x9a0] sm:$0xff]  ;;  %5421 = vmatpush1.bf16.msra.mxu0 %v8987_v53  ;;  %5452 = vmatprep.mubr.bf16.mxu0 %v11165_v36 }
 0x331   : > { %v2670_v48 = vld [vmem:[%s10989_s14 + $0xd80] sm:$0xff]  ;;  %v8980_v55 = vcombine.high %v2542_v45, %v2546_v46  ;;  %5461 = vmatprep.subr.bf16.mxu1 %v9116_v44  ;;  %5412 = vmatmul.mubr.bf16.vlgmr.msra.gmra.mxu1 %v11152_v52  ;;  %v8979_v33 = vcombine.low %v2542_v45, %v2546_v46 }
 0x332   : > { %v2674_v50 = vld [vmem:[%s10989_s14 + $0xda0] sm:$0xff]  ;;  %5462 = vmatpush1.bf16.msra.mxu1 %v9115_v54  ;;  %5493 = vmatprep.mubr.bf16.mxu1 %v11170_v61 }
 0x333   : > { %v2534_v56 = vld [vmem:[%s10989_s14 + $0x940] sm:$0xff]  ;;  %v9108_v58 = vcombine.high %v2670_v48, %v2674_v50  ;;  %5422 = vmatprep.subr.bf16.mxu0 %v8980_v55  ;;  %v9107_v62 = vcombine.low %v2670_v48, %v2674_v50 }
 0x334   : > { %v2538_v57 = vld [vmem:[%s10989_s14 + $0x960] sm:$0xff]  ;;  %5423 = vmatpush1.bf16.msra.mxu0 %v8979_v33 }
 0x335   : > { %v2662_v59 = vld [vmem:[%s10989_s14 + $0xd40] sm:$0xff]  ;;  %v8972_v60 = vcombine.high %v2534_v56, %v2538_v57  ;;  %5463 = vmatprep.subr.bf16.mxu1 %v9108_v58  ;;  %v8971_v2 = vcombine.low %v2534_v56, %v2538_v57 }
 0x336   : > { %v2666_v18 = vld [vmem:[%s10989_s14 + $0xd60] sm:$0xff]  ;;  %5464 = vmatpush1.bf16.msra.mxu1 %v9107_v62 }
 0x337   : > { %v2526_v63 = vld [vmem:[%s10989_s14 + $0x900] sm:$0xff]  ;;  %v9100_v49 = vcombine.high %v2662_v59, %v2666_v18  ;;  %5424 = vmatprep.subr.bf16.mxu0 %v8972_v60  ;;  %v9099_v3 = vcombine.low %v2662_v59, %v2666_v18 }
 0x338   : > { %v2530_v37 = vld [vmem:[%s10989_s14 + $0x920] sm:$0xff]  ;;  %5425 = vmatpush1.bf16.msra.mxu0 %v8971_v2 }
 0x339   : > { %v2654_v0 = vld [vmem:[%s10989_s14 + $0xd00] sm:$0xff]  ;;  %v8964_v4 = vcombine.high %v2526_v63, %v2530_v37  ;;  %5465 = vmatprep.subr.bf16.mxu1 %v9100_v49  ;;  %v8963_v10 = vcombine.low %v2526_v63, %v2530_v37 }
 0x33a   : > { %v2658_v1 = vld [vmem:[%s10989_s14 + $0xd20] sm:$0xff]  ;;  %5466 = vmatpush1.bf16.msra.mxu1 %v9099_v3 }
 0x33b   : > { %v2518_v5 = vld [vmem:[%s10989_s14 + $0x8c0] sm:$0xff]  ;;  %v9092_v8 = vcombine.high %v2654_v0, %v2658_v1  ;;  %5426 = vmatprep.subr.bf16.mxu0 %v8964_v4  ;;  %v9091_v11 = vcombine.low %v2654_v0, %v2658_v1 }
 0x33c   : > { %v2522_v6 = vld [vmem:[%s10989_s14 + $0x8e0] sm:$0xff]  ;;  %5427 = vmatpush1.bf16.msra.mxu0 %v8963_v10 }
 0x33d   : > { %v2646_v7 = vld [vmem:[%s10989_s14 + $0xcc0] sm:$0xff]  ;;  %v8956_v12 = vcombine.high %v2518_v5, %v2522_v6  ;;  %5467 = vmatprep.subr.bf16.mxu1 %v9092_v8  ;;  %v8955_v20 = vcombine.low %v2518_v5, %v2522_v6 }
 0x33e   : > { %v2650_v9 = vld [vmem:[%s10989_s14 + $0xce0] sm:$0xff]  ;;  %5468 = vmatpush1.bf16.msra.mxu1 %v9091_v11 }
 0x33f   : > { %v2510_v13 = vld [vmem:[%s10989_s14 + $0x880] sm:$0xff]  ;;  %v9084_v16 = vcombine.high %v2646_v7, %v2650_v9  ;;  %5428 = vmatprep.subr.bf16.mxu0 %v8956_v12  ;;  %v9083_v21 = vcombine.low %v2646_v7, %v2650_v9 }
 0x340   : > { %v2514_v14 = vld [vmem:[%s10989_s14 + $0x8a0] sm:$0xff]  ;;  %5429 = vmatpush1.bf16.msra.mxu0 %v8955_v20 }
 0x341   : > { %v2638_v15 = vld [vmem:[%s10989_s14 + $0xc80] sm:$0xff]  ;;  %v8948_v24 = vcombine.high %v2510_v13, %v2514_v14  ;;  %5469 = vmatprep.subr.bf16.mxu1 %v9084_v16  ;;  %v8947_v30 = vcombine.low %v2510_v13, %v2514_v14 }
 0x342   : > { %v2642_v19 = vld [vmem:[%s10989_s14 + $0xca0] sm:$0xff]  ;;  %5470 = vmatpush1.bf16.msra.mxu1 %v9083_v21 }
 0x343   : > { %v2502_v25 = vld [vmem:[%s10989_s14 + $0x840] sm:$0xff]  ;;  %v9076_v28 = vcombine.high %v2638_v15, %v2642_v19  ;;  %5430 = vmatprep.subr.bf16.mxu0 %v8948_v24  ;;  %v9075_v31 = vcombine.low %v2638_v15, %v2642_v19 }
 0x344   : > { %v2506_v26 = vld [vmem:[%s10989_s14 + $0x860] sm:$0xff]  ;;  %5431 = vmatpush1.bf16.msra.mxu0 %v8947_v30 }
 0x345   : > { %v2630_v27 = vld [vmem:[%s10989_s14 + $0xc40] sm:$0xff]  ;;  %v8940_v32 = vcombine.high %v2502_v25, %v2506_v26  ;;  %5471 = vmatprep.subr.bf16.mxu1 %v9076_v28  ;;  %v8939_v41 = vcombine.low %v2502_v25, %v2506_v26 }
 0x346   : > { %v2634_v29 = vld [vmem:[%s10989_s14 + $0xc60] sm:$0xff]  ;;  %5472 = vmatpush1.bf16.msra.mxu1 %v9075_v31 }
 0x347   : > { %v2494_v34 = vld [vmem:[%s10989_s14 + $0x800] sm:$0xff]  ;;  %v9068_v39 = vcombine.high %v2630_v27, %v2634_v29  ;;  %5432 = vmatprep.subr.bf16.mxu0 %v8940_v32  ;;  %v9067_v42 = vcombine.low %v2630_v27, %v2634_v29 }
 0x348   : > { %v2498_v35 = vld [vmem:[%s10989_s14 + $0x820] sm:$0xff]  ;;  %5433 = vmatpush1.bf16.msra.mxu0 %v8939_v41 }
 0x349   : > { %v2622_v38 = vld [vmem:[%s10989_s14 + $0xc00] sm:$0xff]  ;;  %v8932_v43 = vcombine.high %v2494_v34, %v2498_v35  ;;  %5473 = vmatprep.subr.bf16.mxu1 %v9068_v39  ;;  %v8931_v53 = vcombine.low %v2494_v34, %v2498_v35 }
 0x34a   : > { %v2626_v40 = vld [vmem:[%s10989_s14 + $0xc20] sm:$0xff]  ;;  %5474 = vmatpush1.bf16.msra.mxu1 %v9067_v42 }
 0x34b   : > { %v2614_v44 = vld [vmem:[%s10989_s14 + $0xbc0] sm:$0xff]  ;;  %v9060_v48 = vcombine.high %v2622_v38, %v2626_v40  ;;  %5434 = vmatprep.subr.bf16.mxu0 %v8932_v43  ;;  %v9059_v54 = vcombine.low %v2622_v38, %v2626_v40 }
 0x34c   : > { %v2618_v45 = vld [vmem:[%s10989_s14 + $0xbe0] sm:$0xff]  ;;  %5435 = vmatpush1.bf16.msra.mxu0 %v8931_v53 }
 0x34d   : > { %v2742_v46 = vld [vmem:[%s10989_s14 + $0xfc0] sm:$0xff]  ;;  %v9052_v55 = vcombine.high %v2614_v44, %v2618_v45  ;;  %5475 = vmatprep.subr.bf16.mxu1 %v9060_v48  ;;  %v9051_v33 = vcombine.low %v2614_v44, %v2618_v45 }
 0x34e   : > { %v2746_v50 = vld [vmem:[%s10989_s14 + $0xfe0] sm:$0xff]  ;;  %5476 = vmatpush1.bf16.msra.mxu1 %v9059_v54 }
 0x34f   : > { %v2606_v56 = vld [vmem:[%s10989_s14 + $0xb80] sm:$0xff]  ;;  %v9180_v59 = vcombine.high %v2742_v46, %v2746_v50  ;;  %5436 = vmatprep.subr.bf16.mxu0 %v9052_v55  ;;  %v9179_v62 = vcombine.low %v2742_v46, %v2746_v50 }
 0x350   : > { %v2610_v57 = vld [vmem:[%s10989_s14 + $0xba0] sm:$0xff]  ;;  %5437 = vmatpush2.bf16.msra.mxu0 %v9051_v33 }
 0x351   : > { %v2734_v58 = vld [vmem:[%s10989_s14 + $0xf80] sm:$0xff]  ;;  %v9044_v60 = vcombine.high %v2606_v56, %v2610_v57  ;;  %5477 = vmatprep.subr.bf16.mxu1 %v9180_v59  ;;  %v9043_v2 = vcombine.low %v2606_v56, %v2610_v57  ;;  %v2295_v56 = vld [vmem:[%s10989_s14 + $0x1c8] sm:$0xff] }
 0x352   : > { %v2738_v18 = vld [vmem:[%s10989_s14 + $0xfa0] sm:$0xff]  ;;  %5478 = vmatpush2.bf16.msra.mxu1 %v9179_v62  ;;  %v2299_v57 = vld [vmem:[%s10989_s14 + $0x1e8] sm:$0xff] }
 0x353   : > { %v2598_v63 = vld [vmem:[%s10989_s14 + $0xb40] sm:$0xff]  ;;  %v9172_v49 = vcombine.high %v2734_v58, %v2738_v18  ;;  %5438 = vmatprep.subr.bf16.mxu0 %v9044_v60  ;;  %v9171_v3 = vcombine.low %v2734_v58, %v2738_v18  ;;  %v2423_v58 = vld [vmem:[%s10989_s14 + $0x5c8] sm:$0xff]  ;;  %v8734_v60 = vcombine.high %v2295_v56, %v2299_v57 }
 0x354   : > { %v2602_v37 = vld [vmem:[%s10989_s14 + $0xb60] sm:$0xff]  ;;  %5439 = vmatpush2.bf16.msra.mxu0 %v9043_v2  ;;  %v2427_v18 = vld [vmem:[%s10989_s14 + $0x5e8] sm:$0xff]  ;;  %v11237_v2 = vcombine.low %v11148_v51, %v11148_v51 }
 0x355   : > { %v2726_v0 = vld [vmem:[%s10989_s14 + $0xf40] sm:$0xff]  ;;  %v9036_v4 = vcombine.high %v2598_v63, %v2602_v37  ;;  %5479 = vmatprep.subr.bf16.mxu1 %v9172_v49  ;;  %v9035_v10 = vcombine.low %v2598_v63, %v2602_v37  ;;  %v2287_v63 = vld [vmem:[%s10989_s14 + $0x188] sm:$0xff]  ;;  %v8862_v49 = vcombine.high %v2423_v58, %v2427_v18 }
 0x356   : > { %v2730_v1 = vld [vmem:[%s10989_s14 + $0xf60] sm:$0xff]  ;;  %5480 = vmatpush2.bf16.msra.mxu1 %v9171_v3  ;;  %v2291_v37 = vld [vmem:[%s10989_s14 + $0x1a8] sm:$0xff]  ;;  %v11241_v3 = vcombine.low %v11157_v17, %v11157_v17 }
 0x357   : > { %v2590_v5 = vld [vmem:[%s10989_s14 + $0xb00] sm:$0xff]  ;;  %v9164_v8 = vcombine.high %v2726_v0, %v2730_v1  ;;  %5440 = vmatprep.subr.bf16.mxu0 %v9036_v4  ;;  %v9163_v11 = vcombine.low %v2726_v0, %v2730_v1  ;;  %v2415_v0 = vld [vmem:[%s10989_s14 + $0x588] sm:$0xff]  ;;  %v8733_v4 = vcombine.low %v2295_v56, %v2299_v57  ;;  %v8725_v17 = vcombine.low %v2287_v63, %v2291_v37 }
 0x358   : > { %v2594_v6 = vld [vmem:[%s10989_s14 + $0xb20] sm:$0xff]  ;;  %5441 = vmatpush2.bf16.msra.mxu0 %v9035_v10  ;;  %v2419_v1 = vld [vmem:[%s10989_s14 + $0x5a8] sm:$0xff] }
 0x359   : > { %v2718_v7 = vld [vmem:[%s10989_s14 + $0xf00] sm:$0xff]  ;;  %v9028_v12 = vcombine.high %v2590_v5, %v2594_v6  ;;  %5481 = vmatprep.subr.bf16.mxu1 %v9164_v8  ;;  %v9027_v20 = vcombine.low %v2590_v5, %v2594_v6  ;;  %v8861_v5 = vcombine.low %v2423_v58, %v2427_v18  ;;  %v8726_v6 = vcombine.high %v2287_v63, %v2291_v37  ;;  %v2283_v8 = vld [vmem:[%s10989_s14 + $0x168] sm:$0xff] }
 0x35a   : > { %v2722_v9 = vld [vmem:[%s10989_s14 + $0xf20] sm:$0xff]  ;;  %5482 = vmatpush2.bf16.msra.mxu1 %v9163_v11  ;;  %v8854_v51 = vcombine.high %v2415_v0, %v2419_v1  ;;  %v2411_v10 = vld [vmem:[%s10989_s14 + $0x568] sm:$0xff]  ;;  %v8853_v11 = vcombine.low %v2415_v0, %v2419_v1 }
 0x35b   : > { %v2582_v13 = vld [vmem:[%s10989_s14 + $0xac0] sm:$0xff]  ;;  %v9156_v16 = vcombine.high %v2718_v7, %v2722_v9  ;;  %5442 = vmatprep.subr.bf16.mxu0 %v9028_v12  ;;  %v9155_v21 = vcombine.low %v2718_v7, %v2722_v9  ;;  %v2279_v7 = vld [vmem:[%s10989_s14 + $0x148] sm:$0xff] }
 0x35c   : > { %v2586_v14 = vld [vmem:[%s10989_s14 + $0xae0] sm:$0xff]  ;;  %5443 = vmatpush2.bf16.msra.mxu0 %v9027_v20  ;;  %v2407_v9 = vld [vmem:[%s10989_s14 + $0x548] sm:$0xff]  ;;  %v8718_v12 = vcombine.high %v2279_v7, %v2283_v8  ;;  %v8717_v20 = vcombine.low %v2279_v7, %v2283_v8 }
 0x35d   : > { %v2710_v15 = vld [vmem:[%s10989_s14 + $0xec0] sm:$0xff]  ;;  %v9020_v24 = vcombine.high %v2582_v13, %v2586_v14  ;;  %5483 = vmatprep.subr.bf16.mxu1 %v9156_v16  ;;  %v9019_v30 = vcombine.low %v2582_v13, %v2586_v14  ;;  %v2271_v13 = vld [vmem:[%s10989_s14 + $0x108] sm:$0xff]  ;;  %v8846_v16 = vcombine.high %v2407_v9, %v2411_v10 }
 0x35e   : > { %v2714_v19 = vld [vmem:[%s10989_s14 + $0xee0] sm:$0xff]  ;;  %5484 = vmatpush2.bf16.msra.mxu1 %v9155_v21  ;;  %v2275_v14 = vld [vmem:[%s10989_s14 + $0x128] sm:$0xff]  ;;  %v8845_v21 = vcombine.low %v2407_v9, %v2411_v10 }
 0x35f   : > { %v2574_v25 = vld [vmem:[%s10989_s14 + $0xa80] sm:$0xff]  ;;  %v9148_v28 = vcombine.high %v2710_v15, %v2714_v19  ;;  %5444 = vmatprep.subr.bf16.mxu0 %v9020_v24  ;;  %v9147_v31 = vcombine.low %v2710_v15, %v2714_v19  ;;  %v2399_v15 = vld [vmem:[%s10989_s14 + $0x508] sm:$0xff]  ;;  %v8710_v24 = vcombine.high %v2271_v13, %v2275_v14 }
 0x360   : > { %v2578_v26 = vld [vmem:[%s10989_s14 + $0xaa0] sm:$0xff]  ;;  %5445 = vmatpush2.bf16.msra.mxu0 %v9019_v30  ;;  %v2403_v19 = vld [vmem:[%s10989_s14 + $0x528] sm:$0xff]  ;;  %v8709_v30 = vcombine.low %v2271_v13, %v2275_v14 }
 0x361   : > { %v2702_v27 = vld [vmem:[%s10989_s14 + $0xe80] sm:$0xff]  ;;  %v9012_v32 = vcombine.high %v2574_v25, %v2578_v26  ;;  %5485 = vmatprep.subr.bf16.mxu1 %v9148_v28  ;;  %v9011_v41 = vcombine.low %v2574_v25, %v2578_v26  ;;  %v2263_v25 = vld [vmem:[%s10989_s14 + $0xc8] sm:$0xff]  ;;  %v8838_v28 = vcombine.high %v2399_v15, %v2403_v19 }
 0x362   : > { %v2706_v29 = vld [vmem:[%s10989_s14 + $0xea0] sm:$0xff]  ;;  %5486 = vmatpush2.bf16.msra.mxu1 %v9147_v31  ;;  %v2267_v26 = vld [vmem:[%s10989_s14 + $0xe8] sm:$0xff]  ;;  %v8837_v31 = vcombine.low %v2399_v15, %v2403_v19 }
 0x363   : > { %v2566_v34 = vld [vmem:[%s10989_s14 + $0xa40] sm:$0xff]  ;;  %v9140_v39 = vcombine.high %v2702_v27, %v2706_v29  ;;  %5446 = vmatprep.subr.bf16.mxu0 %v9012_v32  ;;  %v9139_v42 = vcombine.low %v2702_v27, %v2706_v29  ;;  %v2391_v27 = vld [vmem:[%s10989_s14 + $0x4c8] sm:$0xff]  ;;  %v8702_v32 = vcombine.high %v2263_v25, %v2267_v26 }
 0x364   : > { %v2570_v35 = vld [vmem:[%s10989_s14 + $0xa60] sm:$0xff]  ;;  %5447 = vmatpush2.bf16.msra.mxu0 %v9011_v41  ;;  %v2395_v29 = vld [vmem:[%s10989_s14 + $0x4e8] sm:$0xff]  ;;  %v8701_v41 = vcombine.low %v2263_v25, %v2267_v26 }
 0x365   : > { %v2694_v38 = vld [vmem:[%s10989_s14 + $0xe40] sm:$0xff]  ;;  %v9004_v43 = vcombine.high %v2566_v34, %v2570_v35  ;;  %5487 = vmatprep.subr.bf16.mxu1 %v9140_v39  ;;  %v9003_v53 = vcombine.low %v2566_v34, %v2570_v35  ;;  %v2255_v34 = vld [vmem:[%s10989_s14 + $0x88] sm:$0xff]  ;;  %v8830_v39 = vcombine.high %v2391_v27, %v2395_v29 }
 0x366   : > { %v2698_v40 = vld [vmem:[%s10989_s14 + $0xe60] sm:$0xff]  ;;  %5488 = vmatpush2.bf16.msra.mxu1 %v9139_v42  ;;  %v2259_v35 = vld [vmem:[%s10989_s14 + $0xa8] sm:$0xff]  ;;  %v8829_v42 = vcombine.low %v2391_v27, %v2395_v29 }
 0x367   : > { %v2558_v44 = vld [vmem:[%s10989_s14 + $0xa00] sm:$0xff]  ;;  %v9132_v48 = vcombine.high %v2694_v38, %v2698_v40  ;;  %5448 = vmatprep.subr.bf16.mxu0 %v9004_v43  ;;  %v9131_v54 = vcombine.low %v2694_v38, %v2698_v40  ;;  %v2383_v38 = vld [vmem:[%s10989_s14 + $0x488] sm:$0xff]  ;;  %v8694_v43 = vcombine.high %v2255_v34, %v2259_v35 }
 0x368   : > { %v2562_v45 = vld [vmem:[%s10989_s14 + $0xa20] sm:$0xff]  ;;  %5449 = vmatpush2.bf16.msra.mxu0 %v9003_v53  ;;  %v2387_v40 = vld [vmem:[%s10989_s14 + $0x4a8] sm:$0xff]  ;;  %v8693_v53 = vcombine.low %v2255_v34, %v2259_v35 }
 0x369   : > { %v2686_v46 = vld [vmem:[%s10989_s14 + $0xe00] sm:$0xff]  ;;  %v8996_v55 = vcombine.high %v2558_v44, %v2562_v45  ;;  %5489 = vmatprep.subr.bf16.mxu1 %v9132_v48  ;;  %v8995_v33 = vcombine.low %v2558_v44, %v2562_v45  ;;  %v2247_v44 = vld [vmem:[%s10989_s14 + $0x48] sm:$0xff]  ;;  %v8822_v48 = vcombine.high %v2383_v38, %v2387_v40 }
 0x36a   : > { %v2690_v50 = vld [vmem:[%s10989_s14 + $0xe20] sm:$0xff]  ;;  %5490 = vmatpush2.bf16.msra.mxu1 %v9131_v54  ;;  %v2251_v45 = vld [vmem:[%s10989_s14 + $0x68] sm:$0xff]  ;;  %v8821_v54 = vcombine.low %v2383_v38, %v2387_v40 }
 0x36b   : > { %v9124_v59 = vcombine.high %v2686_v46, %v2690_v50  ;;  %5450 = vmatprep.subr.bf16.mxu0 %v8996_v55  ;;  %v9123_v62 = vcombine.low %v2686_v46, %v2690_v50  ;;  %v2375_v46 = vld [vmem:[%s10989_s14 + $0x448] sm:$0xff]  ;;  %v8686_v55 = vcombine.high %v2247_v44, %v2251_v45 }
 0x36c   : > { %5451 = vmatpush2.bf16.msra.mxu0 %v8995_v33  ;;  %v2379_v50 = vld [vmem:[%s10989_s14 + $0x468] sm:$0xff]  ;;  %v8685_v33 = vcombine.low %v2247_v44, %v2251_v45 }
 0x36d   : > { %5491 = vmatprep.subr.bf16.mxu1 %v9124_v59  ;;  %5502 = vmatprep.subr.bf16.mxu0 %v8734_v60  ;;  %v2239_v56 = vld [vmem:[%s10989_s14 + $0x8] sm:$0xff]  ;;  %v8814_v59 = vcombine.high %v2375_v46, %v2379_v50 }
 0x36e   : > { %5492 = vmatpush2.bf16.msra.mxu1 %v9123_v62  ;;  %v2243_v57 = vld [vmem:[%s10989_s14 + $0x28] sm:$0xff]  ;;  %v8813_v62 = vcombine.low %v2375_v46, %v2379_v50 }
 0x36f   : > { %5543 = vmatprep.subr.bf16.mxu1 %v8862_v49  ;;  %5453 = vmatmul.mubr.bf16.vlgmr.msra.gmra.mxu0 %v11237_v2  ;;  %v2367_v58 = vld [vmem:[%s10989_s14 + $0x408] sm:$0xff]  ;;  %v8678_v60 = vcombine.high %v2239_v56, %v2243_v57 }
 0x370   : > { %5503 = vmatpush1.bf16.msra.mxu0 %v8733_v4  ;;  %5534 = vmatprep.mubr.bf16.mxu0 %v11091_v22  ;;  %v2371_v18 = vld [vmem:[%s10989_s14 + $0x428] sm:$0xff]  ;;  %v8677_v4 = vcombine.low %v2239_v56, %v2243_v57 }
 0x371   : > { %5494 = vmatmul.mubr.bf16.vlgmr.msra.gmra.mxu1 %v11241_v3  ;;  %5504 = vmatprep.subr.bf16.mxu0 %v8726_v6  ;;  %v2359_v63 = vld [vmem:[%s10989_s14 + $0x3c8] sm:$0xff]  ;;  %v8806_v49 = vcombine.high %v2367_v58, %v2371_v18 }
 0x372   : > { %5544 = vmatpush1.bf16.msra.mxu1 %v8861_v5  ;;  %5575 = vmatprep.mubr.bf16.mxu1 %v11095_v23  ;;  %v2363_v37 = vld [vmem:[%s10989_s14 + $0x3e8] sm:$0xff]  ;;  %v8805_v5 = vcombine.low %v2367_v58, %v2371_v18 }
 0x373   : > { %5545 = vmatprep.subr.bf16.mxu1 %v8854_v51  ;;  %v2487_v0 = vld [vmem:[%s10989_s14 + $0x7c8] sm:$0xff]  ;;  %v8798_v6 = vcombine.high %v2359_v63, %v2363_v37 }
 0x374   : > { %5505 = vmatpush1.bf16.msra.mxu0 %v8725_v17  ;;  %v2491_v1 = vld [vmem:[%s10989_s14 + $0x7e8] sm:$0xff]  ;;  %v8797_v17 = vcombine.low %v2359_v63, %v2363_v37 }
 0x375   : > { %5506 = vmatprep.subr.bf16.mxu0 %v8718_v12  ;;  %v2351_v7 = vld [vmem:[%s10989_s14 + $0x388] sm:$0xff]  ;;  %v8926_v51 = vcombine.high %v2487_v0, %v2491_v1 }
 0x376   : > { %5546 = vmatpush1.bf16.msra.mxu1 %v8853_v11  ;;  %v2355_v8 = vld [vmem:[%s10989_s14 + $0x3a8] sm:$0xff]  ;;  %v8925_v11 = vcombine.low %v2487_v0, %v2491_v1 }
 0x377   : > { %5547 = vmatprep.subr.bf16.mxu1 %v8846_v16  ;;  %v2479_v9 = vld [vmem:[%s10989_s14 + $0x788] sm:$0xff]  ;;  %v8790_v12 = vcombine.high %v2351_v7, %v2355_v8 }
 0x378   : > { %5507 = vmatpush1.bf16.msra.mxu0 %v8717_v20  ;;  %v2483_v10 = vld [vmem:[%s10989_s14 + $0x7a8] sm:$0xff]  ;;  %v8789_v20 = vcombine.low %v2351_v7, %v2355_v8 }
 0x379   : > { %5508 = vmatprep.subr.bf16.mxu0 %v8710_v24  ;;  %v2343_v13 = vld [vmem:[%s10989_s14 + $0x348] sm:$0xff]  ;;  %v8918_v16 = vcombine.high %v2479_v9, %v2483_v10 }
 0x37a   : > { %5548 = vmatpush1.bf16.msra.mxu1 %v8845_v21  ;;  %v2347_v14 = vld [vmem:[%s10989_s14 + $0x368] sm:$0xff]  ;;  %v8917_v21 = vcombine.low %v2479_v9, %v2483_v10 }
 0x37b   : > { %5549 = vmatprep.subr.bf16.mxu1 %v8838_v28  ;;  %v2471_v15 = vld [vmem:[%s10989_s14 + $0x748] sm:$0xff]  ;;  %v8782_v24 = vcombine.high %v2343_v13, %v2347_v14 }
 0x37c   : > { %5509 = vmatpush1.bf16.msra.mxu0 %v8709_v30  ;;  %v2475_v19 = vld [vmem:[%s10989_s14 + $0x768] sm:$0xff]  ;;  %v8781_v30 = vcombine.low %v2343_v13, %v2347_v14 }
 0x37d   : > { %5510 = vmatprep.subr.bf16.mxu0 %v8702_v32  ;;  %v2335_v25 = vld [vmem:[%s10989_s14 + $0x308] sm:$0xff]  ;;  %v8910_v28 = vcombine.high %v2471_v15, %v2475_v19 }
 0x37e   : > { %5550 = vmatpush1.bf16.msra.mxu1 %v8837_v31  ;;  %v2339_v26 = vld [vmem:[%s10989_s14 + $0x328] sm:$0xff]  ;;  %v8909_v31 = vcombine.low %v2471_v15, %v2475_v19 }
 0x37f   : > { %5551 = vmatprep.subr.bf16.mxu1 %v8830_v39  ;;  %v2463_v27 = vld [vmem:[%s10989_s14 + $0x708] sm:$0xff]  ;;  %v8774_v32 = vcombine.high %v2335_v25, %v2339_v26 }
 0x380   : > { %5511 = vmatpush1.bf16.msra.mxu0 %v8701_v41  ;;  %v2467_v29 = vld [vmem:[%s10989_s14 + $0x728] sm:$0xff]  ;;  %v8773_v41 = vcombine.low %v2335_v25, %v2339_v26 }
 0x381   : > { %5512 = vmatprep.subr.bf16.mxu0 %v8694_v43  ;;  %v2327_v34 = vld [vmem:[%s10989_s14 + $0x2c8] sm:$0xff]  ;;  %v8902_v39 = vcombine.high %v2463_v27, %v2467_v29 }
 0x382   : > { %5552 = vmatpush1.bf16.msra.mxu1 %v8829_v42  ;;  %v2331_v35 = vld [vmem:[%s10989_s14 + $0x2e8] sm:$0xff]  ;;  %v8901_v42 = vcombine.low %v2463_v27, %v2467_v29 }
 0x383   : > { %5553 = vmatprep.subr.bf16.mxu1 %v8822_v48  ;;  %v2455_v38 = vld [vmem:[%s10989_s14 + $0x6c8] sm:$0xff]  ;;  %v8766_v43 = vcombine.high %v2327_v34, %v2331_v35 }
 0x384   : > { %5513 = vmatpush1.bf16.msra.mxu0 %v8693_v53  ;;  %v2459_v40 = vld [vmem:[%s10989_s14 + $0x6e8] sm:$0xff]  ;;  %v8765_v53 = vcombine.low %v2327_v34, %v2331_v35 }
 0x385   : > { %5514 = vmatprep.subr.bf16.mxu0 %v8686_v55  ;;  %v2319_v44 = vld [vmem:[%s10989_s14 + $0x288] sm:$0xff]  ;;  %v8894_v48 = vcombine.high %v2455_v38, %v2459_v40 }
 0x386   : > { %5554 = vmatpush1.bf16.msra.mxu1 %v8821_v54  ;;  %v2323_v45 = vld [vmem:[%s10989_s14 + $0x2a8] sm:$0xff]  ;;  %v8893_v54 = vcombine.low %v2455_v38, %v2459_v40 }
 0x387   : > { %5555 = vmatprep.subr.bf16.mxu1 %v8814_v59  ;;  %v2447_v46 = vld [vmem:[%s10989_s14 + $0x688] sm:$0xff]  ;;  %v8758_v55 = vcombine.high %v2319_v44, %v2323_v45 }
 0x388   : > { %5515 = vmatpush1.bf16.msra.mxu0 %v8685_v33  ;;  %v2451_v50 = vld [vmem:[%s10989_s14 + $0x6a8] sm:$0xff]  ;;  %v8757_v33 = vcombine.low %v2319_v44, %v2323_v45 }
 0x389   : > { %5516 = vmatprep.subr.bf16.mxu0 %v8678_v60  ;;  %v2311_v56 = vld [vmem:[%s10989_s14 + $0x248] sm:$0xff]  ;;  %v8886_v59 = vcombine.high %v2447_v46, %v2451_v50 }
 0x38a   : > { %5556 = vmatpush1.bf16.msra.mxu1 %v8813_v62  ;;  %v2315_v57 = vld [vmem:[%s10989_s14 + $0x268] sm:$0xff]  ;;  %v8885_v62 = vcombine.low %v2447_v46, %v2451_v50 }
 0x38b   : > { %5557 = vmatprep.subr.bf16.mxu1 %v8806_v49  ;;  %v2439_v58 = vld [vmem:[%s10989_s14 + $0x648] sm:$0xff]  ;;  %v8750_v60 = vcombine.high %v2311_v56, %v2315_v57 }
 0x38c   : > { %5517 = vmatpush1.bf16.msra.mxu0 %v8677_v4  ;;  %v2443_v18 = vld [vmem:[%s10989_s14 + $0x668] sm:$0xff]  ;;  %v8749_v4 = vcombine.low %v2311_v56, %v2315_v57 }
 0x38d   : > { %5518 = vmatprep.subr.bf16.mxu0 %v8798_v6  ;;  %v2303_v63 = vld [vmem:[%s10989_s14 + $0x208] sm:$0xff]  ;;  %v8878_v49 = vcombine.high %v2439_v58, %v2443_v18 }
 0x38e   : > { %5558 = vmatpush1.bf16.msra.mxu1 %v8805_v5  ;;  %v2307_v37 = vld [vmem:[%s10989_s14 + $0x228] sm:$0xff]  ;;  %v8877_v5 = vcombine.low %v2439_v58, %v2443_v18 }
 0x38f   : > { %5559 = vmatprep.subr.bf16.mxu1 %v8926_v51  ;;  %v2431_v0 = vld [vmem:[%s10989_s14 + $0x608] sm:$0xff]  ;;  %v8742_v6 = vcombine.high %v2303_v63, %v2307_v37 }
 0x390   : > { %5519 = vmatpush2.bf16.msra.mxu0 %v8797_v17  ;;  %v2435_v1 = vld [vmem:[%s10989_s14 + $0x628] sm:$0xff]  ;;  %v8741_v17 = vcombine.low %v2303_v63, %v2307_v37 }
 0x391   : > { %5520 = vmatprep.subr.bf16.mxu0 %v8790_v12  ;;  %v2551_v7 = vld [vmem:[%s10989_s14 + $0x9c8] sm:$0xff]  ;;  %v8870_v51 = vcombine.high %v2431_v0, %v2435_v1 }
 0x392   : > { %5560 = vmatpush2.bf16.msra.mxu1 %v8925_v11  ;;  %v2555_v8 = vld [vmem:[%s10989_s14 + $0x9e8] sm:$0xff]  ;;  %v8869_v11 = vcombine.low %v2431_v0, %v2435_v1 }
 0x393   : > { %5561 = vmatprep.subr.bf16.mxu1 %v8918_v16  ;;  %v2679_v9 = vld [vmem:[%s10989_s14 + $0xdc8] sm:$0xff]  ;;  %v8990_v12 = vcombine.high %v2551_v7, %v2555_v8 }
 0x394   : > { %5521 = vmatpush2.bf16.msra.mxu0 %v8789_v20  ;;  %v2683_v10 = vld [vmem:[%s10989_s14 + $0xde8] sm:$0xff]  ;;  %v8989_v20 = vcombine.low %v2551_v7, %v2555_v8 }
 0x395   : > { %5522 = vmatprep.subr.bf16.mxu0 %v8782_v24  ;;  %v2543_v13 = vld [vmem:[%s10989_s14 + $0x988] sm:$0xff]  ;;  %v9118_v16 = vcombine.high %v2679_v9, %v2683_v10 }
 0x396   : > { %5562 = vmatpush2.bf16.msra.mxu1 %v8917_v21  ;;  %v2547_v14 = vld [vmem:[%s10989_s14 + $0x9a8] sm:$0xff]  ;;  %v9117_v21 = vcombine.low %v2679_v9, %v2683_v10 }
 0x397   : > { %5563 = vmatprep.subr.bf16.mxu1 %v8910_v28  ;;  %v2671_v15 = vld [vmem:[%s10989_s14 + $0xd88] sm:$0xff]  ;;  %v8982_v24 = vcombine.high %v2543_v13, %v2547_v14 }
 0x398   : > { %5523 = vmatpush2.bf16.msra.mxu0 %v8781_v30  ;;  %v2675_v19 = vld [vmem:[%s10989_s14 + $0xda8] sm:$0xff]  ;;  %v8981_v30 = vcombine.low %v2543_v13, %v2547_v14 }
 0x399   : > { %5524 = vmatprep.subr.bf16.mxu0 %v8774_v32  ;;  %v9110_v25 = vcombine.high %v2671_v15, %v2675_v19  ;;  %v2535_v26 = vld [vmem:[%s10989_s14 + $0x948] sm:$0xff] }
 0x39a   : > { %5564 = vmatpush2.bf16.msra.mxu1 %v8909_v31  ;;  %v2539_v27 = vld [vmem:[%s10989_s14 + $0x968] sm:$0xff]  ;;  %v9109_v31 = vcombine.low %v2671_v15, %v2675_v19 }
 0x39b   : > { %5565 = vmatprep.subr.bf16.mxu1 %v8902_v39  ;;  %v2663_v28 = vld [vmem:[%s10989_s14 + $0xd48] sm:$0xff]  ;;  %v8974_v32 = vcombine.high %v2535_v26, %v2539_v27 }
 0x39c   : > { %5525 = vmatpush2.bf16.msra.mxu0 %v8773_v41  ;;  %v2667_v29 = vld [vmem:[%s10989_s14 + $0xd68] sm:$0xff]  ;;  %v8973_v41 = vcombine.low %v2535_v26, %v2539_v27 }
 0x39d   : > { %5526 = vmatprep.subr.bf16.mxu0 %v8766_v43  ;;  %v9102_v34 = vcombine.high %v2663_v28, %v2667_v29  ;;  %v2527_v35 = vld [vmem:[%s10989_s14 + $0x908] sm:$0xff] }
 0x39e   : > { %5566 = vmatpush2.bf16.msra.mxu1 %v8901_v42  ;;  %v2531_v38 = vld [vmem:[%s10989_s14 + $0x928] sm:$0xff]  ;;  %v9101_v42 = vcombine.low %v2663_v28, %v2667_v29 }
 0x39f   : > { %5567 = vmatprep.subr.bf16.mxu1 %v8894_v48  ;;  %v2655_v39 = vld [vmem:[%s10989_s14 + $0xd08] sm:$0xff]  ;;  %v8966_v43 = vcombine.high %v2527_v35, %v2531_v38 }
 0x3a0   : > { %5527 = vmatpush2.bf16.msra.mxu0 %v8765_v53  ;;  %v2659_v40 = vld [vmem:[%s10989_s14 + $0xd28] sm:$0xff]  ;;  %v8965_v53 = vcombine.low %v2527_v35, %v2531_v38 }
 0x3a1   : > { %5528 = vmatprep.subr.bf16.mxu0 %v8758_v55  ;;  %v9094_v44 = vcombine.high %v2655_v39, %v2659_v40  ;;  %v2519_v45 = vld [vmem:[%s10989_s14 + $0x8c8] sm:$0xff] }
 0x3a2   : > { %5568 = vmatpush2.bf16.msra.mxu1 %v8893_v54  ;;  %v2523_v46 = vld [vmem:[%s10989_s14 + $0x8e8] sm:$0xff]  ;;  %v9093_v54 = vcombine.low %v2655_v39, %v2659_v40 }
 0x3a3   : > { %5569 = vmatprep.subr.bf16.mxu1 %v8886_v59  ;;  %v2647_v48 = vld [vmem:[%s10989_s14 + $0xcc8] sm:$0xff]  ;;  %v8958_v55 = vcombine.high %v2519_v45, %v2523_v46 }
 0x3a4   : > { %5529 = vmatpush2.bf16.msra.mxu0 %v8757_v33  ;;  %v2651_v50 = vld [vmem:[%s10989_s14 + $0xce8] sm:$0xff]  ;;  %v8957_v33 = vcombine.low %v2519_v45, %v2523_v46 }
 0x3a5   : > { %5530 = vmatprep.subr.bf16.mxu0 %v8750_v60  ;;  %v9086_v56 = vcombine.high %v2647_v48, %v2651_v50  ;;  %v2511_v57 = vld [vmem:[%s10989_s14 + $0x888] sm:$0xff] }
 0x3a6   : > { %5570 = vmatpush2.bf16.msra.mxu1 %v8885_v62  ;;  %v2515_v58 = vld [vmem:[%s10989_s14 + $0x8a8] sm:$0xff]  ;;  %v9085_v62 = vcombine.low %v2647_v48, %v2651_v50 }
 0x3a7   : > { %5571 = vmatprep.subr.bf16.mxu1 %v8878_v49  ;;  %v2639_v59 = vld [vmem:[%s10989_s14 + $0xc88] sm:$0xff]  ;;  %v8950_v60 = vcombine.high %v2511_v57, %v2515_v58 }
 0x3a8   : > { %5531 = vmatpush2.bf16.msra.mxu0 %v8749_v4  ;;  %v2643_v18 = vld [vmem:[%s10989_s14 + $0xca8] sm:$0xff]  ;;  %v8949_v4 = vcombine.low %v2511_v57, %v2515_v58 }
 0x3a9   : > { %5532 = vmatprep.subr.bf16.mxu0 %v8742_v6  ;;  %v9078_v63 = vcombine.high %v2639_v59, %v2643_v18  ;;  %v2503_v37 = vld [vmem:[%s10989_s14 + $0x848] sm:$0xff] }
 0x3aa   : > { %5572 = vmatpush2.bf16.msra.mxu1 %v8877_v5  ;;  %v2507_v0 = vld [vmem:[%s10989_s14 + $0x868] sm:$0xff]  ;;  %v9077_v5 = vcombine.low %v2639_v59, %v2643_v18 }
 0x3ab   : > { %5573 = vmatprep.subr.bf16.mxu1 %v8870_v51  ;;  %v2631_v49 = vld [vmem:[%s10989_s14 + $0xc48] sm:$0xff]  ;;  %v8942_v6 = vcombine.high %v2503_v37, %v2507_v0 }
 0x3ac   : > { %5533 = vmatpush2.bf16.msra.mxu0 %v8741_v17  ;;  %v2635_v1 = vld [vmem:[%s10989_s14 + $0xc68] sm:$0xff]  ;;  %v8941_v17 = vcombine.low %v2503_v37, %v2507_v0 }
 0x3ad   : > { %5584 = vmatprep.subr.bf16.mxu0 %v8990_v12  ;;  %v9070_v7 = vcombine.high %v2631_v49, %v2635_v1  ;;  %v2495_v8 = vld [vmem:[%s10989_s14 + $0x808] sm:$0xff] }
 0x3ae   : > { %5574 = vmatpush2.bf16.msra.mxu1 %v8869_v11  ;;  %v2499_v9 = vld [vmem:[%s10989_s14 + $0x828] sm:$0xff]  ;;  %v9069_v11 = vcombine.low %v2631_v49, %v2635_v1 }
 0x3af   : > { %5625 = vmatprep.subr.bf16.mxu1 %v9118_v16  ;;  %5535 = vmatmul.mubr.bf16.vlgmr.msra.gmra.mxu0 %v11141_v47  ;;  %v2623_v51 = vld [vmem:[%s10989_s14 + $0xc08] sm:$0xff]  ;;  %v8934_v12 = vcombine.high %v2495_v8, %v2499_v9 }
 0x3b0   : > { %5585 = vmatpush1.bf16.msra.mxu0 %v8989_v20  ;;  %5616 = vmatprep.mubr.bf16.mxu0 %v11165_v36  ;;  %v2627_v10 = vld [vmem:[%s10989_s14 + $0xc28] sm:$0xff]  ;;  %v8933_v20 = vcombine.low %v2495_v8, %v2499_v9 }
 0x3b1   : > { %5576 = vmatmul.mubr.bf16.vlgmr.msra.gmra.mxu1 %v11152_v52  ;;  %5586 = vmatprep.subr.bf16.mxu0 %v8982_v24  ;;  %v9062_v13 = vcombine.high %v2623_v51, %v2627_v10  ;;  %v2615_v14 = vld [vmem:[%s10989_s14 + $0xbc8] sm:$0xff] }
 0x3b2   : > { %5626 = vmatpush1.bf16.msra.mxu1 %v9117_v21  ;;  %5657 = vmatprep.mubr.bf16.mxu1 %v11170_v61  ;;  %v2619_v15 = vld [vmem:[%s10989_s14 + $0xbe8] sm:$0xff]  ;;  %v9061_v21 = vcombine.low %v2623_v51, %v2627_v10 }
 0x3b3   : > { %5627 = vmatprep.subr.bf16.mxu1 %v9110_v25  ;;  %v2743_v16 = vld [vmem:[%s10989_s14 + $0xfc8] sm:$0xff]  ;;  %v9054_v24 = vcombine.high %v2615_v14, %v2619_v15 }
 0x3b4   : > { %5587 = vmatpush1.bf16.msra.mxu0 %v8981_v30  ;;  %v2747_v19 = vld [vmem:[%s10989_s14 + $0xfe8] sm:$0xff]  ;;  %v9053_v30 = vcombine.low %v2615_v14, %v2619_v15 }
 0x3b5   : > { %5588 = vmatprep.subr.bf16.mxu0 %v8974_v32  ;;  %v9182_v25 = vcombine.high %v2743_v16, %v2747_v19  ;;  %v2607_v26 = vld [vmem:[%s10989_s14 + $0xb88] sm:$0xff] }
 0x3b6   : > { %5628 = vmatpush1.bf16.msra.mxu1 %v9109_v31  ;;  %v2611_v27 = vld [vmem:[%s10989_s14 + $0xba8] sm:$0xff]  ;;  %v9181_v31 = vcombine.low %v2743_v16, %v2747_v19 }
 0x3b7   : > { %5629 = vmatprep.subr.bf16.mxu1 %v9102_v34  ;;  %v2735_v28 = vld [vmem:[%s10989_s14 + $0xf88] sm:$0xff]  ;;  %v9046_v32 = vcombine.high %v2607_v26, %v2611_v27 }
 0x3b8   : > { %5589 = vmatpush1.bf16.msra.mxu0 %v8973_v41  ;;  %v2739_v29 = vld [vmem:[%s10989_s14 + $0xfa8] sm:$0xff]  ;;  %v9045_v41 = vcombine.low %v2607_v26, %v2611_v27  ;;  %v2296_v26 = vld [vmem:[%s10989_s14 + $0x1d0] sm:$0xff] }
 0x3b9   : > { %5590 = vmatprep.subr.bf16.mxu0 %v8966_v43  ;;  %v9174_v34 = vcombine.high %v2735_v28, %v2739_v29  ;;  %v2599_v35 = vld [vmem:[%s10989_s14 + $0xb48] sm:$0xff]  ;;  %v2300_v27 = vld [vmem:[%s10989_s14 + $0x1f0] sm:$0xff] }
 0x3ba   : > { %5630 = vmatpush1.bf16.msra.mxu1 %v9101_v42  ;;  %v2603_v38 = vld [vmem:[%s10989_s14 + $0xb68] sm:$0xff]  ;;  %v9173_v42 = vcombine.low %v2735_v28, %v2739_v29  ;;  %v2424_v28 = vld [vmem:[%s10989_s14 + $0x5d0] sm:$0xff] }
 0x3bb   : > { %5631 = vmatprep.subr.bf16.mxu1 %v9094_v44  ;;  %v2727_v39 = vld [vmem:[%s10989_s14 + $0xf48] sm:$0xff]  ;;  %v9038_v43 = vcombine.high %v2599_v35, %v2603_v38  ;;  %v2428_v29 = vld [vmem:[%s10989_s14 + $0x5f0] sm:$0xff] }
 0x3bc   : > { %5591 = vmatpush1.bf16.msra.mxu0 %v8965_v53  ;;  %v2731_v40 = vld [vmem:[%s10989_s14 + $0xf68] sm:$0xff]  ;;  %v9037_v53 = vcombine.low %v2599_v35, %v2603_v38  ;;  %v2288_v35 = vld [vmem:[%s10989_s14 + $0x190] sm:$0xff] }
 0x3bd   : > { %5592 = vmatprep.subr.bf16.mxu0 %v8958_v55  ;;  %v9166_v44 = vcombine.high %v2727_v39, %v2731_v40  ;;  %v2591_v45 = vld [vmem:[%s10989_s14 + $0xb08] sm:$0xff]  ;;  %v2292_v38 = vld [vmem:[%s10989_s14 + $0x1b0] sm:$0xff] }
 0x3be   : > { %5632 = vmatpush1.bf16.msra.mxu1 %v9093_v54  ;;  %v2595_v46 = vld [vmem:[%s10989_s14 + $0xb28] sm:$0xff]  ;;  %v9165_v54 = vcombine.low %v2727_v39, %v2731_v40  ;;  %v2416_v39 = vld [vmem:[%s10989_s14 + $0x590] sm:$0xff] }
 0x3bf   : > { %5633 = vmatprep.subr.bf16.mxu1 %v9086_v56  ;;  %v2719_v48 = vld [vmem:[%s10989_s14 + $0xf08] sm:$0xff]  ;;  %v9030_v55 = vcombine.high %v2591_v45, %v2595_v46  ;;  %v2420_v40 = vld [vmem:[%s10989_s14 + $0x5b0] sm:$0xff] }
 0x3c0   : > { %5593 = vmatpush1.bf16.msra.mxu0 %v8957_v33  ;;  %v2723_v50 = vld [vmem:[%s10989_s14 + $0xf28] sm:$0xff]  ;;  %v9029_v33 = vcombine.low %v2591_v45, %v2595_v46  ;;  %v2280_v45 = vld [vmem:[%s10989_s14 + $0x150] sm:$0xff] }
 0x3c1   : > { %5594 = vmatprep.subr.bf16.mxu0 %v8950_v60  ;;  %v9158_v56 = vcombine.high %v2719_v48, %v2723_v50  ;;  %v2583_v57 = vld [vmem:[%s10989_s14 + $0xac8] sm:$0xff]  ;;  %v2284_v46 = vld [vmem:[%s10989_s14 + $0x170] sm:$0xff] }
 0x3c2   : > { %5634 = vmatpush1.bf16.msra.mxu1 %v9085_v62  ;;  %v2587_v58 = vld [vmem:[%s10989_s14 + $0xae8] sm:$0xff]  ;;  %v9157_v62 = vcombine.low %v2719_v48, %v2723_v50  ;;  %v2408_v50 = vld [vmem:[%s10989_s14 + $0x550] sm:$0xff] }
 0x3c3   : > { %5635 = vmatprep.subr.bf16.mxu1 %v9078_v63  ;;  %v2711_v59 = vld [vmem:[%s10989_s14 + $0xec8] sm:$0xff]  ;;  %v9022_v60 = vcombine.high %v2583_v57, %v2587_v58 }
 0x3c4   : > { %5595 = vmatpush1.bf16.msra.mxu0 %v8949_v4  ;;  %v2715_v18 = vld [vmem:[%s10989_s14 + $0xee8] sm:$0xff]  ;;  %v9021_v4 = vcombine.low %v2583_v57, %v2587_v58  ;;  %v8855_v58 = vcombine.low %v2416_v39, %v2420_v40 }
 0x3c5   : > { %5596 = vmatprep.subr.bf16.mxu0 %v8942_v6  ;;  %v9150_v63 = vcombine.high %v2711_v59, %v2715_v18  ;;  %v2575_v37 = vld [vmem:[%s10989_s14 + $0xa88] sm:$0xff] }
 0x3c6   : > { %5636 = vmatpush1.bf16.msra.mxu1 %v9077_v5  ;;  %v2579_v0 = vld [vmem:[%s10989_s14 + $0xaa8] sm:$0xff]  ;;  %v9149_v5 = vcombine.low %v2711_v59, %v2715_v18  ;;  %v8720_v59 = vcombine.high %v2280_v45, %v2284_v46 }
 0x3c7   : > { %5637 = vmatprep.subr.bf16.mxu1 %v9070_v7  ;;  %v2703_v49 = vld [vmem:[%s10989_s14 + $0xe88] sm:$0xff]  ;;  %v9014_v6 = vcombine.high %v2575_v37, %v2579_v0 }
 0x3c8   : > { %5597 = vmatpush1.bf16.msra.mxu0 %v8941_v17  ;;  %v2707_v1 = vld [vmem:[%s10989_s14 + $0xea8] sm:$0xff]  ;;  %v9013_v17 = vcombine.low %v2575_v37, %v2579_v0  ;;  %v2400_v0 = vld [vmem:[%s10989_s14 + $0x510] sm:$0xff] }
 0x3c9   : > { %5598 = vmatprep.subr.bf16.mxu0 %v8934_v12  ;;  %v9142_v7 = vcombine.high %v2703_v49, %v2707_v1  ;;  %v2567_v8 = vld [vmem:[%s10989_s14 + $0xa48] sm:$0xff] }
 0x3ca   : > { %5638 = vmatpush1.bf16.msra.mxu1 %v9069_v11  ;;  %v2571_v9 = vld [vmem:[%s10989_s14 + $0xa68] sm:$0xff]  ;;  %v9141_v11 = vcombine.low %v2703_v49, %v2707_v1  ;;  %v2404_v49 = vld [vmem:[%s10989_s14 + $0x530] sm:$0xff] }
 0x3cb   : > { %5639 = vmatprep.subr.bf16.mxu1 %v9062_v13  ;;  %v2695_v51 = vld [vmem:[%s10989_s14 + $0xe48] sm:$0xff]  ;;  %v9006_v12 = vcombine.high %v2567_v8, %v2571_v9 }
 0x3cc   : > { %5599 = vmatpush1.bf16.msra.mxu0 %v8933_v20  ;;  %v2699_v10 = vld [vmem:[%s10989_s14 + $0xe68] sm:$0xff]  ;;  %v9005_v20 = vcombine.low %v2567_v8, %v2571_v9  ;;  %v8840_v9 = vcombine.high %v2400_v0, %v2404_v49 }
 0x3cd   : > { %5600 = vmatprep.subr.bf16.mxu0 %v9054_v24  ;;  %v9134_v13 = vcombine.high %v2695_v51, %v2699_v10  ;;  %v2559_v14 = vld [vmem:[%s10989_s14 + $0xa08] sm:$0xff] }
 0x3ce   : > { %5640 = vmatpush1.bf16.msra.mxu1 %v9061_v21  ;;  %v2563_v15 = vld [vmem:[%s10989_s14 + $0xa28] sm:$0xff]  ;;  %v9133_v21 = vcombine.low %v2695_v51, %v2699_v10  ;;  %v2264_v51 = vld [vmem:[%s10989_s14 + $0xd0] sm:$0xff] }
 0x3cf   : > { %5641 = vmatprep.subr.bf16.mxu1 %v9182_v25  ;;  %v2687_v16 = vld [vmem:[%s10989_s14 + $0xe08] sm:$0xff]  ;;  %v8998_v24 = vcombine.high %v2559_v14, %v2563_v15  ;;  %v2268_v10 = vld [vmem:[%s10989_s14 + $0xf0] sm:$0xff] }
 0x3d0   : > { %5601 = vmatpush2.bf16.msra.mxu0 %v9053_v30  ;;  %v2691_v19 = vld [vmem:[%s10989_s14 + $0xe28] sm:$0xff]  ;;  %v8997_v30 = vcombine.low %v2559_v14, %v2563_v15  ;;  %v8704_v14 = vcombine.high %v2264_v51, %v2268_v10 }
 0x3d1   : > { %5602 = vmatprep.subr.bf16.mxu0 %v9046_v32  ;;  %v9126_v25 = vcombine.high %v2687_v16, %v2691_v19  ;;  %v8736_v32 = vcombine.high %v2296_v26, %v2300_v27 }
 0x3d2   : > { %5642 = vmatpush2.bf16.msra.mxu1 %v9181_v31  ;;  %v9125_v31 = vcombine.low %v2687_v16, %v2691_v19  ;;  %v2256_v16 = vld [vmem:[%s10989_s14 + $0x90] sm:$0xff] }
 0x3d3   : > { %5643 = vmatprep.subr.bf16.mxu1 %v9174_v34  ;;  %v8864_v34 = vcombine.high %v2424_v28, %v2428_v29  ;;  %v2260_v19 = vld [vmem:[%s10989_s14 + $0xb0] sm:$0xff] }
 0x3d4   : > { %5603 = vmatpush2.bf16.msra.mxu0 %v9045_v41  ;;  %v8735_v41 = vcombine.low %v2296_v26, %v2300_v27  ;;  %v8696_v26 = vcombine.high %v2256_v16, %v2260_v19 }
 0x3d5   : > { %5604 = vmatprep.subr.bf16.mxu0 %v9038_v43  ;;  %v8728_v43 = vcombine.high %v2288_v35, %v2292_v38 }
 0x3d6   : > { %5644 = vmatpush2.bf16.msra.mxu1 %v9173_v42  ;;  %v8863_v42 = vcombine.low %v2424_v28, %v2428_v29  ;;  %v2248_v28 = vld [vmem:[%s10989_s14 + $0x50] sm:$0xff] }
 0x3d7   : > { %5645 = vmatprep.subr.bf16.mxu1 %v9166_v44  ;;  %v8856_v44 = vcombine.high %v2416_v39, %v2420_v40  ;;  %v2252_v29 = vld [vmem:[%s10989_s14 + $0x70] sm:$0xff] }
 0x3d8   : > { %5605 = vmatpush2.bf16.msra.mxu0 %v9037_v53  ;;  %v2412_v53 = vld [vmem:[%s10989_s14 + $0x570] sm:$0xff] }
 0x3d9   : > { %5606 = vmatprep.subr.bf16.mxu0 %v9030_v55  ;;  %v8727_v55 = vcombine.low %v2288_v35, %v2292_v38  ;;  %v8688_v35 = vcombine.high %v2248_v28, %v2252_v29  ;;  %v2240_v39 = vld [vmem:[%s10989_s14 + $0x10] sm:$0xff] }
 0x3da   : > { %5646 = vmatpush2.bf16.msra.mxu1 %v9165_v54  ;;  %v2244_v40 = vld [vmem:[%s10989_s14 + $0x30] sm:$0xff] }
 0x3db   : > { %5647 = vmatprep.subr.bf16.mxu1 %v9158_v56 }
 0x3dc   : > { %5607 = vmatpush2.bf16.msra.mxu0 %v9029_v33  ;;  %v8848_v33 = vcombine.high %v2408_v50, %v2412_v53 }
 0x3dd   : > { %5608 = vmatprep.subr.bf16.mxu0 %v9022_v60  ;;  %v2276_v60 = vld [vmem:[%s10989_s14 + $0x130] sm:$0xff] }
 0x3de   : > { %5648 = vmatpush2.bf16.msra.mxu1 %v9157_v62  ;;  %v2272_v62 = vld [vmem:[%s10989_s14 + $0x110] sm:$0xff] }
 0x3df   : > { %5649 = vmatprep.subr.bf16.mxu1 %v9150_v63 }
 0x3e0   : > { %5609 = vmatpush2.bf16.msra.mxu0 %v9021_v4  ;;  %v8719_v4 = vcombine.low %v2280_v45, %v2284_v46  ;;  %v8680_v45 = vcombine.high %v2240_v39, %v2244_v40 }
 0x3e1   : > { %5610 = vmatprep.subr.bf16.mxu0 %v9014_v6  ;;  %v8847_v6 = vcombine.low %v2408_v50, %v2412_v53  ;;  %v2364_v50 = vld [vmem:[%s10989_s14 + $0x3f0] sm:$0xff] }
 0x3e2   : > { %5650 = vmatpush2.bf16.msra.mxu1 %v9149_v5  ;;  %v2488_v53 = vld [vmem:[%s10989_s14 + $0x7d0] sm:$0xff] }
 0x3e3   : > { %5651 = vmatprep.subr.bf16.mxu1 %v9142_v7  ;;  %v8712_v7 = vcombine.high %v2272_v62, %v2276_v60 }
 0x3e4   : > { %5611 = vmatpush2.bf16.msra.mxu0 %v9013_v17  ;;  %v2392_v17 = vld [vmem:[%s10989_s14 + $0x4d0] sm:$0xff] }
 0x3e5   : > { %5612 = vmatprep.subr.bf16.mxu0 %v9006_v12  ;;  %v8711_v12 = vcombine.low %v2272_v62, %v2276_v60  ;;  %v2480_v62 = vld [vmem:[%s10989_s14 + $0x790] sm:$0xff] }
 0x3e6   : > { %5652 = vmatpush2.bf16.msra.mxu1 %v9141_v11  ;;  %v2396_v11 = vld [vmem:[%s10989_s14 + $0x4f0] sm:$0xff] }
 0x3e7   : > { %5653 = vmatprep.subr.bf16.mxu1 %v9134_v13  ;;  %v8839_v13 = vcombine.low %v2400_v0, %v2404_v49  ;;  %v8832_v15 = vcombine.high %v2392_v17, %v2396_v11  ;;  %v2484_v60 = vld [vmem:[%s10989_s14 + $0x7b0] sm:$0xff] }
 0x3e8   : > { %5613 = vmatpush2.bf16.msra.mxu0 %v9005_v20  ;;  %v2384_v20 = vld [vmem:[%s10989_s14 + $0x490] sm:$0xff] }
 0x3e9   : > { %5614 = vmatprep.subr.bf16.mxu0 %v8998_v24  ;;  %v8703_v24 = vcombine.low %v2264_v51, %v2268_v10 }
 0x3ea   : > { %5654 = vmatpush2.bf16.msra.mxu1 %v9133_v21  ;;  %v2388_v21 = vld [vmem:[%s10989_s14 + $0x4b0] sm:$0xff] }
 0x3eb   : > { %5655 = vmatprep.subr.bf16.mxu1 %v9126_v25  ;;  %v8831_v25 = vcombine.low %v2392_v17, %v2396_v11  ;;  %v8824_v27 = vcombine.high %v2384_v20, %v2388_v21  ;;  %v2336_v17 = vld [vmem:[%s10989_s14 + $0x310] sm:$0xff] }
 0x3ec   : > { %5615 = vmatpush2.bf16.msra.mxu0 %v8997_v30  ;;  %v2376_v30 = vld [vmem:[%s10989_s14 + $0x450] sm:$0xff] }
 0x3ed   : > { %5666 = vmatprep.subr.bf16.mxu0 %v8736_v32  ;;  %v8695_v32 = vcombine.low %v2256_v16, %v2260_v19  ;;  %v2340_v11 = vld [vmem:[%s10989_s14 + $0x330] sm:$0xff] }
 0x3ee   : > { %5656 = vmatpush2.bf16.msra.mxu1 %v9125_v31  ;;  %v2380_v31 = vld [vmem:[%s10989_s14 + $0x470] sm:$0xff]  ;;  %v8776_v16 = vcombine.high %v2336_v17, %v2340_v11 }
 0x3ef   : > { %5707 = vmatprep.subr.bf16.mxu1 %v8864_v34  ;;  %v5372_v48 = vpop.f32.mrf.mxu0  ;;  %5617 = vmatmul.mubr.bf16.vlgmr.msra.gmra.mxu0 %v11237_v2  ;;  %v8823_v34 = vcombine.low %v2384_v20, %v2388_v21  ;;  %v8816_v38 = vcombine.high %v2376_v30, %v2380_v31  ;;  %v2328_v20 = vld [vmem:[%s10989_s14 + $0x2d0] sm:$0xff] }
 0x3f0   : > { %5667 = vmatpush1.bf16.msra.mxu0 %v8735_v41  ;;  %5698 = vmatprep.mubr.bf16.mxu0 %v11091_v22  ;;  %v2368_v41 = vld [vmem:[%s10989_s14 + $0x410] sm:$0xff] }
 0x3f1   : > { %v5413_v54 = vpop.f32.mrf.mxu1  ;;  %5658 = vmatmul.mubr.bf16.vlgmr.msra.gmra.mxu1 %v11241_v3  ;;  %v5374_v57 = vpop.f32.mrf.mxu0  ;;  %5668 = vmatprep.subr.bf16.mxu0 %v8728_v43  ;;  %v8687_v43 = vcombine.low %v2248_v28, %v2252_v29  ;;  %v2332_v21 = vld [vmem:[%s10989_s14 + $0x2f0] sm:$0xff] }
 0x3f2   : > { %v11385_v56 = vadd.f32 %v5413_v54, %v5372_v48  ;;  %5708 = vmatpush1.bf16.msra.mxu1 %v8863_v42  ;;  %5739 = vmatprep.mubr.bf16.mxu1 %v11095_v23  ;;  %v2372_v42 = vld [vmem:[%s10989_s14 + $0x430] sm:$0xff]  ;;  %v8768_v28 = vcombine.high %v2328_v20, %v2332_v21 }
 0x3f3   : > { %v5415_v18 = vpop.f32.mrf.mxu1  ;;  %5709 = vmatprep.subr.bf16.mxu1 %v8856_v44  ;;  %v5376_v37 = vpop.f32.mrf.mxu0  ;;  %v8815_v44 = vcombine.low %v2376_v30, %v2380_v31  ;;  %v8808_v46 = vcombine.high %v2368_v41, %v2372_v42  ;;  %v2360_v48 = vld [vmem:[%s10989_s14 + $0x3d0] sm:$0xff] }
 0x3f4   : > { %v11390_v63 = vadd.f32 %v5415_v18, %v5374_v57  ;;  %5669 = vmatpush1.bf16.msra.mxu0 %v8727_v55  ;;  %v2492_v54 = vld [vmem:[%s10989_s14 + $0x7f0] sm:$0xff]  ;;  %v8679_v55 = vcombine.low %v2240_v39, %v2244_v40  ;;  %v8807_v57 = vcombine.low %v2368_v41, %v2372_v42  ;;  %v8799_v37 = vcombine.low %v2360_v48, %v2364_v50 }
 0x3f5   : > { %v5417_v1 = vpop.f32.mrf.mxu1  ;;  %v5377_v5 = vpop.f32.mrf.mxu0  ;;  %5670 = vmatprep.subr.bf16.mxu0 %v8720_v59  ;;  %v8928_v59 = vcombine.high %v2488_v53, %v2492_v54  ;;  %v2352_v18 = vld [vmem:[%s10989_s14 + $0x390] sm:$0xff]  ;;  %v8927_v0 = vcombine.low %v2488_v53, %v2492_v54 }
 0x3f6   : > { %5710 = vmatpush1.bf16.msra.mxu1 %v8855_v58  ;;  %v8800_v58 = vcombine.high %v2360_v48, %v2364_v50  ;;  %v8920_v1 = vcombine.high %v2480_v62, %v2484_v60  ;;  %v2348_v5 = vld [vmem:[%s10989_s14 + $0x370] sm:$0xff] }
 0x3f7   : > { %v5418_v8 = vpop.f32.mrf.mxu1  ;;  %5711 = vmatprep.subr.bf16.mxu1 %v8848_v33  ;;  %v2356_v33 = vld [vmem:[%s10989_s14 + $0x3b0] sm:$0xff] }
 0x3f8   : > { %5671 = vmatpush1.bf16.msra.mxu0 %v8719_v4  ;;  %v8792_v49 = vcombine.high %v2352_v18, %v2356_v33  ;;  %v2344_v4 = vld [vmem:[%s10989_s14 + $0x350] sm:$0xff]  ;;  %v8791_v8 = vcombine.low %v2352_v18, %v2356_v33 }
 0x3f9   : > { %5672 = vmatprep.subr.bf16.mxu0 %v8712_v7  ;;  %v2476_v7 = vld [vmem:[%s10989_s14 + $0x770] sm:$0xff]  ;;  %v8784_v51 = vcombine.high %v2344_v4, %v2348_v5 }
 0x3fa   : > { %5712 = vmatpush1.bf16.msra.mxu1 %v8847_v6  ;;  %v2472_v6 = vld [vmem:[%s10989_s14 + $0x750] sm:$0xff] }
 0x3fb   : > { %5713 = vmatprep.subr.bf16.mxu1 %v8840_v9  ;;  %v8919_v9 = vcombine.low %v2480_v62, %v2484_v60  ;;  %v8912_v10 = vcombine.high %v2472_v6, %v2476_v7  ;;  %v2320_v30 = vld [vmem:[%s10989_s14 + $0x290] sm:$0xff] }
 0x3fc   : > { %5673 = vmatpush1.bf16.msra.mxu0 %v8711_v12  ;;  %v2464_v12 = vld [vmem:[%s10989_s14 + $0x710] sm:$0xff] }
 0x3fd   : > { %5674 = vmatprep.subr.bf16.mxu0 %v8704_v14  ;;  %v8783_v14 = vcombine.low %v2344_v4, %v2348_v5  ;;  %v2324_v31 = vld [vmem:[%s10989_s14 + $0x2b0] sm:$0xff] }
 0x3fe   : > { %5714 = vmatpush1.bf16.msra.mxu1 %v8839_v13  ;;  %v2468_v13 = vld [vmem:[%s10989_s14 + $0x730] sm:$0xff]  ;;  %v8760_v39 = vcombine.high %v2320_v30, %v2324_v31 }
 0x3ff   : > { %5715 = vmatprep.subr.bf16.mxu1 %v8832_v15  ;;  %v8911_v15 = vcombine.low %v2472_v6, %v2476_v7  ;;  %v8904_v19 = vcombine.high %v2464_v12, %v2468_v13  ;;  %v2312_v41 = vld [vmem:[%s10989_s14 + $0x250] sm:$0xff] }
 0x400   : > { %5675 = vmatpush1.bf16.msra.mxu0 %v8703_v24  ;;  %v2456_v24 = vld [vmem:[%s10989_s14 + $0x6d0] sm:$0xff] }
 0x401   : > { %5676 = vmatprep.subr.bf16.mxu0 %v8696_v26  ;;  %v8775_v26 = vcombine.low %v2336_v17, %v2340_v11  ;;  %v2316_v42 = vld [vmem:[%s10989_s14 + $0x270] sm:$0xff] }
 0x402   : > { %5716 = vmatpush1.bf16.msra.mxu1 %v8831_v25  ;;  %v2460_v25 = vld [vmem:[%s10989_s14 + $0x6f0] sm:$0xff]  ;;  %v8752_v48 = vcombine.high %v2312_v41, %v2316_v42 }
 0x403   : > { %5717 = vmatprep.subr.bf16.mxu1 %v8824_v27  ;;  %v8903_v27 = vcombine.low %v2464_v12, %v2468_v13  ;;  %v8896_v29 = vcombine.high %v2456_v24, %v2460_v25  ;;  %v2304_v53 = vld [vmem:[%s10989_s14 + $0x210] sm:$0xff] }
 0x404   : > { %5677 = vmatpush1.bf16.msra.mxu0 %v8695_v32  ;;  %v2448_v32 = vld [vmem:[%s10989_s14 + $0x690] sm:$0xff] }
 0x405   : > { %5678 = vmatprep.subr.bf16.mxu0 %v8688_v35  ;;  %v8767_v35 = vcombine.low %v2328_v20, %v2332_v21  ;;  %v2308_v54 = vld [vmem:[%s10989_s14 + $0x230] sm:$0xff] }
 0x406   : > { %5718 = vmatpush1.bf16.msra.mxu1 %v8823_v34  ;;  %v2452_v34 = vld [vmem:[%s10989_s14 + $0x6b0] sm:$0xff]  ;;  %v8744_v18 = vcombine.high %v2304_v53, %v2308_v54 }
 0x407   : > { %5719 = vmatprep.subr.bf16.mxu1 %v8816_v38  ;;  %v8895_v38 = vcombine.low %v2456_v24, %v2460_v25  ;;  %v8888_v40 = vcombine.high %v2448_v32, %v2452_v34  ;;  %v2552_v62 = vld [vmem:[%s10989_s14 + $0x9d0] sm:$0xff] }
 0x408   : > { %5679 = vmatpush1.bf16.msra.mxu0 %v8687_v43  ;;  %v2440_v43 = vld [vmem:[%s10989_s14 + $0x650] sm:$0xff] }
 0x409   : > { %5680 = vmatprep.subr.bf16.mxu0 %v8680_v45  ;;  %v8759_v45 = vcombine.low %v2320_v30, %v2324_v31  ;;  %v2556_v60 = vld [vmem:[%s10989_s14 + $0x9f0] sm:$0xff] }
 0x40a   : > { %5720 = vmatpush1.bf16.msra.mxu1 %v8815_v44  ;;  %v2444_v44 = vld [vmem:[%s10989_s14 + $0x670] sm:$0xff]  ;;  %v8992_v4 = vcombine.high %v2552_v62, %v2556_v60 }
 0x40b   : > { %5721 = vmatprep.subr.bf16.mxu1 %v8808_v46  ;;  %v8887_v46 = vcombine.low %v2448_v32, %v2452_v34  ;;  %v8880_v50 = vcombine.high %v2440_v43, %v2444_v44  ;;  %v2544_v6 = vld [vmem:[%s10989_s14 + $0x990] sm:$0xff] }
 0x40c   : > { %5681 = vmatpush1.bf16.msra.mxu0 %v8679_v55  ;;  %v2432_v55 = vld [vmem:[%s10989_s14 + $0x610] sm:$0xff] }
 0x40d   : > { %5682 = vmatprep.subr.bf16.mxu0 %v8800_v58  ;;  %v8751_v58 = vcombine.low %v2312_v41, %v2316_v42  ;;  %v2548_v7 = vld [vmem:[%s10989_s14 + $0x9b0] sm:$0xff] }
 0x40e   : > { %5722 = vmatpush1.bf16.msra.mxu1 %v8807_v57  ;;  %v2436_v57 = vld [vmem:[%s10989_s14 + $0x630] sm:$0xff]  ;;  %v8984_v17 = vcombine.high %v2544_v6, %v2548_v7  ;;  %v8983_v21 = vcombine.low %v2544_v6, %v2548_v7 }
 0x40f   : > { %5723 = vmatprep.subr.bf16.mxu1 %v8928_v59  ;;  %v8879_v59 = vcombine.low %v2440_v43, %v2444_v44  ;;  %v8872_v33 = vcombine.high %v2432_v55, %v2436_v57  ;;  %v2536_v12 = vld [vmem:[%s10989_s14 + $0x950] sm:$0xff] }
 0x410   : > { %5683 = vmatpush2.bf16.msra.mxu0 %v8799_v37  ;;  %v2680_v37 = vld [vmem:[%s10989_s14 + $0xdd0] sm:$0xff] }
 0x411   : > { %5684 = vmatprep.subr.bf16.mxu0 %v8792_v49  ;;  %v8743_v49 = vcombine.low %v2304_v53, %v2308_v54  ;;  %v2540_v13 = vld [vmem:[%s10989_s14 + $0x970] sm:$0xff] }
 0x412   : > { %5724 = vmatpush2.bf16.msra.mxu1 %v8927_v0  ;;  %v2684_v0 = vld [vmem:[%s10989_s14 + $0xdf0] sm:$0xff] }
 0x413   : > { %5725 = vmatprep.subr.bf16.mxu1 %v8920_v1  ;;  %v8871_v1 = vcombine.low %v2432_v55, %v2436_v57  ;;  %v9120_v5 = vcombine.high %v2680_v37, %v2684_v0  ;;  %v2528_v30 = vld [vmem:[%s10989_s14 + $0x910] sm:$0xff] }
 0x414   : > { %5685 = vmatpush2.bf16.msra.mxu0 %v8791_v8  ;;  %v2672_v8 = vld [vmem:[%s10989_s14 + $0xd90] sm:$0xff] }
 0x415   : > { %5686 = vmatprep.subr.bf16.mxu0 %v8784_v51  ;;  %v8991_v51 = vcombine.low %v2552_v62, %v2556_v60  ;;  %v2532_v31 = vld [vmem:[%s10989_s14 + $0x930] sm:$0xff] }
 0x416   : > { %5726 = vmatpush2.bf16.msra.mxu1 %v8919_v9  ;;  %v2676_v9 = vld [vmem:[%s10989_s14 + $0xdb0] sm:$0xff]  ;;  %v8968_v42 = vcombine.high %v2528_v30, %v2532_v31  ;;  %v8967_v53 = vcombine.low %v2528_v30, %v2532_v31 }
 0x417   : > { %5727 = vmatprep.subr.bf16.mxu1 %v8912_v10  ;;  %v9119_v10 = vcombine.low %v2680_v37, %v2684_v0  ;;  %v9112_v11 = vcombine.high %v2672_v8, %v2676_v9  ;;  %v9111_v25 = vcombine.low %v2672_v8, %v2676_v9  ;;  %v2656_v34 = vld [vmem:[%s10989_s14 + $0xd10] sm:$0xff] }
 0x418   : > { %5687 = vmatpush2.bf16.msra.mxu0 %v8783_v14  ;;  %v2736_v30 = vld [vmem:[%s10989_s14 + $0xf90] sm:$0xff] }
 0x419   : > { %5688 = vmatprep.subr.bf16.mxu0 %v8776_v16  ;;  %v2668_v16 = vld [vmem:[%s10989_s14 + $0xd70] sm:$0xff] }
 0x41a   : > { %5728 = vmatpush2.bf16.msra.mxu1 %v8911_v15  ;;  %v2664_v15 = vld [vmem:[%s10989_s14 + $0xd50] sm:$0xff] }
 0x41b   : > { %5729 = vmatprep.subr.bf16.mxu1 %v8904_v19  ;;  %v9103_v41 = vcombine.low %v2664_v15, %v2668_v16  ;;  %v2740_v31 = vld [vmem:[%s10989_s14 + $0xfb0] sm:$0xff] }
 0x41c   : > { %5689 = vmatpush2.bf16.msra.mxu0 %v8775_v26  ;;  %v8976_v26 = vcombine.high %v2536_v12, %v2540_v13 }
 0x41d   : > { %5690 = vmatprep.subr.bf16.mxu0 %v8768_v28 }
 0x41e   : > { %5730 = vmatpush2.bf16.msra.mxu1 %v8903_v27 }
 0x41f   : > { %5731 = vmatprep.subr.bf16.mxu1 %v8896_v29 }
 0x420   : > { %5691 = vmatpush2.bf16.msra.mxu0 %v8767_v35  ;;  %v2660_v35 = vld [vmem:[%s10989_s14 + $0xd30] sm:$0xff] }
 0x421   : > { %5692 = vmatprep.subr.bf16.mxu0 %v8760_v39  ;;  %v9096_v44 = vcombine.high %v2656_v34, %v2660_v35  ;;  %v9095_v54 = vcombine.low %v2656_v34, %v2660_v35 }
 0x422   : > { %5732 = vmatpush2.bf16.msra.mxu1 %v8895_v38 }
 0x423   : > { %5733 = vmatprep.subr.bf16.mxu1 %v8888_v40 }
 0x424   : > { %5693 = vmatpush2.bf16.msra.mxu0 %v8759_v45  ;;  %v2520_v45 = vld [vmem:[%s10989_s14 + $0x8d0] sm:$0xff] }
 0x425   : > { %5694 = vmatprep.subr.bf16.mxu0 %v8752_v48  ;;  %v2648_v48 = vld [vmem:[%s10989_s14 + $0xcd0] sm:$0xff] }
 0x426   : > { %5734 = vmatpush2.bf16.msra.mxu1 %v8887_v46  ;;  %v2524_v46 = vld [vmem:[%s10989_s14 + $0x8f0] sm:$0xff] }
 0x427   : > { %5735 = vmatprep.subr.bf16.mxu1 %v8880_v50  ;;  %v2652_v50 = vld [vmem:[%s10989_s14 + $0xcf0] sm:$0xff]  ;;  %v8960_v55 = vcombine.high %v2520_v45, %v2524_v46  ;;  %v8959_v62 = vcombine.low %v2520_v45, %v2524_v46 }
 0x428   : > { %5695 = vmatpush2.bf16.msra.mxu0 %v8751_v58  ;;  %v9088_v57 = vcombine.high %v2648_v48, %v2652_v50  ;;  %v2512_v58 = vld [vmem:[%s10989_s14 + $0x890] sm:$0xff]  ;;  %v9087_v60 = vcombine.low %v2648_v48, %v2652_v50 }
 0x429   : > { %5696 = vmatprep.subr.bf16.mxu0 %v8744_v18  ;;  %v2640_v18 = vld [vmem:[%s10989_s14 + $0xc90] sm:$0xff] }
 0x42a   : > { %5736 = vmatpush2.bf16.msra.mxu1 %v8879_v59  ;;  %v2516_v59 = vld [vmem:[%s10989_s14 + $0x8b0] sm:$0xff] }
 0x42b   : > { %5737 = vmatprep.subr.bf16.mxu1 %v8872_v33  ;;  %v2644_v33 = vld [vmem:[%s10989_s14 + $0xcb0] sm:$0xff]  ;;  %v8952_v37 = vcombine.high %v2512_v58, %v2516_v59  ;;  %v8951_v6 = vcombine.low %v2512_v58, %v2516_v59 }
 0x42c   : > { %5697 = vmatpush2.bf16.msra.mxu0 %v8743_v49  ;;  %v9080_v0 = vcombine.high %v2640_v18, %v2644_v33  ;;  %v2504_v49 = vld [vmem:[%s10989_s14 + $0x850] sm:$0xff]  ;;  %v9079_v7 = vcombine.low %v2640_v18, %v2644_v33 }
 0x42d   : > { %5748 = vmatprep.subr.bf16.mxu0 %v8992_v4  ;;  %v2632_v4 = vld [vmem:[%s10989_s14 + $0xc50] sm:$0xff] }
 0x42e   : > { %5738 = vmatpush2.bf16.msra.mxu1 %v8871_v1  ;;  %v2508_v1 = vld [vmem:[%s10989_s14 + $0x870] sm:$0xff] }
 0x42f   : > { %5789 = vmatprep.subr.bf16.mxu1 %v9120_v5  ;;  %v5454_v14 = vpop.f32.mrf.mxu0  ;;  %5699 = vmatmul.mubr.bf16.vlgmr.msra.gmra.mxu0 %v11141_v47  ;;  %v2636_v5 = vld [vmem:[%s10989_s14 + $0xc70] sm:$0xff]  ;;  %v8944_v8 = vcombine.high %v2504_v49, %v2508_v1 }
 0x430   : > { %v5455_v19 = vadd.f32 %v5454_v14, %v11385_v56  ;;  %5749 = vmatpush1.bf16.msra.mxu0 %v8991_v51  ;;  %v9104_v56 = vcombine.high %v2664_v15, %v2668_v16  ;;  %5780 = vmatprep.mubr.bf16.mxu0 %v11165_v36  ;;  %v9072_v9 = vcombine.high %v2632_v4, %v2636_v5  ;;  %v2496_v51 = vld [vmem:[%s10989_s14 + $0x810] sm:$0xff] }
 0x431   : > { %v5495_v20 = vpop.f32.mrf.mxu1  ;;  %5740 = vmatmul.mubr.bf16.vlgmr.msra.gmra.mxu1 %v11152_v52  ;;  %v5456_v24 = vpop.f32.mrf.mxu0  ;;  %5750 = vmatprep.subr.bf16.mxu0 %v8984_v17  ;;  %v2624_v17 = vld [vmem:[%s10989_s14 + $0xc10] sm:$0xff] }
 0x432   : > { %5790 = vmatpush1.bf16.msra.mxu1 %v9119_v10  ;;  %v11458_v27 = vadd.f32 %v5495_v20, %v5455_v19  ;;  %v5457_v28 = vadd.f32 %v5456_v24, %v11390_v63  ;;  %5821 = vmatprep.mubr.bf16.mxu1 %v11170_v61  ;;  %v8975_v63 = vcombine.low %v2536_v12, %v2540_v13  ;;  %v2500_v10 = vld [vmem:[%s10989_s14 + $0x830] sm:$0xff] }
 0x433   : > { %v5497_v29 = vpop.f32.mrf.mxu1  ;;  %5791 = vmatprep.subr.bf16.mxu1 %v9112_v11  ;;  %v5458_v32 = vpop.f32.mrf.mxu0  ;;  %v2628_v11 = vld [vmem:[%s10989_s14 + $0xc30] sm:$0xff]  ;;  %v8943_v12 = vcombine.low %v2504_v49, %v2508_v1  ;;  %v9071_v13 = vcombine.low %v2632_v4, %v2636_v5  ;;  %v8936_v14 = vcombine.high %v2496_v51, %v2500_v10  ;;  %v8935_v24 = vcombine.low %v2496_v51, %v2500_v10 }
 0x434   : > { %v11467_v38 = vadd.f32 %v5497_v29, %v5457_v28  ;;  %5751 = vmatpush1.bf16.msra.mxu0 %v8983_v21  ;;  %v9064_v15 = vcombine.high %v2624_v17, %v2628_v11  ;;  %v2616_v16 = vld [vmem:[%s10989_s14 + $0xbd0] sm:$0xff] }
 0x435   : > { %v5499_v39 = vpop.f32.mrf.mxu1  ;;  %v5459_v40 = vpop.f32.mrf.mxu0  ;;  %5752 = vmatprep.subr.bf16.mxu0 %v8976_v26  ;;  %v2620_v19 = vld [vmem:[%s10989_s14 + $0xbf0] sm:$0xff] }
 0x436   : > { %5792 = vmatpush1.bf16.msra.mxu1 %v9111_v25  ;;  %v2744_v20 = vld [vmem:[%s10989_s14 + $0xfd0] sm:$0xff]  ;;  %v9063_v25 = vcombine.low %v2624_v17, %v2628_v11  ;;  %v9056_v26 = vcombine.high %v2616_v16, %v2620_v19  ;;  %v9055_v32 = vcombine.low %v2616_v16, %v2620_v19  ;;  %v9176_v39 = vcombine.high %v2736_v30, %v2740_v31 }
 0x437   : > { %v5500_v43 = vpop.f32.mrf.mxu1  ;;  %5793 = vmatprep.subr.bf16.mxu1 %v9104_v56  ;;  %v2748_v21 = vld [vmem:[%s10989_s14 + $0xff0] sm:$0xff] }
 0x438   : > { %5753 = vmatpush1.bf16.msra.mxu0 %v8975_v63  ;;  %v9184_v28 = vcombine.high %v2744_v20, %v2748_v21  ;;  %v2608_v29 = vld [vmem:[%s10989_s14 + $0xb90] sm:$0xff]  ;;  %v9183_v34 = vcombine.low %v2744_v20, %v2748_v21 }
 0x439   : > { %5754 = vmatprep.subr.bf16.mxu0 %v8968_v42  ;;  %v2612_v56 = vld [vmem:[%s10989_s14 + $0xbb0] sm:$0xff] }
 0x43a   : > { %5794 = vmatpush1.bf16.msra.mxu1 %v9103_v41  ;;  %v9048_v35 = vcombine.high %v2608_v29, %v2612_v56  ;;  %v2600_v63 = vld [vmem:[%s10989_s14 + $0xb50] sm:$0xff]  ;;  %v9047_v43 = vcombine.low %v2608_v29, %v2612_v56 }
 0x43b   : > { %5795 = vmatprep.subr.bf16.mxu1 %v9096_v44  ;;  %v2604_v40 = vld [vmem:[%s10989_s14 + $0xb70] sm:$0xff]  ;;  %v9175_v44 = vcombine.low %v2736_v30, %v2740_v31  ;;  %v2297_v30 = vld [vmem:[%s10989_s14 + $0x1d8] sm:$0xff] }
 0x43c   : > { %5755 = vmatpush1.bf16.msra.mxu0 %v8967_v53  ;;  %v2728_v41 = vld [vmem:[%s10989_s14 + $0xf50] sm:$0xff]  ;;  %v9040_v45 = vcombine.high %v2600_v63, %v2604_v40  ;;  %v2301_v31 = vld [vmem:[%s10989_s14 + $0x1f8] sm:$0xff] }
 0x43d   : > { %5756 = vmatprep.subr.bf16.mxu0 %v8960_v55  ;;  %v2732_v42 = vld [vmem:[%s10989_s14 + $0xf70] sm:$0xff]  ;;  %v9039_v55 = vcombine.low %v2600_v63, %v2604_v40  ;;  %v8738_v63 = vcombine.high %v2297_v30, %v2301_v31 }
 0x43e   : > { %5796 = vmatpush1.bf16.msra.mxu1 %v9095_v54  ;;  %v9168_v46 = vcombine.high %v2728_v41, %v2732_v42  ;;  %v2592_v48 = vld [vmem:[%s10989_s14 + $0xb10] sm:$0xff] }
 0x43f   : > { %5797 = vmatprep.subr.bf16.mxu1 %v9088_v57  ;;  %v2596_v50 = vld [vmem:[%s10989_s14 + $0xb30] sm:$0xff]  ;;  %v9167_v57 = vcombine.low %v2728_v41, %v2732_v42  ;;  %v2289_v41 = vld [vmem:[%s10989_s14 + $0x198] sm:$0xff] }
 0x440   : > { %5757 = vmatpush1.bf16.msra.mxu0 %v8959_v62  ;;  %v2720_v53 = vld [vmem:[%s10989_s14 + $0xf10] sm:$0xff]  ;;  %v9032_v58 = vcombine.high %v2592_v48, %v2596_v50  ;;  %v2293_v42 = vld [vmem:[%s10989_s14 + $0x1b8] sm:$0xff] }
 0x441   : > { %5758 = vmatprep.subr.bf16.mxu0 %v8952_v37  ;;  %v2724_v54 = vld [vmem:[%s10989_s14 + $0xf30] sm:$0xff]  ;;  %v9031_v37 = vcombine.low %v2592_v48, %v2596_v50  ;;  %v8730_v48 = vcombine.high %v2289_v41, %v2293_v42 }
 0x442   : > { %5798 = vmatpush1.bf16.msra.mxu1 %v9087_v60  ;;  %v9160_v59 = vcombine.high %v2720_v53, %v2724_v54  ;;  %v2584_v18 = vld [vmem:[%s10989_s14 + $0xad0] sm:$0xff] }
 0x443   : > { %5799 = vmatprep.subr.bf16.mxu1 %v9080_v0  ;;  %v2588_v33 = vld [vmem:[%s10989_s14 + $0xaf0] sm:$0xff]  ;;  %v9159_v0 = vcombine.low %v2720_v53, %v2724_v54  ;;  %v2281_v53 = vld [vmem:[%s10989_s14 + $0x158] sm:$0xff] }
 0x444   : > { %5759 = vmatpush1.bf16.msra.mxu0 %v8951_v6  ;;  %v2712_v62 = vld [vmem:[%s10989_s14 + $0xed0] sm:$0xff]  ;;  %v9024_v49 = vcombine.high %v2584_v18, %v2588_v33  ;;  %v2285_v54 = vld [vmem:[%s10989_s14 + $0x178] sm:$0xff] }
 0x445   : > { %5760 = vmatprep.subr.bf16.mxu0 %v8944_v8  ;;  %v2716_v60 = vld [vmem:[%s10989_s14 + $0xef0] sm:$0xff]  ;;  %v9023_v8 = vcombine.low %v2584_v18, %v2588_v33  ;;  %v8729_v18 = vcombine.low %v2289_v41, %v2293_v42 }
 0x446   : > { %5800 = vmatpush1.bf16.msra.mxu1 %v9079_v7  ;;  %v9152_v1 = vcombine.high %v2712_v62, %v2716_v60  ;;  %v2576_v4 = vld [vmem:[%s10989_s14 + $0xa90] sm:$0xff] }
 0x447   : > { %5801 = vmatprep.subr.bf16.mxu1 %v9072_v9  ;;  %v2580_v5 = vld [vmem:[%s10989_s14 + $0xab0] sm:$0xff]  ;;  %v9151_v9 = vcombine.low %v2712_v62, %v2716_v60 }
 0x448   : > { %5761 = vmatpush1.bf16.msra.mxu0 %v8943_v12  ;;  %v2704_v6 = vld [vmem:[%s10989_s14 + $0xe90] sm:$0xff]  ;;  %v9016_v51 = vcombine.high %v2576_v4, %v2580_v5 }
 0x449   : > { %5762 = vmatprep.subr.bf16.mxu0 %v8936_v14  ;;  %v2708_v7 = vld [vmem:[%s10989_s14 + $0xeb0] sm:$0xff]  ;;  %v9015_v14 = vcombine.low %v2576_v4, %v2580_v5  ;;  %v2277_v4 = vld [vmem:[%s10989_s14 + $0x138] sm:$0xff] }
 0x44a   : > { %5802 = vmatpush1.bf16.msra.mxu1 %v9071_v13  ;;  %v9144_v10 = vcombine.high %v2704_v6, %v2708_v7  ;;  %v2568_v17 = vld [vmem:[%s10989_s14 + $0xa50] sm:$0xff] }
 0x44b   : > { %5803 = vmatprep.subr.bf16.mxu1 %v9064_v15  ;;  %v2572_v11 = vld [vmem:[%s10989_s14 + $0xa70] sm:$0xff]  ;;  %v9143_v15 = vcombine.low %v2704_v6, %v2708_v7  ;;  %v2401_v7 = vld [vmem:[%s10989_s14 + $0x518] sm:$0xff] }
 0x44c   : > { %5763 = vmatpush1.bf16.msra.mxu0 %v8935_v24  ;;  %v2696_v12 = vld [vmem:[%s10989_s14 + $0xe50] sm:$0xff]  ;;  %v9008_v16 = vcombine.high %v2568_v17, %v2572_v11 }
 0x44d   : > { %5764 = vmatprep.subr.bf16.mxu0 %v9056_v26  ;;  %v2700_v13 = vld [vmem:[%s10989_s14 + $0xe70] sm:$0xff]  ;;  %v9007_v26 = vcombine.low %v2568_v17, %v2572_v11 }
 0x44e   : > { %5804 = vmatpush1.bf16.msra.mxu1 %v9063_v25  ;;  %v9136_v19 = vcombine.high %v2696_v12, %v2700_v13  ;;  %v2560_v20 = vld [vmem:[%s10989_s14 + $0xa10] sm:$0xff] }
 0x44f   : > { %5805 = vmatprep.subr.bf16.mxu1 %v9184_v28  ;;  %v2564_v21 = vld [vmem:[%s10989_s14 + $0xa30] sm:$0xff]  ;;  %v9135_v28 = vcombine.low %v2696_v12, %v2700_v13  ;;  %v2265_v13 = vld [vmem:[%s10989_s14 + $0xd8] sm:$0xff] }
 0x450   : > { %5765 = vmatpush2.bf16.msra.mxu0 %v9055_v32  ;;  %v2688_v24 = vld [vmem:[%s10989_s14 + $0xe10] sm:$0xff]  ;;  %v9000_v29 = vcombine.high %v2560_v20, %v2564_v21  ;;  %v2425_v32 = vld [vmem:[%s10989_s14 + $0x5d8] sm:$0xff] }
 0x451   : > { %5766 = vmatprep.subr.bf16.mxu0 %v9048_v35  ;;  %v2692_v25 = vld [vmem:[%s10989_s14 + $0xe30] sm:$0xff]  ;;  %v8999_v35 = vcombine.low %v2560_v20, %v2564_v21 }
 0x452   : > { %5806 = vmatpush2.bf16.msra.mxu1 %v9183_v34  ;;  %v9128_v56 = vcombine.high %v2688_v24, %v2692_v25  ;;  %v2429_v34 = vld [vmem:[%s10989_s14 + $0x5f8] sm:$0xff] }
 0x453   : > { %5807 = vmatprep.subr.bf16.mxu1 %v9176_v39  ;;  %v9127_v39 = vcombine.low %v2688_v24, %v2692_v25  ;;  %v8866_v40 = vcombine.high %v2425_v32, %v2429_v34  ;;  %v2257_v24 = vld [vmem:[%s10989_s14 + $0x98] sm:$0xff] }
 0x454   : > { %5767 = vmatpush2.bf16.msra.mxu0 %v9047_v43  ;;  %v2417_v43 = vld [vmem:[%s10989_s14 + $0x598] sm:$0xff] }
 0x455   : > { %5768 = vmatprep.subr.bf16.mxu0 %v9040_v45  ;;  %v8737_v45 = vcombine.low %v2297_v30, %v2301_v31  ;;  %v2261_v25 = vld [vmem:[%s10989_s14 + $0xb8] sm:$0xff] }
 0x456   : > { %5808 = vmatpush2.bf16.msra.mxu1 %v9175_v44  ;;  %v2421_v44 = vld [vmem:[%s10989_s14 + $0x5b8] sm:$0xff]  ;;  %v8698_v30 = vcombine.high %v2257_v24, %v2261_v25 }
 0x457   : > { %5809 = vmatprep.subr.bf16.mxu1 %v9168_v46  ;;  %v8865_v46 = vcombine.low %v2425_v32, %v2429_v34  ;;  %v8858_v50 = vcombine.high %v2417_v43, %v2421_v44  ;;  %v8857_v60 = vcombine.low %v2417_v43, %v2421_v44  ;;  %v2249_v32 = vld [vmem:[%s10989_s14 + $0x58] sm:$0xff] }
 0x458   : > { %5769 = vmatpush2.bf16.msra.mxu0 %v9039_v55  ;;  %v2253_v34 = vld [vmem:[%s10989_s14 + $0x78] sm:$0xff] }
 0x459   : > { %5770 = vmatprep.subr.bf16.mxu0 %v9032_v58  ;;  %v2413_v58 = vld [vmem:[%s10989_s14 + $0x578] sm:$0xff]  ;;  %v8690_v41 = vcombine.high %v2249_v32, %v2253_v34 }
 0x45a   : > { %5810 = vmatpush2.bf16.msra.mxu1 %v9167_v57  ;;  %v2409_v57 = vld [vmem:[%s10989_s14 + $0x558] sm:$0xff] }
 0x45b   : > { %5811 = vmatprep.subr.bf16.mxu1 %v9160_v59  ;;  %v8849_v17 = vcombine.low %v2409_v57, %v2413_v58  ;;  %v2241_v43 = vld [vmem:[%s10989_s14 + $0x18] sm:$0xff] }
 0x45c   : > { %5771 = vmatpush2.bf16.msra.mxu0 %v9031_v37  ;;  %v8722_v37 = vcombine.high %v2281_v53, %v2285_v54  ;;  %v2245_v44 = vld [vmem:[%s10989_s14 + $0x38] sm:$0xff] }
 0x45d   : > { %5772 = vmatprep.subr.bf16.mxu0 %v9024_v49  ;;  %v8850_v49 = vcombine.high %v2409_v57, %v2413_v58  ;;  %v2365_v57 = vld [vmem:[%s10989_s14 + $0x3f8] sm:$0xff] }
 0x45e   : > { %5812 = vmatpush2.bf16.msra.mxu1 %v9159_v0  ;;  %v2489_v58 = vld [vmem:[%s10989_s14 + $0x7d8] sm:$0xff] }
 0x45f   : > { %5813 = vmatprep.subr.bf16.mxu1 %v9152_v1  ;;  %v2273_v1 = vld [vmem:[%s10989_s14 + $0x118] sm:$0xff] }
 0x460   : > { %5773 = vmatpush2.bf16.msra.mxu0 %v9023_v8  ;;  %v2405_v8 = vld [vmem:[%s10989_s14 + $0x538] sm:$0xff]  ;;  %v8714_v11 = vcombine.high %v2273_v1, %v2277_v4 }
 0x461   : > { %5774 = vmatprep.subr.bf16.mxu0 %v9016_v51  ;;  %v8721_v51 = vcombine.low %v2281_v53, %v2285_v54  ;;  %v8842_v12 = vcombine.high %v2401_v7, %v2405_v8  ;;  %v8682_v53 = vcombine.high %v2241_v43, %v2245_v44 }
 0x462   : > { %5814 = vmatpush2.bf16.msra.mxu1 %v9151_v9 }
 0x463   : > { %5815 = vmatprep.subr.bf16.mxu1 %v9144_v10 }
 0x464   : > { %5775 = vmatpush2.bf16.msra.mxu0 %v9015_v14  ;;  %v2269_v14 = vld [vmem:[%s10989_s14 + $0xf8] sm:$0xff] }
 0x465   : > { %5776 = vmatprep.subr.bf16.mxu0 %v9008_v16  ;;  %v2397_v16 = vld [vmem:[%s10989_s14 + $0x4f8] sm:$0xff]  ;;  %v8706_v20 = vcombine.high %v2265_v13, %v2269_v14 }
 0x466   : > { %5816 = vmatpush2.bf16.msra.mxu1 %v9143_v15  ;;  %v2393_v15 = vld [vmem:[%s10989_s14 + $0x4d8] sm:$0xff] }
 0x467   : > { %5817 = vmatprep.subr.bf16.mxu1 %v9136_v19  ;;  %v8841_v19 = vcombine.low %v2401_v7, %v2405_v8  ;;  %v8834_v21 = vcombine.high %v2393_v15, %v2397_v16 }
 0x468   : > { %5777 = vmatpush2.bf16.msra.mxu0 %v9007_v26  ;;  %v2385_v26 = vld [vmem:[%s10989_s14 + $0x498] sm:$0xff] }
 0x469   : > { %5778 = vmatprep.subr.bf16.mxu0 %v9000_v29  ;;  %v8705_v29 = vcombine.low %v2265_v13, %v2269_v14 }
 0x46a   : > { %5818 = vmatpush2.bf16.msra.mxu1 %v9135_v28  ;;  %v2389_v28 = vld [vmem:[%s10989_s14 + $0x4b8] sm:$0xff] }
 0x46b   : > { %5819 = vmatprep.subr.bf16.mxu1 %v9128_v56  ;;  %v8833_v56 = vcombine.low %v2393_v15, %v2397_v16  ;;  %v8826_v31 = vcombine.high %v2385_v26, %v2389_v28  ;;  %v2337_v15 = vld [vmem:[%s10989_s14 + $0x318] sm:$0xff] }
 0x46c   : > { %5779 = vmatpush2.bf16.msra.mxu0 %v8999_v35  ;;  %v2377_v35 = vld [vmem:[%s10989_s14 + $0x458] sm:$0xff] }
 0x46d   : > { %5830 = vmatprep.subr.bf16.mxu0 %v8738_v63  ;;  %v8697_v63 = vcombine.low %v2257_v24, %v2261_v25  ;;  %v2341_v16 = vld [vmem:[%s10989_s14 + $0x338] sm:$0xff] }
 0x46e   : > { %5820 = vmatpush2.bf16.msra.mxu1 %v9127_v39  ;;  %v2381_v39 = vld [vmem:[%s10989_s14 + $0x478] sm:$0xff]  ;;  %v8778_v24 = vcombine.high %v2337_v15, %v2341_v16 }
 0x46f   : > { %5871 = vmatprep.subr.bf16.mxu1 %v8866_v40  ;;  %v5536_v55 = vpop.f32.mrf.mxu0  ;;  %5781 = vmatmul.mubr.bf16.vlgmr.msra.gmra.mxu0 %v11237_v2  ;;  %v8825_v40 = vcombine.low %v2385_v26, %v2389_v28  ;;  %v8818_v42 = vcombine.high %v2377_v35, %v2381_v39  ;;  %v2329_v26 = vld [vmem:[%s10989_s14 + $0x2d8] sm:$0xff] }
 0x470   : > { %5831 = vmatpush1.bf16.msra.mxu0 %v8737_v45  ;;  %5862 = vmatprep.mubr.bf16.mxu0 %v11091_v22  ;;  %v2369_v45 = vld [vmem:[%s10989_s14 + $0x418] sm:$0xff] }
 0x471   : > { %v5577_v59 = vpop.f32.mrf.mxu1  ;;  %5822 = vmatmul.mubr.bf16.vlgmr.msra.gmra.mxu1 %v11241_v3  ;;  %v5538_v62 = vpop.f32.mrf.mxu0  ;;  %5832 = vmatprep.subr.bf16.mxu0 %v8730_v48  ;;  %v8689_v48 = vcombine.low %v2249_v32, %v2253_v34  ;;  %v2333_v28 = vld [vmem:[%s10989_s14 + $0x2f8] sm:$0xff] }
 0x472   : > { %v11531_v33 = vadd.f32 %v5577_v59, %v5536_v55  ;;  %5872 = vmatpush1.bf16.msra.mxu1 %v8865_v46  ;;  %5903 = vmatprep.mubr.bf16.mxu1 %v11095_v23  ;;  %v8713_v23 = vcombine.low %v2273_v1, %v2277_v4  ;;  %v2373_v46 = vld [vmem:[%s10989_s14 + $0x438] sm:$0xff]  ;;  %v8770_v32 = vcombine.high %v2329_v26, %v2333_v28 }
 0x473   : > { %v5579_v0 = vpop.f32.mrf.mxu1  ;;  %5873 = vmatprep.subr.bf16.mxu1 %v8858_v50  ;;  %v5540_v6 = vpop.f32.mrf.mxu0  ;;  %v8817_v50 = vcombine.low %v2377_v35, %v2381_v39  ;;  %v8810_v54 = vcombine.high %v2369_v45, %v2373_v46  ;;  %v2361_v55 = vld [vmem:[%s10989_s14 + $0x3d8] sm:$0xff] }
 0x474   : > { %v11536_v5 = vadd.f32 %v5579_v0, %v5538_v62  ;;  %5833 = vmatpush1.bf16.msra.mxu0 %v8729_v18  ;;  %v2493_v59 = vld [vmem:[%s10989_s14 + $0x7f8] sm:$0xff]  ;;  %v8681_v18 = vcombine.low %v2241_v43, %v2245_v44  ;;  %v8809_v62 = vcombine.low %v2369_v45, %v2373_v46  ;;  %v8801_v6 = vcombine.low %v2361_v55, %v2365_v57 }
 0x475   : > { %v5581_v9 = vpop.f32.mrf.mxu1  ;;  %v5541_v10 = vpop.f32.mrf.mxu0  ;;  %5834 = vmatprep.subr.bf16.mxu0 %v8722_v37  ;;  %v8930_v37 = vcombine.high %v2489_v58, %v2493_v59  ;;  %v2353_v0 = vld [vmem:[%s10989_s14 + $0x398] sm:$0xff]  ;;  %v8929_v7 = vcombine.low %v2489_v58, %v2493_v59 }
 0x476   : > { %5874 = vmatpush1.bf16.msra.mxu1 %v8857_v60  ;;  %v8802_v60 = vcombine.high %v2361_v55, %v2365_v57  ;;  %v2481_v1 = vld [vmem:[%s10989_s14 + $0x798] sm:$0xff] }
 0x477   : > { %v5582_v22 = vpop.f32.mrf.mxu1  ;;  %5875 = vmatprep.subr.bf16.mxu1 %v8850_v49  ;;  %v2357_v49 = vld [vmem:[%s10989_s14 + $0x3b8] sm:$0xff] }
 0x478   : > { %5835 = vmatpush1.bf16.msra.mxu0 %v8721_v51  ;;  %v2485_v4 = vld [vmem:[%s10989_s14 + $0x7b8] sm:$0xff]  ;;  %v8794_v8 = vcombine.high %v2353_v0, %v2357_v49  ;;  %v8793_v22 = vcombine.low %v2353_v0, %v2357_v49 }
 0x479   : > { %5836 = vmatprep.subr.bf16.mxu0 %v8714_v11  ;;  %v8922_v9 = vcombine.high %v2481_v1, %v2485_v4  ;;  %v2345_v51 = vld [vmem:[%s10989_s14 + $0x358] sm:$0xff] }
 0x47a   : > { %5876 = vmatpush1.bf16.msra.mxu1 %v8849_v17  ;;  %v2349_v10 = vld [vmem:[%s10989_s14 + $0x378] sm:$0xff] }
 0x47b   : > { %5877 = vmatprep.subr.bf16.mxu1 %v8842_v12  ;;  %v2473_v17 = vld [vmem:[%s10989_s14 + $0x758] sm:$0xff]  ;;  %v8921_v12 = vcombine.low %v2481_v1, %v2485_v4  ;;  %v8786_v13 = vcombine.high %v2345_v51, %v2349_v10 }
 0x47c   : > { %5837 = vmatpush1.bf16.msra.mxu0 %v8713_v23  ;;  %v2477_v11 = vld [vmem:[%s10989_s14 + $0x778] sm:$0xff] }
 0x47d   : > { %5838 = vmatprep.subr.bf16.mxu0 %v8706_v20  ;;  %v8914_v14 = vcombine.high %v2473_v17, %v2477_v11  ;;  %v2465_v23 = vld [vmem:[%s10989_s14 + $0x718] sm:$0xff]  ;;  %v8785_v20 = vcombine.low %v2345_v51, %v2349_v10 }
 0x47e   : > { %5878 = vmatpush1.bf16.msra.mxu1 %v8841_v19  ;;  %v2469_v19 = vld [vmem:[%s10989_s14 + $0x738] sm:$0xff] }
 0x47f   : > { %5879 = vmatprep.subr.bf16.mxu1 %v8834_v21  ;;  %v8913_v21 = vcombine.low %v2473_v17, %v2477_v11  ;;  %v8906_v25 = vcombine.high %v2465_v23, %v2469_v19  ;;  %v2321_v35 = vld [vmem:[%s10989_s14 + $0x298] sm:$0xff] }
 0x480   : > { %5839 = vmatpush1.bf16.msra.mxu0 %v8705_v29  ;;  %v2457_v29 = vld [vmem:[%s10989_s14 + $0x6d8] sm:$0xff] }
 0x481   : > { %5840 = vmatprep.subr.bf16.mxu0 %v8698_v30  ;;  %v8777_v30 = vcombine.low %v2337_v15, %v2341_v16  ;;  %v2325_v39 = vld [vmem:[%s10989_s14 + $0x2b8] sm:$0xff] }
 0x482   : > { %5880 = vmatpush1.bf16.msra.mxu1 %v8833_v56  ;;  %v2461_v56 = vld [vmem:[%s10989_s14 + $0x6f8] sm:$0xff]  ;;  %v8762_v43 = vcombine.high %v2321_v35, %v2325_v39 }
 0x483   : > { %5881 = vmatprep.subr.bf16.mxu1 %v8826_v31  ;;  %v8905_v31 = vcombine.low %v2465_v23, %v2469_v19  ;;  %v8898_v34 = vcombine.high %v2457_v29, %v2461_v56  ;;  %v2313_v45 = vld [vmem:[%s10989_s14 + $0x258] sm:$0xff] }
 0x484   : > { %5841 = vmatpush1.bf16.msra.mxu0 %v8697_v63  ;;  %v2449_v63 = vld [vmem:[%s10989_s14 + $0x698] sm:$0xff] }
 0x485   : > { %5842 = vmatprep.subr.bf16.mxu0 %v8690_v41  ;;  %v8769_v41 = vcombine.low %v2329_v26, %v2333_v28  ;;  %v2317_v46 = vld [vmem:[%s10989_s14 + $0x278] sm:$0xff] }
 0x486   : > { %5882 = vmatpush1.bf16.msra.mxu1 %v8825_v40  ;;  %v2453_v40 = vld [vmem:[%s10989_s14 + $0x6b8] sm:$0xff]  ;;  %v8754_v55 = vcombine.high %v2313_v45, %v2317_v46 }
 0x487   : > { %5883 = vmatprep.subr.bf16.mxu1 %v8818_v42  ;;  %v8897_v42 = vcombine.low %v2457_v29, %v2461_v56  ;;  %v8890_v44 = vcombine.high %v2449_v63, %v2453_v40  ;;  %v2305_v58 = vld [vmem:[%s10989_s14 + $0x218] sm:$0xff] }
 0x488   : > { %5843 = vmatpush1.bf16.msra.mxu0 %v8689_v48  ;;  %v2441_v48 = vld [vmem:[%s10989_s14 + $0x658] sm:$0xff] }
 0x489   : > { %5844 = vmatprep.subr.bf16.mxu0 %v8682_v53  ;;  %v8761_v53 = vcombine.low %v2321_v35, %v2325_v39  ;;  %v2309_v59 = vld [vmem:[%s10989_s14 + $0x238] sm:$0xff] }
 0x48a   : > { %5884 = vmatpush1.bf16.msra.mxu1 %v8817_v50  ;;  %v2445_v50 = vld [vmem:[%s10989_s14 + $0x678] sm:$0xff]  ;;  %v8746_v0 = vcombine.high %v2305_v58, %v2309_v59 }
 0x48b   : > { %5885 = vmatprep.subr.bf16.mxu1 %v8810_v54  ;;  %v8889_v54 = vcombine.low %v2449_v63, %v2453_v40  ;;  %v8882_v57 = vcombine.high %v2441_v48, %v2445_v50  ;;  %v2553_v1 = vld [vmem:[%s10989_s14 + $0x9d8] sm:$0xff] }
 0x48c   : > { %5845 = vmatpush1.bf16.msra.mxu0 %v8681_v18  ;;  %v2433_v18 = vld [vmem:[%s10989_s14 + $0x618] sm:$0xff] }
 0x48d   : > { %5846 = vmatprep.subr.bf16.mxu0 %v8802_v60  ;;  %v8753_v60 = vcombine.low %v2313_v45, %v2317_v46  ;;  %v2557_v4 = vld [vmem:[%s10989_s14 + $0x9f8] sm:$0xff] }
 0x48e   : > { %5886 = vmatpush1.bf16.msra.mxu1 %v8809_v62  ;;  %v2437_v62 = vld [vmem:[%s10989_s14 + $0x638] sm:$0xff]  ;;  %v8994_v51 = vcombine.high %v2553_v1, %v2557_v4 }
 0x48f   : > { %5887 = vmatprep.subr.bf16.mxu1 %v8930_v37  ;;  %v8881_v37 = vcombine.low %v2441_v48, %v2445_v50  ;;  %v8874_v49 = vcombine.high %v2433_v18, %v2437_v62  ;;  %v2545_v17 = vld [vmem:[%s10989_s14 + $0x998] sm:$0xff] }
 0x490   : > { %5847 = vmatpush2.bf16.msra.mxu0 %v8801_v6  ;;  %v2681_v6 = vld [vmem:[%s10989_s14 + $0xdd8] sm:$0xff] }
 0x491   : > { %5848 = vmatprep.subr.bf16.mxu0 %v8794_v8  ;;  %v8745_v8 = vcombine.low %v2305_v58, %v2309_v59  ;;  %v2549_v11 = vld [vmem:[%s10989_s14 + $0x9b8] sm:$0xff] }
 0x492   : > { %5888 = vmatpush2.bf16.msra.mxu1 %v8929_v7  ;;  %v2685_v7 = vld [vmem:[%s10989_s14 + $0xdf8] sm:$0xff]  ;;  %v8986_v15 = vcombine.high %v2545_v17, %v2549_v11  ;;  %v8985_v28 = vcombine.low %v2545_v17, %v2549_v11 }
 0x493   : > { %5889 = vmatprep.subr.bf16.mxu1 %v8922_v9  ;;  %v8873_v9 = vcombine.low %v2433_v18, %v2437_v62  ;;  %v9122_v10 = vcombine.high %v2681_v6, %v2685_v7  ;;  %v2537_v23 = vld [vmem:[%s10989_s14 + $0x958] sm:$0xff] }
 0x494   : > { %5849 = vmatpush2.bf16.msra.mxu0 %v8793_v22  ;;  %v2673_v22 = vld [vmem:[%s10989_s14 + $0xd98] sm:$0xff] }
 0x495   : > { %5850 = vmatprep.subr.bf16.mxu0 %v8786_v13  ;;  %v8993_v13 = vcombine.low %v2553_v1, %v2557_v4  ;;  %v2541_v19 = vld [vmem:[%s10989_s14 + $0x978] sm:$0xff] }
 0x496   : > { %5890 = vmatpush2.bf16.msra.mxu1 %v8921_v12  ;;  %v2677_v12 = vld [vmem:[%s10989_s14 + $0xdb8] sm:$0xff]  ;;  %v8977_v40 = vcombine.low %v2537_v23, %v2541_v19 }
 0x497   : > { %5891 = vmatprep.subr.bf16.mxu1 %v8914_v14  ;;  %v9121_v14 = vcombine.low %v2681_v6, %v2685_v7  ;;  %v9114_v16 = vcombine.high %v2673_v22, %v2677_v12  ;;  %v9113_v56 = vcombine.low %v2673_v22, %v2677_v12  ;;  %v2657_v35 = vld [vmem:[%s10989_s14 + $0xd18] sm:$0xff] }
 0x498   : > { %5851 = vmatpush2.bf16.msra.mxu0 %v8785_v20  ;;  %v2661_v39 = vld [vmem:[%s10989_s14 + $0xd38] sm:$0xff] }
 0x499   : > { %5852 = vmatprep.subr.bf16.mxu0 %v8778_v24  ;;  %v2669_v24 = vld [vmem:[%s10989_s14 + $0xd78] sm:$0xff] }
 0x49a   : > { %5892 = vmatpush2.bf16.msra.mxu1 %v8913_v21  ;;  %v2665_v21 = vld [vmem:[%s10989_s14 + $0xd58] sm:$0xff] }
 0x49b   : > { %5893 = vmatprep.subr.bf16.mxu1 %v8906_v25  ;;  %v2521_v45 = vld [vmem:[%s10989_s14 + $0x8d8] sm:$0xff] }
 0x49c   : > { %5853 = vmatpush2.bf16.msra.mxu0 %v8777_v30  ;;  %v8978_v30 = vcombine.high %v2537_v23, %v2541_v19  ;;  %v2525_v46 = vld [vmem:[%s10989_s14 + $0x8f8] sm:$0xff] }
 0x49d   : > { %5854 = vmatprep.subr.bf16.mxu0 %v8770_v32  ;;  %v9106_v32 = vcombine.high %v2665_v21, %v2669_v24  ;;  %v2649_v48 = vld [vmem:[%s10989_s14 + $0xcd8] sm:$0xff]  ;;  %v8961_v62 = vcombine.low %v2521_v45, %v2525_v46 }
 0x49e   : > { %5894 = vmatpush2.bf16.msra.mxu1 %v8905_v31  ;;  %v2653_v50 = vld [vmem:[%s10989_s14 + $0xcf8] sm:$0xff] }
 0x49f   : > { %5895 = vmatprep.subr.bf16.mxu1 %v8898_v34  ;;  %v2533_v34 = vld [vmem:[%s10989_s14 + $0x938] sm:$0xff] }
 0x4a0   : > { %5855 = vmatpush2.bf16.msra.mxu0 %v8769_v41  ;;  %v2517_v58 = vld [vmem:[%s10989_s14 + $0x8b8] sm:$0xff] }
 0x4a1   : > { %5856 = vmatprep.subr.bf16.mxu0 %v8762_v43  ;;  %v2641_v59 = vld [vmem:[%s10989_s14 + $0xc98] sm:$0xff] }
 0x4a2   : > { %5896 = vmatpush2.bf16.msra.mxu1 %v8897_v42  ;;  %v9105_v42 = vcombine.low %v2665_v21, %v2669_v24  ;;  %v2645_v18 = vld [vmem:[%s10989_s14 + $0xcb8] sm:$0xff] }
 0x4a3   : > { %5897 = vmatprep.subr.bf16.mxu1 %v8890_v44  ;;  %v2509_v1 = vld [vmem:[%s10989_s14 + $0x878] sm:$0xff] }
 0x4a4   : > { %5857 = vmatpush2.bf16.msra.mxu0 %v8761_v53  ;;  %v9097_v53 = vcombine.low %v2657_v35, %v2661_v39  ;;  %v2633_v4 = vld [vmem:[%s10989_s14 + $0xc58] sm:$0xff] }
 0x4a5   : > { %5858 = vmatprep.subr.bf16.mxu0 %v8754_v55  ;;  %v9090_v55 = vcombine.high %v2649_v48, %v2653_v50  ;;  %v2637_v6 = vld [vmem:[%s10989_s14 + $0xc78] sm:$0xff] }
 0x4a6   : > { %5898 = vmatpush2.bf16.msra.mxu1 %v8889_v54  ;;  %v8962_v54 = vcombine.high %v2521_v45, %v2525_v46  ;;  %v2501_v17 = vld [vmem:[%s10989_s14 + $0x838] sm:$0xff] }
 0x4a7   : > { %5899 = vmatprep.subr.bf16.mxu1 %v8882_v57  ;;  %v2513_v57 = vld [vmem:[%s10989_s14 + $0x898] sm:$0xff] }
 0x4a8   : > { %5859 = vmatpush2.bf16.msra.mxu0 %v8753_v60  ;;  %v9089_v60 = vcombine.low %v2649_v48, %v2653_v50  ;;  %v8953_v7 = vcombine.low %v2513_v57, %v2517_v58  ;;  %v2625_v11 = vld [vmem:[%s10989_s14 + $0xc18] sm:$0xff] }
 0x4a9   : > { %5860 = vmatprep.subr.bf16.mxu0 %v8746_v0  ;;  %v9082_v0 = vcombine.high %v2641_v59, %v2645_v18  ;;  %v2629_v22 = vld [vmem:[%s10989_s14 + $0xc38] sm:$0xff] }
 0x4aa   : > { %5900 = vmatpush2.bf16.msra.mxu1 %v8881_v37  ;;  %v8954_v37 = vcombine.high %v2513_v57, %v2517_v58  ;;  %v2621_v23 = vld [vmem:[%s10989_s14 + $0xbf8] sm:$0xff]  ;;  %v9065_v24 = vcombine.low %v2625_v11, %v2629_v22 }
 0x4ab   : > { %5901 = vmatprep.subr.bf16.mxu1 %v8874_v49  ;;  %v2505_v49 = vld [vmem:[%s10989_s14 + $0x858] sm:$0xff] }
 0x4ac   : > { %5861 = vmatpush2.bf16.msra.mxu0 %v8745_v8  ;;  %v9081_v8 = vcombine.low %v2641_v59, %v2645_v18  ;;  %v8945_v12 = vcombine.low %v2505_v49, %v2509_v1  ;;  %v2745_v19 = vld [vmem:[%s10989_s14 + $0xfd8] sm:$0xff] }
 0x4ad   : > { %5912 = vmatprep.subr.bf16.mxu0 %v8994_v51  ;;  %v9074_v51 = vcombine.high %v2633_v4, %v2637_v6  ;;  %v2593_v45 = vld [vmem:[%s10989_s14 + $0xb18] sm:$0xff] }
 0x4ae   : > { %5902 = vmatpush2.bf16.msra.mxu1 %v8873_v9  ;;  %v8946_v9 = vcombine.high %v2505_v49, %v2509_v1  ;;  %v2597_v46 = vld [vmem:[%s10989_s14 + $0xb38] sm:$0xff] }
 0x4af   : > { %5953 = vmatprep.subr.bf16.mxu1 %v9122_v10  ;;  %v5618_v20 = vpop.f32.mrf.mxu0  ;;  %5863 = vmatmul.mubr.bf16.vlgmr.msra.gmra.mxu0 %v11141_v47  ;;  %v2497_v10 = vld [vmem:[%s10989_s14 + $0x818] sm:$0xff] }
 0x4b0   : > { %v5619_v25 = vadd.f32 %v5618_v20, %v11531_v33  ;;  %5913 = vmatpush1.bf16.msra.mxu0 %v8993_v13  ;;  %v2529_v33 = vld [vmem:[%s10989_s14 + $0x918] sm:$0xff]  ;;  %5944 = vmatprep.mubr.bf16.mxu0 %v11165_v36  ;;  %v9098_v36 = vcombine.high %v2657_v35, %v2661_v39  ;;  %v9073_v13 = vcombine.low %v2633_v4, %v2637_v6 }
 0x4b1   : > { %v5659_v26 = vpop.f32.mrf.mxu1  ;;  %5904 = vmatmul.mubr.bf16.vlgmr.msra.gmra.mxu1 %v11152_v52  ;;  %v11604_v29 = vpop.f32.mrf.mxu0  ;;  %5914 = vmatprep.subr.bf16.mxu0 %v8986_v15  ;;  %v8970_v43 = vcombine.high %v2529_v33, %v2533_v34  ;;  %v9066_v15 = vcombine.high %v2625_v11, %v2629_v22  ;;  %v2749_v20 = vld [vmem:[%s10989_s14 + $0xff8] sm:$0xff]  ;;  %v8937_v21 = vcombine.low %v2497_v10, %v2501_v17 }
 0x4b2   : > { %5954 = vmatpush1.bf16.msra.mxu1 %v9121_v14  ;;  %v11606_v47 = vadd.f32 %v5659_v26, %v5619_v25  ;;  %5985 = vmatprep.mubr.bf16.mxu1 %v11170_v61  ;;  %v8969_v61 = vcombine.low %v2529_v33, %v2533_v34  ;;  %v8938_v14 = vcombine.high %v2497_v10, %v2501_v17  ;;  %v2601_v39 = vld [vmem:[%s10989_s14 + $0xb58] sm:$0xff] }
 0x4b3   : > { %v11608_v31 = vpop.f32.mrf.mxu1  ;;  %5955 = vmatprep.subr.bf16.mxu1 %v9114_v16  ;;  %v5622_v52 = vpop.f32.mrf.mxu0  ;;  %v2617_v16 = vld [vmem:[%s10989_s14 + $0xbd8] sm:$0xff]  ;;  %v9186_v26 = vcombine.high %v2745_v19, %v2749_v20  ;;  %v9185_v34 = vcombine.low %v2745_v19, %v2749_v20 }
 0x4b4   : > { %5915 = vmatpush1.bf16.msra.mxu0 %v8985_v28  ;;  %v9058_v25 = vcombine.high %v2617_v16, %v2621_v23  ;;  %v2609_v28 = vld [vmem:[%s10989_s14 + $0xb98] sm:$0xff]  ;;  %v9057_v33 = vcombine.low %v2617_v16, %v2621_v23 }
 0x4b5   : > { %v5663_v63 = vpop.f32.mrf.mxu1  ;;  %v5623_v41 = vpop.f32.mrf.mxu0  ;;  %5916 = vmatprep.subr.bf16.mxu0 %v8978_v30  ;;  %v2737_v30 = vld [vmem:[%s10989_s14 + $0xf98] sm:$0xff] }
 0x4b6   : > { %5956 = vmatpush1.bf16.msra.mxu1 %v9113_v56  ;;  %v2613_v56 = vld [vmem:[%s10989_s14 + $0xbb8] sm:$0xff] }
 0x4b7   : > { %v5664_v44 = vpop.f32.mrf.mxu1  ;;  %5957 = vmatprep.subr.bf16.mxu1 %v9106_v32  ;;  %v2741_v32 = vld [vmem:[%s10989_s14 + $0xfb8] sm:$0xff]  ;;  %v9050_v52 = vcombine.high %v2609_v28, %v2613_v56 }
 0x4b8   : > { %5917 = vmatpush1.bf16.msra.mxu0 %v8977_v40  ;;  %v9178_v35 = vcombine.high %v2737_v30, %v2741_v32  ;;  %v2605_v63 = vld [vmem:[%s10989_s14 + $0xb78] sm:$0xff] }
 0x4b9   : > { %5918 = vmatprep.subr.bf16.mxu0 %v8970_v43  ;;  %v2729_v40 = vld [vmem:[%s10989_s14 + $0xf58] sm:$0xff]  ;;  %v9177_v43 = vcombine.low %v2737_v30, %v2741_v32  ;;  %v9042_v44 = vcombine.high %v2601_v39, %v2605_v63  ;;  %v9984_v32 = vld [vmem:[%s10999_s24 + $0xe4] ss:$16 sps:$4 sm:$0xff]  }
 0x4ba   : > { %5958 = vmatpush1.bf16.msra.mxu1 %v9105_v42  ;;  %v2733_v41 = vld [vmem:[%s10989_s14 + $0xf78] sm:$0xff]  ;;  %v9049_v42 = vcombine.low %v2609_v28, %v2613_v56  ;;  %v5621_v28 = vadd.f32 %v11604_v29, %v11536_v5  ;;  %v9990_v5 = vld [vmem:[%s10999_s24 + $0xc4] ss:$16 sps:$4 sm:$0xff]   ;;  %v11674_v29 = vpack.c.bf16 %v11467_v38, %v11467_v38 }
 0x4bb   : > { %5959 = vmatprep.subr.bf16.mxu1 %v9098_v36  ;;  %v9170_v36 = vcombine.high %v2729_v40, %v2733_v41  ;;  %v2721_v48 = vld [vmem:[%s10989_s14 + $0xf18] sm:$0xff] }
 0x4bc   : > { %5919 = vmatpush1.bf16.msra.mxu0 %v8969_v61  ;;  %v2725_v50 = vld [vmem:[%s10989_s14 + $0xf38] sm:$0xff]  ;;  %v9041_v61 = vcombine.low %v2601_v39, %v2605_v63  ;;  %v9993_v63 = vld [vmem:[%s10999_s24 + $0x2c4] ss:$16 sps:$4 sm:$0xff]  }
 0x4bd   : > { %5920 = vmatprep.subr.bf16.mxu0 %v8962_v54  ;;  %v9034_v54 = vcombine.high %v2593_v45, %v2597_v46  ;;  %v2585_v57 = vld [vmem:[%s10989_s14 + $0xad8] sm:$0xff] }
 0x4be   : > { %5960 = vmatpush1.bf16.msra.mxu1 %v9097_v53  ;;  %v9169_v53 = vcombine.low %v2729_v40, %v2733_v41  ;;  %v2589_v58 = vld [vmem:[%s10989_s14 + $0xaf8] sm:$0xff]  ;;  %v9988_v41 = vld [vmem:[%s10999_s24 + $0xc0] ss:$16 sps:$4 sm:$0xff]  }
 0x4bf   : > { %5961 = vmatprep.subr.bf16.mxu1 %v9090_v55  ;;  %v9162_v55 = vcombine.high %v2721_v48, %v2725_v50  ;;  %v2713_v59 = vld [vmem:[%s10989_s14 + $0xed8] sm:$0xff] }
 0x4c0   : > { %5921 = vmatpush1.bf16.msra.mxu0 %v8961_v62  ;;  %v2717_v18 = vld [vmem:[%s10989_s14 + $0xef8] sm:$0xff]  ;;  %v9033_v62 = vcombine.low %v2593_v45, %v2597_v46  ;;  %v9994_v46 = vld [vmem:[%s10999_s24 + $0xa0] ss:$16 sps:$4 sm:$0xff]  }
 0x4c1   : > { %5922 = vmatprep.subr.bf16.mxu0 %v8954_v37  ;;  %v9026_v37 = vcombine.high %v2585_v57, %v2589_v58  ;;  %v2577_v49 = vld [vmem:[%s10989_s14 + $0xa98] sm:$0xff] }
 0x4c2   : > { %5962 = vmatpush1.bf16.msra.mxu1 %v9089_v60  ;;  %v9161_v60 = vcombine.low %v2721_v48, %v2725_v50  ;;  %v2581_v1 = vld [vmem:[%s10989_s14 + $0xab8] sm:$0xff]  ;;  %v9997_v50 = vld [vmem:[%s10999_s24 + $0x2a0] ss:$16 sps:$4 sm:$0xff]  }
 0x4c3   : > { %5963 = vmatprep.subr.bf16.mxu1 %v9082_v0  ;;  %v9154_v0 = vcombine.high %v2713_v59, %v2717_v18  ;;  %v2705_v4 = vld [vmem:[%s10989_s14 + $0xe98] sm:$0xff] }
 0x4c4   : > { %5923 = vmatpush1.bf16.msra.mxu0 %v8953_v7  ;;  %v2709_v6 = vld [vmem:[%s10989_s14 + $0xeb8] sm:$0xff]  ;;  %v9025_v7 = vcombine.low %v2585_v57, %v2589_v58  ;;  %v10003_v57 = vld [vmem:[%s10999_s24 + $0x280] ss:$16 sps:$4 sm:$0xff]   ;;  %v10008_v58 = vld [vmem:[%s10999_s24 + $0x64] ss:$16 sps:$4 sm:$0xff]  }
 0x4c5   : > { %5924 = vmatprep.subr.bf16.mxu0 %v8946_v9  ;;  %v9018_v9 = vcombine.high %v2577_v49, %v2581_v1  ;;  %v2569_v10 = vld [vmem:[%s10989_s14 + $0xa58] sm:$0xff] }
 0x4c6   : > { %5964 = vmatpush1.bf16.msra.mxu1 %v9081_v8  ;;  %v9153_v8 = vcombine.low %v2713_v59, %v2717_v18  ;;  %v2573_v17 = vld [vmem:[%s10989_s14 + $0xa78] sm:$0xff]  ;;  %v10011_v59 = vld [vmem:[%s10999_s24 + $0x264] ss:$16 sps:$4 sm:$0xff]   ;;  %v10006_v18 = vld [vmem:[%s10999_s24 + $0x60] ss:$16 sps:$4 sm:$0xff]  }
 0x4c7   : > { %5965 = vmatprep.subr.bf16.mxu1 %v9074_v51  ;;  %v9146_v51 = vcombine.high %v2705_v4, %v2709_v6  ;;  %v2697_v11 = vld [vmem:[%s10989_s14 + $0xe58] sm:$0xff] }
 0x4c8   : > { %5925 = vmatpush1.bf16.msra.mxu0 %v8945_v12  ;;  %v2701_v22 = vld [vmem:[%s10989_s14 + $0xe78] sm:$0xff]  ;;  %v9017_v12 = vcombine.low %v2577_v49, %v2581_v1  ;;  %v10015_v49 = vld [vmem:[%s10999_s24 + $0x240] ss:$16 sps:$4 sm:$0xff]   ;;  %v10020_v1 = vld [vmem:[%s10999_s24 + $0x24] ss:$16 sps:$4 sm:$0xff]  }
 0x4c9   : > { %5926 = vmatprep.subr.bf16.mxu0 %v8938_v14  ;;  %v9010_v14 = vcombine.high %v2569_v10, %v2573_v17  ;;  %v2561_v16 = vld [vmem:[%s10989_s14 + $0xa18] sm:$0xff] }
 0x4ca   : > { %5966 = vmatpush1.bf16.msra.mxu1 %v9073_v13  ;;  %v9145_v13 = vcombine.low %v2705_v4, %v2709_v6  ;;  %v2565_v23 = vld [vmem:[%s10989_s14 + $0xa38] sm:$0xff]  ;;  %v10023_v4 = vld [vmem:[%s10999_s24 + $0x224] ss:$16 sps:$4 sm:$0xff]   ;;  %v10018_v6 = vld [vmem:[%s10999_s24 + $0x20] ss:$16 sps:$4 sm:$0xff]  }
 0x4cb   : > { %5967 = vmatprep.subr.bf16.mxu1 %v9066_v15  ;;  %v9138_v15 = vcombine.high %v2697_v11, %v2701_v22  ;;  %v2689_v19 = vld [vmem:[%s10989_s14 + $0xe18] sm:$0xff]  ;;  %v9001_v56 = vcombine.low %v2561_v16, %v2565_v23 }
 0x4cc   : > { %5927 = vmatpush1.bf16.msra.mxu0 %v8937_v21  ;;  %v2693_v20 = vld [vmem:[%s10989_s14 + $0xe38] sm:$0xff]  ;;  %v9009_v21 = vcombine.low %v2569_v10, %v2573_v17  ;;  %v10027_v10 = vld [vmem:[%s10999_s24 + $0x200] ss:$16 sps:$4 sm:$0xff]   ;;  %v10032_v17 = vld [vmem:[%s10999_s24 + $0x1e4] ss:$16 sps:$4 sm:$0xff]  }
 0x4cd   : > { %5928 = vmatprep.subr.bf16.mxu0 %v9058_v25  ;;  %v9002_v25 = vcombine.high %v2561_v16, %v2565_v23  ;;  %v9129_v30 = vcombine.low %v2689_v19, %v2693_v20  ;;  %v10039_v16 = vld [vmem:[%s10999_s24 + $0x3c0] ss:$16 sps:$4 sm:$0xff]   ;;  %v10044_v23 = vld [vmem:[%s10999_s24 + $0x1a4] ss:$16 sps:$4 sm:$0xff]  }
 0x4ce   : > { %5968 = vmatpush1.bf16.msra.mxu1 %v9065_v24  ;;  %v9137_v24 = vcombine.low %v2697_v11, %v2701_v22  ;;  %v10035_v11 = vld [vmem:[%s10999_s24 + $0x3e4] ss:$16 sps:$4 sm:$0xff]   ;;  %v10030_v22 = vld [vmem:[%s10999_s24 + $0x1e0] ss:$16 sps:$4 sm:$0xff]  }
 0x4cf   : > { %5969 = vmatprep.subr.bf16.mxu1 %v9186_v26  ;;  %v9130_v26 = vcombine.high %v2689_v19, %v2693_v20  ;;  %v10047_v19 = vld [vmem:[%s10999_s24 + $0x3a4] ss:$16 sps:$4 sm:$0xff]   ;;  %v10042_v20 = vld [vmem:[%s10999_s24 + $0x1a0] ss:$16 sps:$4 sm:$0xff]  }
 0x4d0   : > { %5929 = vmatpush2.bf16.msra.mxu0 %v9057_v33  ;;  %v9987_v33 = vld [vmem:[%s10999_s24 + $0x2e4] ss:$16 sps:$4 sm:$0xff]  }
 0x4d1   : > { %5930 = vmatprep.subr.bf16.mxu0 %v9050_v52  ;;  %v9982_v52 = vld [vmem:[%s10999_s24 + $0xe0] ss:$16 sps:$4 sm:$0xff]  }
 0x4d2   : > { %5970 = vmatpush2.bf16.msra.mxu1 %v9185_v34  ;;  %v5662_v34 = vadd.f32 %v11608_v31, %v5621_v28  ;;  %v10051_v28 = vld [vmem:[%s10999_s24 + $0x380] ss:$16 sps:$4 sm:$0xff]  }
 0x4d3   : > { %5971 = vmatprep.subr.bf16.mxu1 %v9178_v35  ;;  %v9985_v35 = vld [vmem:[%s10999_s24 + $0x2e0] ss:$16 sps:$4 sm:$0xff]  }
 0x4d4   : > { %5931 = vmatpush2.bf16.msra.mxu0 %v9049_v42  ;;  %v11678_v31 = vpack.c.bf16 %v5662_v34, %v5662_v34  ;;  %v10062_v34 = vld [vmem:[%s10999_s24 + $0x144] ss:$16 sps:$4 sm:$0xff]  }
 0x4d5   : > { %5932 = vmatprep.subr.bf16.mxu0 %v9042_v44 }
 0x4d6   : > { %5972 = vmatpush2.bf16.msra.mxu1 %v9177_v43  ;;  %v9996_v43 = vld [vmem:[%s10999_s24 + $0xa4] ss:$16 sps:$4 sm:$0xff]  }
 0x4d7   : > { %5973 = vmatprep.subr.bf16.mxu1 %v9170_v36 }
 0x4d8   : > { %5933 = vmatpush2.bf16.msra.mxu0 %v9041_v61  ;;  %v10002_v61 = vld [vmem:[%s10999_s24 + $0x84] ss:$16 sps:$4 sm:$0xff]  }
 0x4d9   : > { %5934 = vmatprep.subr.bf16.mxu0 %v9034_v54  ;;  %v10005_v54 = vld [vmem:[%s10999_s24 + $0x284] ss:$16 sps:$4 sm:$0xff]  }
 0x4da   : > { %5974 = vmatpush2.bf16.msra.mxu1 %v9169_v53 }
 0x4db   : > { %5975 = vmatprep.subr.bf16.mxu1 %v9162_v55  ;;  %v10000_v55 = vld [vmem:[%s10999_s24 + $0x80] ss:$16 sps:$4 sm:$0xff]  }
 0x4dc   : > { %5935 = vmatpush2.bf16.msra.mxu0 %v9033_v62  ;;  %v10009_v62 = vld [vmem:[%s10999_s24 + $0x260] ss:$16 sps:$4 sm:$0xff]  }
 0x4dd   : > { %5936 = vmatprep.subr.bf16.mxu0 %v9026_v37  ;;  %v10017_v37 = vld [vmem:[%s10999_s24 + $0x244] ss:$16 sps:$4 sm:$0xff]  }
 0x4de   : > { %5976 = vmatpush2.bf16.msra.mxu1 %v9161_v60  ;;  %v10014_v60 = vld [vmem:[%s10999_s24 + $0x44] ss:$16 sps:$4 sm:$0xff]  }
 0x4df   : > { %5977 = vmatprep.subr.bf16.mxu1 %v9154_v0  ;;  %v10012_v0 = vld [vmem:[%s10999_s24 + $0x40] ss:$16 sps:$4 sm:$0xff]  }
 0x4e0   : > { %5937 = vmatpush2.bf16.msra.mxu0 %v9025_v7  ;;  %v10021_v7 = vld [vmem:[%s10999_s24 + $0x220] ss:$16 sps:$4 sm:$0xff]  }
 0x4e1   : > { %5938 = vmatprep.subr.bf16.mxu0 %v9018_v9  ;;  %v10029_v9 = vld [vmem:[%s10999_s24 + $0x204] ss:$16 sps:$4 sm:$0xff]  }
 0x4e2   : > { %5978 = vmatpush2.bf16.msra.mxu1 %v9153_v8  ;;  %v10026_v8 = vld [vmem:[%s10999_s24 + $0x4] ss:$16 sps:$4 sm:$0xff]  }
 0x4e3   : > { %5979 = vmatprep.subr.bf16.mxu1 %v9146_v51  ;;  %v10024_v51 = vld [vmem:[%s10999_s24] ss:$16 sps:$4 sm:$0xff]  }
 0x4e4   : > { %5939 = vmatpush2.bf16.msra.mxu0 %v9017_v12  ;;  %v10033_v12 = vld [vmem:[%s10999_s24 + $0x3e0] ss:$16 sps:$4 sm:$0xff]  }
 0x4e5   : > { %5940 = vmatprep.subr.bf16.mxu0 %v9010_v14  ;;  %v10041_v14 = vld [vmem:[%s10999_s24 + $0x3c4] ss:$16 sps:$4 sm:$0xff]  }
 0x4e6   : > { %5980 = vmatpush2.bf16.msra.mxu1 %v9145_v13  ;;  %v10038_v13 = vld [vmem:[%s10999_s24 + $0x1c4] ss:$16 sps:$4 sm:$0xff]  }
 0x4e7   : > { %5981 = vmatprep.subr.bf16.mxu1 %v9138_v15  ;;  %v10036_v15 = vld [vmem:[%s10999_s24 + $0x1c0] ss:$16 sps:$4 sm:$0xff]  }
 0x4e8   : > { %5941 = vmatpush2.bf16.msra.mxu0 %v9009_v21  ;;  %v10045_v21 = vld [vmem:[%s10999_s24 + $0x3a0] ss:$16 sps:$4 sm:$0xff]  }
 0x4e9   : > { %5942 = vmatprep.subr.bf16.mxu0 %v9002_v25  ;;  %v10053_v25 = vld [vmem:[%s10999_s24 + $0x384] ss:$16 sps:$4 sm:$0xff]  }
 0x4ea   : > { %5982 = vmatpush2.bf16.msra.mxu1 %v9137_v24  ;;  %v10050_v24 = vld [vmem:[%s10999_s24 + $0x184] ss:$16 sps:$4 sm:$0xff]  }
 0x4eb   : > { %5983 = vmatprep.subr.bf16.mxu1 %v9130_v26  ;;  %v10048_v26 = vld [vmem:[%s10999_s24 + $0x180] ss:$16 sps:$4 sm:$0xff]  }
 0x4ec   : > { %5943 = vmatpush2.bf16.msra.mxu0 %v9001_v56  ;;  %v10056_v56 = vld [vmem:[%s10999_s24 + $0x164] ss:$16 sps:$4 sm:$0xff]  }
 0x4ed   : > { %7542 = vmatprep.subr.bf16.mxu0 %v9984_v32  ;;  %v10054_v32 = vld [vmem:[%s10999_s24 + $0x160] ss:$16 sps:$4 sm:$0xff]  }
 0x4ee   : > { %5984 = vmatpush2.bf16.msra.mxu1 %v9129_v30  ;;  %v10059_v30 = vld [vmem:[%s10999_s24 + $0x364] ss:$16 sps:$4 sm:$0xff]  }
 0x4ef   : > { %7583 = vmatprep.subr.bf16.mxu1 %v9987_v33  ;;  %v5700_v39 = vpop.f32.mrf.mxu0  ;;  %5945 = vmatmul.mubr.bf16.vlgmr.msra.gmra.mxu0 %v11237_v2  ;;  %v9991_v2 = vld [vmem:[%s10999_s24 + $0x2c0] ss:$16 sps:$4 sm:$0xff]  }
 0x4f0   : > { %7543 = vmatpush1.bf16.msra.mxu0 %v9982_v52  ;;  %7574 = vmatprep.mubr.bf16.mxu0 %v11674_v29  ;;  %v10057_v33 = vld [vmem:[%s10999_s24 + $0x360] ss:$16 sps:$4 sm:$0xff]   ;;  %v10065_v52 = vld [vmem:[%s10999_s24 + $0x344] ss:$16 sps:$4 sm:$0xff]  }
 0x4f1   : > { %v5741_v40 = vpop.f32.mrf.mxu1  ;;  %5986 = vmatmul.mubr.bf16.vlgmr.msra.gmra.mxu1 %v11241_v3  ;;  %v11685_v38 = vpop.f32.mrf.mxu0  ;;  %7544 = vmatprep.subr.bf16.mxu0 %v9990_v5  ;;  %v9999_v3 = vld [vmem:[%s10999_s24 + $0x2a4] ss:$16 sps:$4 sm:$0xff]   ;;  %v10063_v5 = vld [vmem:[%s10999_s24 + $0x340] ss:$16 sps:$4 sm:$0xff]  }
 0x4f2   : > { %v11682_v42 = vadd.f32 %v5741_v40, %v5700_v39  ;;  %7584 = vmatpush1.bf16.msra.mxu1 %v9985_v35  ;;  %7615 = vmatprep.mubr.bf16.mxu1 %v11678_v31  ;;  %v10060_v35 = vld [vmem:[%s10999_s24 + $0x140] ss:$16 sps:$4 sm:$0xff]   ;;  %v10068_v39 = vld [vmem:[%s10999_s24 + $0x124] ss:$16 sps:$4 sm:$0xff]  }
 0x4f3   : > { %v11690_v44 = vpop.f32.mrf.mxu1  ;;  %v5704_v36 = vpop.f32.mrf.mxu0  ;;  %7585 = vmatprep.subr.bf16.mxu1 %v9993_v63  ;;  %v10071_v63 = vld [vmem:[%s10999_s24 + $0x324] ss:$16 sps:$4 sm:$0xff]   ;;  %v10066_v40 = vld [vmem:[%s10999_s24 + $0x120] ss:$16 sps:$4 sm:$0xff]  }
 0x4f4   : > { %7545 = vmatpush1.bf16.msra.mxu0 %v9988_v41  ;;  %v10069_v41 = vld [vmem:[%s10999_s24 + $0x320] ss:$16 sps:$4 sm:$0xff]  }
 0x4f5   : > { %v5745_v45 = vpop.f32.mrf.mxu1  ;;  %v5705_v48 = vpop.f32.mrf.mxu0  ;;  %7546 = vmatprep.subr.bf16.mxu0 %v9996_v43  ;;  %v10077_v43 = vld [vmem:[%s10999_s24 + $0x304] ss:$16 sps:$4 sm:$0xff]   ;;  %v10075_v36 = vld [vmem:[%s10999_s24 + $0x300] ss:$16 sps:$4 sm:$0xff]  }
 0x4f6   : > { %7586 = vmatpush1.bf16.msra.mxu1 %v9991_v2  ;;  %v10074_v2 = vld [vmem:[%s10999_s24 + $0x104] ss:$16 sps:$4 sm:$0xff]   ;;  %v10078_v48 = vld [vmem:[%s10999_s24 + $0x4e0] ss:$16 sps:$4 sm:$0xff]  }
 0x4f7   : > { %v5746_v53 = vpop.f32.mrf.mxu1  ;;  %7587 = vmatprep.subr.bf16.mxu1 %v9999_v3  ;;  %v10072_v3 = vld [vmem:[%s10999_s24 + $0x100] ss:$16 sps:$4 sm:$0xff]   ;;  %v10080_v45 = vld [vmem:[%s10999_s24 + $0x4e4] ss:$16 sps:$4 sm:$0xff]  }
 0x4f8   : > { %7547 = vmatpush1.bf16.msra.mxu0 %v9994_v46  ;;  %v10137_v46 = vld [vmem:[%s10999_s24 + $0x6e4] ss:$16 sps:$4 sm:$0xff]   ;;  %v10135_v53 = vld [vmem:[%s10999_s24 + $0x6e0] ss:$16 sps:$4 sm:$0xff]  }
 0x4f9   : > { %7548 = vmatprep.subr.bf16.mxu0 %v10002_v61  ;;  %v10083_v61 = vld [vmem:[%s10999_s24 + $0x4c4] ss:$16 sps:$4 sm:$0xff]  }
 0x4fa   : > { %7588 = vmatpush1.bf16.msra.mxu1 %v9997_v50  ;;  %v11752_v50 = vpack.c.bf16 %v11458_v27, %v11458_v27  ;;  %v5744_v27 = vadd.f32 %v11690_v44, %v11685_v38 }
 0x4fb   : > { %7589 = vmatprep.subr.bf16.mxu1 %v10005_v54  ;;  %v11758_v54 = vpack.c.bf16 %v11606_v47, %v11606_v47  ;;  %v10086_v47 = vld [vmem:[%s10999_s24 + $0x4a4] ss:$16 sps:$4 sm:$0xff]  }
 0x4fc   : > { %7549 = vmatpush1.bf16.msra.mxu0 %v10000_v55  ;;  %v10143_v55 = vld [vmem:[%s10999_s24 + $0x6c4] ss:$16 sps:$4 sm:$0xff]  }
 0x4fd   : > { %7550 = vmatprep.subr.bf16.mxu0 %v10008_v58 }
 0x4fe   : > { %7590 = vmatpush1.bf16.msra.mxu1 %v10003_v57 }
 0x4ff   : > { %7591 = vmatprep.subr.bf16.mxu1 %v10011_v59  ;;  %v10081_v59 = vld [vmem:[%s10999_s24 + $0x4c0] ss:$16 sps:$4 sm:$0xff]  }
 0x500   : > { %7551 = vmatpush1.bf16.msra.mxu0 %v10006_v18 }
 0x501   : > { %7552 = vmatprep.subr.bf16.mxu0 %v10014_v60 }
 0x502   : > { %7592 = vmatpush1.bf16.msra.mxu1 %v10009_v62  ;;  %v10141_v62 = vld [vmem:[%s10999_s24 + $0x6c0] ss:$16 sps:$4 sm:$0xff]  }
 0x503   : > { %7593 = vmatprep.subr.bf16.mxu1 %v10017_v37 }
 0x504   : > { %7553 = vmatpush1.bf16.msra.mxu0 %v10012_v0  ;;  %v10149_v0 = vld [vmem:[%s10999_s24 + $0x6a4] ss:$16 sps:$4 sm:$0xff]  }
 0x505   : > { %7554 = vmatprep.subr.bf16.mxu0 %v10020_v1  ;;  %v10084_v1 = vld [vmem:[%s10999_s24 + $0x4a0] ss:$16 sps:$4 sm:$0xff]  }
 0x506   : > { %7594 = vmatpush1.bf16.msra.mxu1 %v10015_v49 }
 0x507   : > { %7595 = vmatprep.subr.bf16.mxu1 %v10023_v4 }
 0x508   : > { %7555 = vmatpush1.bf16.msra.mxu0 %v10018_v6  ;;  %v10089_v6 = vld [vmem:[%s10999_s24 + $0x484] ss:$16 sps:$4 sm:$0xff]  }
 0x509   : > { %7556 = vmatprep.subr.bf16.mxu0 %v10026_v8 }
 0x50a   : > { %7596 = vmatpush1.bf16.msra.mxu1 %v10021_v7  ;;  %v10147_v7 = vld [vmem:[%s10999_s24 + $0x6a0] ss:$16 sps:$4 sm:$0xff]  }
 0x50b   : > { %7597 = vmatprep.subr.bf16.mxu1 %v10029_v9 }
 0x50c   : > { %7557 = vmatpush1.bf16.msra.mxu0 %v10024_v51  ;;  %v10155_v51 = vld [vmem:[%s10999_s24 + $0x684] ss:$16 sps:$4 sm:$0xff]  }
 0x50d   : > { %7558 = vmatprep.subr.bf16.mxu0 %v10032_v17  ;;  %v10092_v17 = vld [vmem:[%s10999_s24 + $0x464] ss:$16 sps:$4 sm:$0xff]  }
 0x50e   : > { %7598 = vmatpush1.bf16.msra.mxu1 %v10027_v10  ;;  %v10087_v10 = vld [vmem:[%s10999_s24 + $0x480] ss:$16 sps:$4 sm:$0xff]  }
 0x50f   : > { %7599 = vmatprep.subr.bf16.mxu1 %v10035_v11  ;;  %v10153_v11 = vld [vmem:[%s10999_s24 + $0x680] ss:$16 sps:$4 sm:$0xff]  }
 0x510   : > { %7559 = vmatpush2.bf16.msra.mxu0 %v10030_v22  ;;  %v10161_v22 = vld [vmem:[%s10999_s24 + $0x664] ss:$16 sps:$4 sm:$0xff]  }
 0x511   : > { %7560 = vmatprep.subr.bf16.mxu0 %v10038_v13  ;;  %v10095_v13 = vld [vmem:[%s10999_s24 + $0x444] ss:$16 sps:$4 sm:$0xff]  }
 0x512   : > { %7600 = vmatpush2.bf16.msra.mxu1 %v10033_v12  ;;  %v10090_v12 = vld [vmem:[%s10999_s24 + $0x460] ss:$16 sps:$4 sm:$0xff]  }
 0x513   : > { %7601 = vmatprep.subr.bf16.mxu1 %v10041_v14  ;;  %v10159_v14 = vld [vmem:[%s10999_s24 + $0x660] ss:$16 sps:$4 sm:$0xff]  }
 0x514   : > { %7561 = vmatpush2.bf16.msra.mxu0 %v10036_v15  ;;  %v10167_v15 = vld [vmem:[%s10999_s24 + $0x644] ss:$16 sps:$4 sm:$0xff]  }
 0x515   : > { %7562 = vmatprep.subr.bf16.mxu0 %v10044_v23  ;;  %v10098_v23 = vld [vmem:[%s10999_s24 + $0x424] ss:$16 sps:$4 sm:$0xff]  }
 0x516   : > { %7602 = vmatpush2.bf16.msra.mxu1 %v10039_v16  ;;  %v10093_v16 = vld [vmem:[%s10999_s24 + $0x440] ss:$16 sps:$4 sm:$0xff]  }
 0x517   : > { %7603 = vmatprep.subr.bf16.mxu1 %v10047_v19  ;;  %v10165_v19 = vld [vmem:[%s10999_s24 + $0x640] ss:$16 sps:$4 sm:$0xff]  }
 0x518   : > { %7563 = vmatpush2.bf16.msra.mxu0 %v10042_v20  ;;  %v10173_v20 = vld [vmem:[%s10999_s24 + $0x624] ss:$16 sps:$4 sm:$0xff]  }
 0x519   : > { %7564 = vmatprep.subr.bf16.mxu0 %v10050_v24  ;;  %v10101_v24 = vld [vmem:[%s10999_s24 + $0x404] ss:$16 sps:$4 sm:$0xff]  }
 0x51a   : > { %7604 = vmatpush2.bf16.msra.mxu1 %v10045_v21  ;;  %v10096_v21 = vld [vmem:[%s10999_s24 + $0x420] ss:$16 sps:$4 sm:$0xff]  }
 0x51b   : > { %7605 = vmatprep.subr.bf16.mxu1 %v10053_v25  ;;  %v10171_v25 = vld [vmem:[%s10999_s24 + $0x620] ss:$16 sps:$4 sm:$0xff]  }
 0x51c   : > { %7565 = vmatpush2.bf16.msra.mxu0 %v10048_v26  ;;  %v10179_v26 = vld [vmem:[%s10999_s24 + $0x604] ss:$16 sps:$4 sm:$0xff]  }
 0x51d   : > { %7566 = vmatprep.subr.bf16.mxu0 %v10056_v56  ;;  %v10104_v56 = vld [vmem:[%s10999_s24 + $0x5e4] ss:$16 sps:$4 sm:$0xff]  }
 0x51e   : > { %7606 = vmatpush2.bf16.msra.mxu1 %v10051_v28  ;;  %v10099_v28 = vld [vmem:[%s10999_s24 + $0x400] ss:$16 sps:$4 sm:$0xff]  }
 0x51f   : > { %7607 = vmatprep.subr.bf16.mxu1 %v10059_v30  ;;  %v10177_v30 = vld [vmem:[%s10999_s24 + $0x600] ss:$16 sps:$4 sm:$0xff]  }
 0x520   : > { %7567 = vmatpush2.bf16.msra.mxu0 %v10054_v32  ;;  %v10185_v32 = vld [vmem:[%s10999_s24 + $0x7e4] ss:$16 sps:$4 sm:$0xff]  }
 0x521   : > { %7568 = vmatprep.subr.bf16.mxu0 %v10062_v34  ;;  %v10107_v34 = vld [vmem:[%s10999_s24 + $0x5c4] ss:$16 sps:$4 sm:$0xff]  }
 0x522   : > { %7608 = vmatpush2.bf16.msra.mxu1 %v10057_v33  ;;  %v10102_v33 = vld [vmem:[%s10999_s24 + $0x5e0] ss:$16 sps:$4 sm:$0xff]  }
 0x523   : > { %7609 = vmatprep.subr.bf16.mxu1 %v10065_v52  ;;  %v10183_v52 = vld [vmem:[%s10999_s24 + $0x7e0] ss:$16 sps:$4 sm:$0xff]  }
 0x524   : > { %7569 = vmatpush2.bf16.msra.mxu0 %v10060_v35  ;;  %v10191_v35 = vld [vmem:[%s10999_s24 + $0x7c4] ss:$16 sps:$4 sm:$0xff]  }
 0x525   : > { %7570 = vmatprep.subr.bf16.mxu0 %v10068_v39  ;;  %v10110_v39 = vld [vmem:[%s10999_s24 + $0x5a4] ss:$16 sps:$4 sm:$0xff]  }
 0x526   : > { %7610 = vmatpush2.bf16.msra.mxu1 %v10063_v5  ;;  %v10105_v5 = vld [vmem:[%s10999_s24 + $0x5c0] ss:$16 sps:$4 sm:$0xff]  }
 0x527   : > { %7611 = vmatprep.subr.bf16.mxu1 %v10071_v63  ;;  %v10189_v63 = vld [vmem:[%s10999_s24 + $0x7c0] ss:$16 sps:$4 sm:$0xff]  }
 0x528   : > { %7571 = vmatpush2.bf16.msra.mxu0 %v10066_v40  ;;  %v10197_v40 = vld [vmem:[%s10999_s24 + $0x7a4] ss:$16 sps:$4 sm:$0xff]  }
 0x529   : > { %7572 = vmatprep.subr.bf16.mxu0 %v10074_v2  ;;  %v10113_v2 = vld [vmem:[%s10999_s24 + $0x584] ss:$16 sps:$4 sm:$0xff]  }
 0x52a   : > { %7612 = vmatpush2.bf16.msra.mxu1 %v10069_v41  ;;  %v10108_v41 = vld [vmem:[%s10999_s24 + $0x5a0] ss:$16 sps:$4 sm:$0xff]  }
 0x52b   : > { %7613 = vmatprep.subr.bf16.mxu1 %v10077_v43  ;;  %v10195_v43 = vld [vmem:[%s10999_s24 + $0x7a0] ss:$16 sps:$4 sm:$0xff]  }
 0x52c   : > { %7573 = vmatpush2.bf16.msra.mxu0 %v10072_v3  ;;  %v10203_v3 = vld [vmem:[%s10999_s24 + $0x784] ss:$16 sps:$4 sm:$0xff]  }
 0x52d   : > { %7624 = vmatprep.subr.bf16.mxu0 %v10080_v45  ;;  %v10116_v45 = vld [vmem:[%s10999_s24 + $0x564] ss:$16 sps:$4 sm:$0xff]  }
 0x52e   : > { %7614 = vmatpush2.bf16.msra.mxu1 %v10075_v36  ;;  %v10111_v36 = vld [vmem:[%s10999_s24 + $0x580] ss:$16 sps:$4 sm:$0xff]  }
 0x52f   : > { %7665 = vmatprep.subr.bf16.mxu1 %v10137_v46  ;;  %v11761_v57 = vpop.f32.mrf.mxu0  ;;  %7575 = vmatmul.mubr.bf16.vlgmr.msra.gmra.mxu0 %v11752_v50  ;;  %v10201_v46 = vld [vmem:[%s10999_s24 + $0x780] ss:$16 sps:$4 sm:$0xff]  }
 0x530   : > { %7625 = vmatpush1.bf16.msra.mxu0 %v10078_v48  ;;  %v10209_v48 = vld [vmem:[%s10999_s24 + $0x764] ss:$16 sps:$4 sm:$0xff]  }
 0x531   : > { %v11766_v58 = vpop.f32.mrf.mxu1  ;;  %7616 = vmatmul.mubr.bf16.vlgmr.msra.gmra.mxu1 %v11758_v54  ;;  %v5784_v18 = vpop.f32.mrf.mxu0  ;;  %7626 = vmatprep.subr.bf16.mxu0 %v10083_v61  ;;  %v10114_v61 = vld [vmem:[%s10999_s24 + $0x560] ss:$16 sps:$4 sm:$0xff]  }
 0x532   : > { %7666 = vmatpush1.bf16.msra.mxu1 %v10135_v53  ;;  %v5785_v60 = vadd.f32 %v5784_v18, %v5744_v27  ;;  %v10119_v53 = vld [vmem:[%s10999_s24 + $0x544] ss:$16 sps:$4 sm:$0xff]  }
 0x533   : > { %v5825_v37 = vpop.f32.mrf.mxu1  ;;  %7667 = vmatprep.subr.bf16.mxu1 %v10143_v55  ;;  %v5786_v38 = vpop.f32.mrf.mxu0  ;;  %v10207_v55 = vld [vmem:[%s10999_s24 + $0x760] ss:$16 sps:$4 sm:$0xff]   ;;  %v10215_v27 = vld [vmem:[%s10999_s24 + $0x744] ss:$16 sps:$4 sm:$0xff]  }
 0x534   : > { %v5826_v44 = vadd.f32 %v5825_v37, %v5785_v60  ;;  %7627 = vmatpush1.bf16.msra.mxu0 %v10081_v59  ;;  %v10117_v59 = vld [vmem:[%s10999_s24 + $0x540] ss:$16 sps:$4 sm:$0xff]   ;;  %v10122_v18 = vld [vmem:[%s10999_s24 + $0x524] ss:$16 sps:$4 sm:$0xff]   ;;  %v5783_v37 = vadd.f32 %v11761_v57, %v11682_v42  ;;  %v10126_v42 = vld [vmem:[%s10999_s24 + $0xe8] ss:$16 sps:$4 sm:$0xff]  }
 0x535   : > { %v5827_v49 = vpop.f32.mrf.mxu1  ;;  %v5787_v4 = vpop.f32.mrf.mxu0  ;;  %7628 = vmatprep.subr.bf16.mxu0 %v10086_v47  ;;  %v10213_v47 = vld [vmem:[%s10999_s24 + $0x740] ss:$16 sps:$4 sm:$0xff]  }
 0x536   : > { %7668 = vmatpush1.bf16.msra.mxu1 %v10141_v62  ;;  %v11776_v8 = vpack.c.bf16 %v5826_v44, %v5826_v44  ;;  %v10221_v62 = vld [vmem:[%s10999_s24 + $0x724] ss:$16 sps:$4 sm:$0xff]   ;;  %v10120_v60 = vld [vmem:[%s10999_s24 + $0x520] ss:$16 sps:$4 sm:$0xff]   ;;  %v10128_v4 = vld [vmem:[%s10999_s24 + $0xec] ss:$16 sps:$4 sm:$0xff]  }
 0x537   : > { %v5828_v9 = vpop.f32.mrf.mxu1  ;;  %7669 = vmatprep.subr.bf16.mxu1 %v10149_v0  ;;  %v10125_v0 = vld [vmem:[%s10999_s24 + $0x504] ss:$16 sps:$4 sm:$0xff]   ;;  %v10219_v38 = vld [vmem:[%s10999_s24 + $0x720] ss:$16 sps:$4 sm:$0xff]  }
 0x538   : > { %7629 = vmatpush1.bf16.msra.mxu0 %v10084_v1  ;;  %7656 = vmatprep.mubr.bf16.mxu0 %v11776_v8  ;;  %v10227_v44 = vld [vmem:[%s10999_s24 + $0x704] ss:$16 sps:$4 sm:$0xff]   ;;  %v10123_v49 = vld [vmem:[%s10999_s24 + $0x500] ss:$16 sps:$4 sm:$0xff]   ;;  %v5824_v1 = vadd.f32 %v11766_v58, %v5783_v37  ;;  %v10131_v9 = vld [vmem:[%s10999_s24 + $0xcc] ss:$16 sps:$4 sm:$0xff]  }
 0x539   : > { %7630 = vmatprep.subr.bf16.mxu0 %v10089_v6  ;;  %v10225_v6 = vld [vmem:[%s10999_s24 + $0x700] ss:$16 sps:$4 sm:$0xff]  }
 0x53a   : > { %7670 = vmatpush1.bf16.msra.mxu1 %v10147_v7  ;;  %v10233_v7 = vld [vmem:[%s10999_s24 + $0x2ec] ss:$16 sps:$4 sm:$0xff]   ;;  %v11836_v57 = vpack.c.bf16 %v5824_v1, %v5824_v1  ;;  %v10228_v1 = vld [vmem:[%s10999_s24 + $0x4a8] ss:$16 sps:$4 sm:$0xff]  }
 0x53b   : > { %7671 = vmatprep.subr.bf16.mxu1 %v10155_v51 }
 0x53c   : > { %7631 = vmatpush1.bf16.msra.mxu0 %v10087_v10  ;;  %v10129_v10 = vld [vmem:[%s10999_s24 + $0xc8] ss:$16 sps:$4 sm:$0xff]  }
 0x53d   : > { %7632 = vmatprep.subr.bf16.mxu0 %v10092_v17 }
 0x53e   : > { %7672 = vmatpush1.bf16.msra.mxu1 %v10153_v11 }
 0x53f   : > { %7673 = vmatprep.subr.bf16.mxu1 %v10161_v22  ;;  %v10134_v22 = vld [vmem:[%s10999_s24 + $0xac] ss:$16 sps:$4 sm:$0xff]  }
 0x540   : > { %7633 = vmatpush1.bf16.msra.mxu0 %v10090_v12 }
 0x541   : > { %7634 = vmatprep.subr.bf16.mxu0 %v10095_v13 }
 0x542   : > { %7674 = vmatpush1.bf16.msra.mxu1 %v10159_v14 }
 0x543   : > { %7675 = vmatprep.subr.bf16.mxu1 %v10167_v15  ;;  %v10132_v15 = vld [vmem:[%s10999_s24 + $0xa8] ss:$16 sps:$4 sm:$0xff]  }
 0x544   : > { %7635 = vmatpush1.bf16.msra.mxu0 %v10093_v16  ;;  %v10140_v16 = vld [vmem:[%s10999_s24 + $0x8c] ss:$16 sps:$4 sm:$0xff]  }
 0x545   : > { %7636 = vmatprep.subr.bf16.mxu0 %v10098_v23 }
 0x546   : > { %7676 = vmatpush1.bf16.msra.mxu1 %v10165_v19  ;;  %v10138_v19 = vld [vmem:[%s10999_s24 + $0x88] ss:$16 sps:$4 sm:$0xff]  }
 0x547   : > { %7677 = vmatprep.subr.bf16.mxu1 %v10173_v20  ;;  %v10146_v20 = vld [vmem:[%s10999_s24 + $0x6c] ss:$16 sps:$4 sm:$0xff]  }
 0x548   : > { %7637 = vmatpush1.bf16.msra.mxu0 %v10096_v21  ;;  %v10144_v21 = vld [vmem:[%s10999_s24 + $0x68] ss:$16 sps:$4 sm:$0xff]  }
 0x549   : > { %7638 = vmatprep.subr.bf16.mxu0 %v10101_v24  ;;  %v10152_v24 = vld [vmem:[%s10999_s24 + $0x4c] ss:$16 sps:$4 sm:$0xff]  }
 0x54a   : > { %7678 = vmatpush1.bf16.msra.mxu1 %v10171_v25  ;;  %v10150_v25 = vld [vmem:[%s10999_s24 + $0x48] ss:$16 sps:$4 sm:$0xff]  }
 0x54b   : > { %7679 = vmatprep.subr.bf16.mxu1 %v10179_v26  ;;  %v10158_v26 = vld [vmem:[%s10999_s24 + $0x2c] ss:$16 sps:$4 sm:$0xff]  }
 0x54c   : > { %7639 = vmatpush1.bf16.msra.mxu0 %v10099_v28  ;;  %v10156_v28 = vld [vmem:[%s10999_s24 + $0x28] ss:$16 sps:$4 sm:$0xff]  }
 0x54d   : > { %7640 = vmatprep.subr.bf16.mxu0 %v10104_v56  ;;  %v10164_v56 = vld [vmem:[%s10999_s24 + $0xc] ss:$16 sps:$4 sm:$0xff]  }
 0x54e   : > { %7680 = vmatpush1.bf16.msra.mxu1 %v10177_v30  ;;  %v10162_v30 = vld [vmem:[%s10999_s24 + $0x8] ss:$16 sps:$4 sm:$0xff]  }
 0x54f   : > { %7681 = vmatprep.subr.bf16.mxu1 %v10185_v32  ;;  %v10170_v32 = vld [vmem:[%s10999_s24 + $0x1ec] ss:$16 sps:$4 sm:$0xff]  }
 0x550   : > { %7641 = vmatpush2.bf16.msra.mxu0 %v10102_v33  ;;  %v10168_v33 = vld [vmem:[%s10999_s24 + $0x1e8] ss:$16 sps:$4 sm:$0xff]  }
 0x551   : > { %7642 = vmatprep.subr.bf16.mxu0 %v10107_v34  ;;  %v10176_v34 = vld [vmem:[%s10999_s24 + $0x1cc] ss:$16 sps:$4 sm:$0xff]  }
 0x552   : > { %7682 = vmatpush2.bf16.msra.mxu1 %v10183_v52  ;;  %v10174_v52 = vld [vmem:[%s10999_s24 + $0x1c8] ss:$16 sps:$4 sm:$0xff]  }
 0x553   : > { %7683 = vmatprep.subr.bf16.mxu1 %v10191_v35  ;;  %v10182_v35 = vld [vmem:[%s10999_s24 + $0x1ac] ss:$16 sps:$4 sm:$0xff]  }
 0x554   : > { %7643 = vmatpush2.bf16.msra.mxu0 %v10105_v5  ;;  %v10180_v5 = vld [vmem:[%s10999_s24 + $0x1a8] ss:$16 sps:$4 sm:$0xff]  }
 0x555   : > { %7644 = vmatprep.subr.bf16.mxu0 %v10110_v39  ;;  %v10188_v39 = vld [vmem:[%s10999_s24 + $0x18c] ss:$16 sps:$4 sm:$0xff]  }
 0x556   : > { %7684 = vmatpush2.bf16.msra.mxu1 %v10189_v63  ;;  %v10186_v63 = vld [vmem:[%s10999_s24 + $0x188] ss:$16 sps:$4 sm:$0xff]  }
 0x557   : > { %7685 = vmatprep.subr.bf16.mxu1 %v10197_v40  ;;  %v10194_v40 = vld [vmem:[%s10999_s24 + $0x16c] ss:$16 sps:$4 sm:$0xff]  }
 0x558   : > { %7645 = vmatpush2.bf16.msra.mxu0 %v10108_v41  ;;  %v10192_v41 = vld [vmem:[%s10999_s24 + $0x168] ss:$16 sps:$4 sm:$0xff]  }
 0x559   : > { %7646 = vmatprep.subr.bf16.mxu0 %v10113_v2  ;;  %v10200_v2 = vld [vmem:[%s10999_s24 + $0x14c] ss:$16 sps:$4 sm:$0xff]  }
 0x55a   : > { %7686 = vmatpush2.bf16.msra.mxu1 %v10195_v43  ;;  %v10198_v43 = vld [vmem:[%s10999_s24 + $0x148] ss:$16 sps:$4 sm:$0xff]  }
 0x55b   : > { %7687 = vmatprep.subr.bf16.mxu1 %v10203_v3  ;;  %v10206_v3 = vld [vmem:[%s10999_s24 + $0x12c] ss:$16 sps:$4 sm:$0xff]  }
 0x55c   : > { %7647 = vmatpush2.bf16.msra.mxu0 %v10111_v36  ;;  %v10204_v36 = vld [vmem:[%s10999_s24 + $0x128] ss:$16 sps:$4 sm:$0xff]  }
 0x55d   : > { %7648 = vmatprep.subr.bf16.mxu0 %v10116_v45  ;;  %v10212_v45 = vld [vmem:[%s10999_s24 + $0x10c] ss:$16 sps:$4 sm:$0xff]  }
 0x55e   : > { %7688 = vmatpush2.bf16.msra.mxu1 %v10201_v46  ;;  %v10210_v46 = vld [vmem:[%s10999_s24 + $0x108] ss:$16 sps:$4 sm:$0xff]  }
 0x55f   : > { %7689 = vmatprep.subr.bf16.mxu1 %v10209_v48  ;;  %v10218_v48 = vld [vmem:[%s10999_s24 + $0x4ec] ss:$16 sps:$4 sm:$0xff]  }
 0x560   : > { %7649 = vmatpush2.bf16.msra.mxu0 %v10114_v61  ;;  %v10216_v61 = vld [vmem:[%s10999_s24 + $0x4e8] ss:$16 sps:$4 sm:$0xff]  }
 0x561   : > { %7650 = vmatprep.subr.bf16.mxu0 %v10119_v53  ;;  %v10224_v53 = vld [vmem:[%s10999_s24 + $0x4cc] ss:$16 sps:$4 sm:$0xff]  }
 0x562   : > { %7690 = vmatpush2.bf16.msra.mxu1 %v10207_v55 }
 0x563   : > { %7691 = vmatprep.subr.bf16.mxu1 %v10215_v27 }
 0x564   : > { %7651 = vmatpush2.bf16.msra.mxu0 %v10117_v59 }
 0x565   : > { %7652 = vmatprep.subr.bf16.mxu0 %v10122_v18 }
 0x566   : > { %7692 = vmatpush2.bf16.msra.mxu1 %v10213_v47  ;;  %v10222_v47 = vld [vmem:[%s10999_s24 + $0x4c8] ss:$16 sps:$4 sm:$0xff]  }
 0x567   : > { %7693 = vmatprep.subr.bf16.mxu1 %v10221_v62 }
 0x568   : > { %7653 = vmatpush2.bf16.msra.mxu0 %v10120_v60  ;;  %v10230_v60 = vld [vmem:[%s10999_s24 + $0x4ac] ss:$16 sps:$4 sm:$0xff]  }
 0x569   : > { %7654 = vmatprep.subr.bf16.mxu0 %v10125_v0 }
 0x56a   : > { %7694 = vmatpush2.bf16.msra.mxu1 %v10219_v38 }
 0x56b   : > { %7695 = vmatprep.subr.bf16.mxu1 %v10227_v44 }
 0x56c   : > { %7655 = vmatpush2.bf16.msra.mxu0 %v10123_v49 }
 0x56d   : > { %7706 = vmatprep.subr.bf16.mxu0 %v10128_v4 }
 0x56e   : > { %7696 = vmatpush2.bf16.msra.mxu1 %v10225_v6 }
 0x56f   : > { %7747 = vmatprep.subr.bf16.mxu1 %v10233_v7  ;;  %v5864_v51 = vpop.f32.mrf.mxu0  ;;  %7657 = vmatmul.mubr.bf16.vlgmr.msra.gmra.mxu0 %v11836_v57 }
 0x570   : > { %7707 = vmatpush1.bf16.msra.mxu0 %v10126_v42  ;;  %7738 = vmatprep.mubr.bf16.mxu0 %v11674_v29  ;;  %v10231_v42 = vld [vmem:[%s10999_s24 + $0x2e8] ss:$16 sps:$4 sm:$0xff]  }
 0x571   : > { %v5905_v58 = vpop.f32.mrf.mxu1  ;;  %v11844_v11 = vpop.f32.mrf.mxu0  ;;  %7708 = vmatprep.subr.bf16.mxu0 %v10131_v9 }
 0x572   : > { %v11842_v17 = vadd.f32 %v5905_v58, %v5864_v51  ;;  %v10239_v51 = vld [vmem:[%s10999_s24 + $0x2cc] ss:$16 sps:$4 sm:$0xff]   ;;  %v10234_v58 = vld [vmem:[%s10999_s24 + $0x488] ss:$16 sps:$4 sm:$0xff]  }
 0x573   : > { %v11847_v12 = vpop.f32.mrf.mxu1  ;;  %v5868_v13 = vpop.f32.mrf.mxu0 }
 0x574   : > { %7709 = vmatpush1.bf16.msra.mxu0 %v10129_v10  ;;  %v5908_v27 = vadd.f32 %v11847_v12, %v11844_v11  ;;  %v10242_v10 = vld [vmem:[%s10999_s24 + $0x46c] ss:$16 sps:$4 sm:$0xff]   ;;  %v10243_v13 = vld [vmem:[%s10999_s24 + $0x2a8] ss:$16 sps:$4 sm:$0xff]  }
 0x575   : > { %v5909_v14 = vpop.f32.mrf.mxu1  ;;  %v5869_v29 = vpop.f32.mrf.mxu0  ;;  %7710 = vmatprep.subr.bf16.mxu0 %v10134_v22  ;;  %v10245_v11 = vld [vmem:[%s10999_s24 + $0x2ac] ss:$16 sps:$4 sm:$0xff]   ;;  %v10240_v22 = vld [vmem:[%s10999_s24 + $0x468] ss:$16 sps:$4 sm:$0xff]  }
 0x576   : > { %v10248_v12 = vld [vmem:[%s10999_s24 + $0x44c] ss:$16 sps:$4 sm:$0xff]   ;;  %v10249_v29 = vld [vmem:[%s10999_s24 + $0x288] ss:$16 sps:$4 sm:$0xff]  }
 0x577   : > { %v5910_v23 = vpop.f32.mrf.mxu1  ;;  %v10251_v14 = vld [vmem:[%s10999_s24 + $0x28c] ss:$16 sps:$4 sm:$0xff]  }
 0x578   : > { %7711 = vmatpush1.bf16.msra.mxu0 %v10132_v15  ;;  %v10246_v15 = vld [vmem:[%s10999_s24 + $0x448] ss:$16 sps:$4 sm:$0xff]  }
 0x579   : > { %7712 = vmatprep.subr.bf16.mxu0 %v10140_v16  ;;  %v10257_v16 = vld [vmem:[%s10999_s24 + $0x26c] ss:$16 sps:$4 sm:$0xff]   ;;  %v10252_v23 = vld [vmem:[%s10999_s24 + $0x428] ss:$16 sps:$4 sm:$0xff]  }
 0x57c   : > { %7713 = vmatpush1.bf16.msra.mxu0 %v10138_v19  ;;  %v10260_v19 = vld [vmem:[%s10999_s24 + $0x40c] ss:$16 sps:$4 sm:$0xff]  }
 0x57d   : > { %7714 = vmatprep.subr.bf16.mxu0 %v10146_v20  ;;  %v10255_v20 = vld [vmem:[%s10999_s24 + $0x268] ss:$16 sps:$4 sm:$0xff]  }
 0x580   : > { %7715 = vmatpush1.bf16.msra.mxu0 %v10144_v21  ;;  %v10263_v21 = vld [vmem:[%s10999_s24 + $0x24c] ss:$16 sps:$4 sm:$0xff]  }
 0x581   : > { %7716 = vmatprep.subr.bf16.mxu0 %v10152_v24  ;;  %v10258_v24 = vld [vmem:[%s10999_s24 + $0x408] ss:$16 sps:$4 sm:$0xff]  }
 0x584   : > { %7717 = vmatpush1.bf16.msra.mxu0 %v10150_v25  ;;  %v10266_v25 = vld [vmem:[%s10999_s24 + $0x5ec] ss:$16 sps:$4 sm:$0xff]  }
 0x585   : > { %7718 = vmatprep.subr.bf16.mxu0 %v10158_v26  ;;  %v10261_v26 = vld [vmem:[%s10999_s24 + $0x248] ss:$16 sps:$4 sm:$0xff]  }
 0x588   : > { %7719 = vmatpush1.bf16.msra.mxu0 %v10156_v28  ;;  %v10269_v28 = vld [vmem:[%s10999_s24 + $0x22c] ss:$16 sps:$4 sm:$0xff]  }
 0x589   : > { %7720 = vmatprep.subr.bf16.mxu0 %v10164_v56  ;;  %v10264_v56 = vld [vmem:[%s10999_s24 + $0x5e8] ss:$16 sps:$4 sm:$0xff]  }
 0x58c   : > { %7721 = vmatpush1.bf16.msra.mxu0 %v10162_v30  ;;  %v10272_v30 = vld [vmem:[%s10999_s24 + $0x5cc] ss:$16 sps:$4 sm:$0xff]  }
 0x58d   : > { %7722 = vmatprep.subr.bf16.mxu0 %v10170_v32  ;;  %v10267_v32 = vld [vmem:[%s10999_s24 + $0x228] ss:$16 sps:$4 sm:$0xff]  }
 0x590   : > { %7723 = vmatpush2.bf16.msra.mxu0 %v10168_v33  ;;  %v10275_v33 = vld [vmem:[%s10999_s24 + $0x20c] ss:$16 sps:$4 sm:$0xff]  }
 0x591   : > { %7724 = vmatprep.subr.bf16.mxu0 %v10176_v34  ;;  %v10270_v34 = vld [vmem:[%s10999_s24 + $0x5c8] ss:$16 sps:$4 sm:$0xff]  }
 0x594   : > { %7725 = vmatpush2.bf16.msra.mxu0 %v10174_v52  ;;  %v10278_v52 = vld [vmem:[%s10999_s24 + $0x5ac] ss:$16 sps:$4 sm:$0xff]  }
 0x595   : > { %7726 = vmatprep.subr.bf16.mxu0 %v10182_v35  ;;  %v10273_v35 = vld [vmem:[%s10999_s24 + $0x208] ss:$16 sps:$4 sm:$0xff]  }
 0x598   : > { %7727 = vmatpush2.bf16.msra.mxu0 %v10180_v5  ;;  %v10281_v5 = vld [vmem:[%s10999_s24 + $0x3ec] ss:$16 sps:$4 sm:$0xff]  }
 0x599   : > { %7728 = vmatprep.subr.bf16.mxu0 %v10188_v39  ;;  %v10276_v39 = vld [vmem:[%s10999_s24 + $0x5a8] ss:$16 sps:$4 sm:$0xff]  }
 0x59c   : > { %7729 = vmatpush2.bf16.msra.mxu0 %v10186_v63  ;;  %v10284_v63 = vld [vmem:[%s10999_s24 + $0x58c] ss:$16 sps:$4 sm:$0xff]  }
 0x59d   : > { %7730 = vmatprep.subr.bf16.mxu0 %v10194_v40  ;;  %v10279_v40 = vld [vmem:[%s10999_s24 + $0x3e8] ss:$16 sps:$4 sm:$0xff]  }
 0x5a0   : > { %7731 = vmatpush2.bf16.msra.mxu0 %v10192_v41  ;;  %v10287_v41 = vld [vmem:[%s10999_s24 + $0x3cc] ss:$16 sps:$4 sm:$0xff]  }
 0x5a1   : > { %7732 = vmatprep.subr.bf16.mxu0 %v10200_v2  ;;  %v10282_v2 = vld [vmem:[%s10999_s24 + $0x588] ss:$16 sps:$4 sm:$0xff]  }
 0x5a4   : > { %7733 = vmatpush2.bf16.msra.mxu0 %v10198_v43  ;;  %v10290_v43 = vld [vmem:[%s10999_s24 + $0x56c] ss:$16 sps:$4 sm:$0xff]  }
 0x5a5   : > { %7734 = vmatprep.subr.bf16.mxu0 %v10206_v3  ;;  %v10285_v3 = vld [vmem:[%s10999_s24 + $0x3c8] ss:$16 sps:$4 sm:$0xff]  }
 0x5a8   : > { %7735 = vmatpush2.bf16.msra.mxu0 %v10204_v36  ;;  %v10293_v36 = vld [vmem:[%s10999_s24 + $0x3ac] ss:$16 sps:$4 sm:$0xff]  }
 0x5a9   : > { %7736 = vmatprep.subr.bf16.mxu0 %v10212_v45  ;;  %v10288_v45 = vld [vmem:[%s10999_s24 + $0x568] ss:$16 sps:$4 sm:$0xff]  }
 0x5ac   : > { %7737 = vmatpush2.bf16.msra.mxu0 %v10210_v46  ;;  %v10296_v46 = vld [vmem:[%s10999_s24 + $0x54c] ss:$16 sps:$4 sm:$0xff]  }
 0x5ad   : > { %7788 = vmatprep.subr.bf16.mxu0 %v10218_v48  ;;  %v10291_v48 = vld [vmem:[%s10999_s24 + $0x3a8] ss:$16 sps:$4 sm:$0xff]  }
 0x5af   : > { %v5946_v55 = vpop.f32.mrf.mxu0  ;;  %7739 = vmatmul.mubr.bf16.vlgmr.msra.gmra.mxu0 %v11752_v50 }
 0x5b0   : > { %v5947_v59 = vadd.f32 %v5946_v55, %v11842_v17  ;;  %7789 = vmatpush1.bf16.msra.mxu0 %v10216_v61  ;;  %7820 = vmatprep.mubr.bf16.mxu0 %v11776_v8  ;;  %v10236_v8 = vld [vmem:[%s10999_s24 + $0x48c] ss:$16 sps:$4 sm:$0xff]   ;;  %v10237_v17 = vld [vmem:[%s10999_s24 + $0x2c8] ss:$16 sps:$4 sm:$0xff]  }
 0x5b1   : > { %v5987_v18 = vpop.f32.mrf.mxu1  ;;  %v5948_v62 = vpop.f32.mrf.mxu0  ;;  %7790 = vmatprep.subr.bf16.mxu0 %v10224_v53  ;;  %v10299_v61 = vld [vmem:[%s10999_s24 + $0x38c] ss:$16 sps:$4 sm:$0xff]   ;;  %v10294_v53 = vld [vmem:[%s10999_s24 + $0x548] ss:$16 sps:$4 sm:$0xff]  }
 0x5b2   : > { %v5949_v37 = vadd.f32 %v5948_v62, %v5908_v27  ;;  %v5988_v50 = vadd.f32 %v5987_v18, %v5947_v59  ;;  %v10302_v55 = vld [vmem:[%s10999_s24 + $0x52c] ss:$16 sps:$4 sm:$0xff]   ;;  %v10297_v27 = vld [vmem:[%s10999_s24 + $0x388] ss:$16 sps:$4 sm:$0xff]  }
 0x5b3   : > { %v5989_v0 = vpop.f32.mrf.mxu1  ;;  %v5950_v38 = vpop.f32.mrf.mxu0  ;;  %v10305_v59 = vld [vmem:[%s10999_s24 + $0x36c] ss:$16 sps:$4 sm:$0xff]   ;;  %v10300_v18 = vld [vmem:[%s10999_s24 + $0x528] ss:$16 sps:$4 sm:$0xff]  }
 0x5b4   : > { %v5990_v44 = vadd.f32 %v5989_v0, %v5949_v37  ;;  %7791 = vmatpush1.bf16.msra.mxu0 %v10222_v47  ;;  %v11891_v9 = vpack.c.bf16 %v5988_v50, %v5988_v50  ;;  %v10308_v47 = vld [vmem:[%s10999_s24 + $0x50c] ss:$16 sps:$4 sm:$0xff]   ;;  %v10303_v62 = vld [vmem:[%s10999_s24 + $0x368] ss:$16 sps:$4 sm:$0xff]  }
 0x5b5   : > { %v5991_v49 = vpop.f32.mrf.mxu1  ;;  %v5951_v4 = vpop.f32.mrf.mxu0  ;;  %7792 = vmatprep.subr.bf16.mxu0 %v10230_v60  ;;  %v10311_v60 = vld [vmem:[%s10999_s24 + $0x34c] ss:$16 sps:$4 sm:$0xff]   ;;  %v10306_v37 = vld [vmem:[%s10999_s24 + $0x508] ss:$16 sps:$4 sm:$0xff]  }
 0x5b6   : > { %v11888_v6 = vpack.c.bf16 %v5990_v44, %v5990_v44  ;;  %v10309_v0 = vld [vmem:[%s10999_s24 + $0x348] ss:$16 sps:$4 sm:$0xff]   ;;  %v10314_v50 = vld [vmem:[%s10999_s24 + $0x32c] ss:$16 sps:$4 sm:$0xff]  }
 0x5b7   : > { %v5992_v7 = vpop.f32.mrf.mxu1  ;;  %v10312_v38 = vld [vmem:[%s10999_s24 + $0x328] ss:$16 sps:$4 sm:$0xff]   ;;  %v10317_v49 = vld [vmem:[%s10999_s24 + $0x30c] ss:$16 sps:$4 sm:$0xff]  }
 0x5b8   : > { %7697 = vmatprep.mubr.bf16.mxu1 %v11888_v6  ;;  %7793 = vmatpush1.bf16.msra.mxu0 %v10228_v1 }
 0x5b9   : > { %7698 = vmatmul.mubr.bf16.vlgmr.msra.gmra.mxu1 %v11891_v9  ;;  %7794 = vmatprep.subr.bf16.mxu0 %v10236_v8 }
 0x5ba   : > { %7748 = vmatpush1.bf16.msra.mxu1 %v10231_v42  ;;  %7779 = vmatprep.mubr.bf16.mxu1 %v11678_v31  ;;  %v10254_v31 = vld [vmem:[%s10999_s24 + $0x42c] ss:$16 sps:$4 sm:$0xff]   ;;  %v10315_v42 = vld [vmem:[%s10999_s24 + $0x308] ss:$16 sps:$4 sm:$0xff]  }
 0x5bb   : > { %7749 = vmatprep.subr.bf16.mxu1 %v10239_v51 }
 0x5bc   : > { %7795 = vmatpush1.bf16.msra.mxu0 %v10234_v58 }
 0x5bd   : > { %7796 = vmatprep.subr.bf16.mxu0 %v10242_v10  ;;  %v10320_v10 = vld [vmem:[%s10999_s24 + $0x6ec] ss:$16 sps:$4 sm:$0xff]  }
 0x5be   : > { %7750 = vmatpush1.bf16.msra.mxu1 %v10237_v17 }
 0x5bf   : > { %7751 = vmatprep.subr.bf16.mxu1 %v10245_v11 }
 0x5c0   : > { %7797 = vmatpush1.bf16.msra.mxu0 %v10240_v22  ;;  %v10318_v22 = vld [vmem:[%s10999_s24 + $0x6e8] ss:$16 sps:$4 sm:$0xff]  }
 0x5c1   : > { %7798 = vmatprep.subr.bf16.mxu0 %v10248_v12  ;;  %v10323_v12 = vld [vmem:[%s10999_s24 + $0x6cc] ss:$16 sps:$4 sm:$0xff]  }
 0x5c2   : > { %7752 = vmatpush1.bf16.msra.mxu1 %v10243_v13  ;;  %v10321_v13 = vld [vmem:[%s10999_s24 + $0x6c8] ss:$16 sps:$4 sm:$0xff]  }
 0x5c3   : > { %7753 = vmatprep.subr.bf16.mxu1 %v10251_v14  ;;  %v10326_v14 = vld [vmem:[%s10999_s24 + $0x6ac] ss:$16 sps:$4 sm:$0xff]  }
 0x5c4   : > { %7799 = vmatpush1.bf16.msra.mxu0 %v10246_v15  ;;  %v10324_v15 = vld [vmem:[%s10999_s24 + $0x6a8] ss:$16 sps:$4 sm:$0xff]  }
 0x5c5   : > { %7800 = vmatprep.subr.bf16.mxu0 %v10254_v31  ;;  %v10329_v31 = vld [vmem:[%s10999_s24 + $0x68c] ss:$16 sps:$4 sm:$0xff]  }
 0x5c6   : > { %7754 = vmatpush1.bf16.msra.mxu1 %v10249_v29  ;;  %v10327_v29 = vld [vmem:[%s10999_s24 + $0x688] ss:$16 sps:$4 sm:$0xff]  }
 0x5c7   : > { %7755 = vmatprep.subr.bf16.mxu1 %v10257_v16  ;;  %v10330_v16 = vld [vmem:[%s10999_s24 + $0x668] ss:$16 sps:$4 sm:$0xff]  }
 0x5c8   : > { %7801 = vmatpush1.bf16.msra.mxu0 %v10252_v23  ;;  %v10333_v23 = vld [vmem:[%s10999_s24 + $0x648] ss:$16 sps:$4 sm:$0xff]  }
 0x5c9   : > { %7802 = vmatprep.subr.bf16.mxu0 %v10260_v19  ;;  %v10338_v19 = vld [vmem:[%s10999_s24 + $0x62c] ss:$16 sps:$4 sm:$0xff]  }
 0x5ca   : > { %7756 = vmatpush1.bf16.msra.mxu1 %v10255_v20  ;;  %v10336_v20 = vld [vmem:[%s10999_s24 + $0x628] ss:$16 sps:$4 sm:$0xff]  }
 0x5cb   : > { %7757 = vmatprep.subr.bf16.mxu1 %v10263_v21  ;;  %v10341_v21 = vld [vmem:[%s10999_s24 + $0x60c] ss:$16 sps:$4 sm:$0xff]  }
 0x5cc   : > { %7803 = vmatpush1.bf16.msra.mxu0 %v10258_v24  ;;  %v10339_v24 = vld [vmem:[%s10999_s24 + $0x608] ss:$16 sps:$4 sm:$0xff]  }
 0x5cd   : > { %7804 = vmatprep.subr.bf16.mxu0 %v10266_v25  ;;  %v10344_v25 = vld [vmem:[%s10999_s24 + $0x7ec] ss:$16 sps:$4 sm:$0xff]  }
 0x5ce   : > { %7758 = vmatpush1.bf16.msra.mxu1 %v10261_v26  ;;  %v10342_v26 = vld [vmem:[%s10999_s24 + $0x7e8] ss:$16 sps:$4 sm:$0xff]  }
 0x5cf   : > { %7759 = vmatprep.subr.bf16.mxu1 %v10269_v28  ;;  %v10347_v28 = vld [vmem:[%s10999_s24 + $0x7cc] ss:$16 sps:$4 sm:$0xff]  }
 0x5d0   : > { %7805 = vmatpush2.bf16.msra.mxu0 %v10264_v56  ;;  %v10345_v56 = vld [vmem:[%s10999_s24 + $0x7c8] ss:$16 sps:$4 sm:$0xff]  }
 0x5d1   : > { %7806 = vmatprep.subr.bf16.mxu0 %v10272_v30  ;;  %v10350_v30 = vld [vmem:[%s10999_s24 + $0x7ac] ss:$16 sps:$4 sm:$0xff]  }
 0x5d2   : > { %7760 = vmatpush1.bf16.msra.mxu1 %v10267_v32  ;;  %v10348_v32 = vld [vmem:[%s10999_s24 + $0x7a8] ss:$16 sps:$4 sm:$0xff]  }
 0x5d3   : > { %7761 = vmatprep.subr.bf16.mxu1 %v10275_v33  ;;  %v10353_v33 = vld [vmem:[%s10999_s24 + $0x78c] ss:$16 sps:$4 sm:$0xff]  }
 0x5d4   : > { %7807 = vmatpush2.bf16.msra.mxu0 %v10270_v34  ;;  %v10351_v34 = vld [vmem:[%s10999_s24 + $0x788] ss:$16 sps:$4 sm:$0xff]  }
 0x5d5   : > { %7808 = vmatprep.subr.bf16.mxu0 %v10278_v52  ;;  %v10356_v52 = vld [vmem:[%s10999_s24 + $0x76c] ss:$16 sps:$4 sm:$0xff]  }
 0x5d6   : > { %7762 = vmatpush1.bf16.msra.mxu1 %v10273_v35  ;;  %v10354_v35 = vld [vmem:[%s10999_s24 + $0x768] ss:$16 sps:$4 sm:$0xff]  }
 0x5d7   : > { %7763 = vmatprep.subr.bf16.mxu1 %v10281_v5  ;;  %v10359_v5 = vld [vmem:[%s10999_s24 + $0x74c] ss:$16 sps:$4 sm:$0xff]  }
 0x5d8   : > { %7809 = vmatpush2.bf16.msra.mxu0 %v10276_v39  ;;  %v10357_v39 = vld [vmem:[%s10999_s24 + $0x748] ss:$16 sps:$4 sm:$0xff]  }
 0x5d9   : > { %7810 = vmatprep.subr.bf16.mxu0 %v10284_v63  ;;  %v10362_v63 = vld [vmem:[%s10999_s24 + $0x72c] ss:$16 sps:$4 sm:$0xff]  }
 0x5da   : > { %7764 = vmatpush2.bf16.msra.mxu1 %v10279_v40  ;;  %v10360_v40 = vld [vmem:[%s10999_s24 + $0x728] ss:$16 sps:$4 sm:$0xff]  }
 0x5db   : > { %7765 = vmatprep.subr.bf16.mxu1 %v10287_v41 }
 0x5dc   : > { %7811 = vmatpush2.bf16.msra.mxu0 %v10282_v2  ;;  %v10365_v2 = vld [vmem:[%s10999_s24 + $0x70c] ss:$16 sps:$4 sm:$0xff]  }
 0x5dd   : > { %7812 = vmatprep.subr.bf16.mxu0 %v10290_v43 }
 0x5de   : > { %7766 = vmatpush2.bf16.msra.mxu1 %v10285_v3 }
 0x5df   : > { %7767 = vmatprep.subr.bf16.mxu1 %v10293_v36 }
 0x5e0   : > { %7813 = vmatpush2.bf16.msra.mxu0 %v10288_v45  ;;  %v10363_v45 = vld [vmem:[%s10999_s24 + $0x708] ss:$16 sps:$4 sm:$0xff]  }
 0x5e1   : > { %7814 = vmatprep.subr.bf16.mxu0 %v10296_v46 }
 0x5e2   : > { %7768 = vmatpush2.bf16.msra.mxu1 %v10291_v48 }
 0x5e3   : > { %7769 = vmatprep.subr.bf16.mxu1 %v10299_v61 }
 0x5e4   : > { %7815 = vmatpush2.bf16.msra.mxu0 %v10294_v53 }
 0x5e5   : > { %7816 = vmatprep.subr.bf16.mxu0 %v10302_v55 }
 0x5e6   : > { %7770 = vmatpush2.bf16.msra.mxu1 %v10297_v27 }
 0x5e7   : > { %7771 = vmatprep.subr.bf16.mxu1 %v10305_v59  ;;  %v5994_v59 = vld [vmem:[#allocation2 + $0x10] sm:$0xff] }
 0x5e8   : > { %7817 = vmatpush2.bf16.msra.mxu0 %v10300_v18 }
 0x5e9   : > { %7818 = vmatprep.subr.bf16.mxu0 %v10308_v47 }
 0x5ea   : > { %7772 = vmatpush2.bf16.msra.mxu1 %v10303_v62  ;;  %v5995_v62 = vld [vmem:[#allocation2] sm:$0xff] }
 0x5eb   : > { %7773 = vmatprep.subr.bf16.mxu1 %v10311_v60 }
 0x5ec   : > { %7819 = vmatpush2.bf16.msra.mxu0 %v10306_v37 }
 0x5ee   : > { %7774 = vmatpush2.bf16.msra.mxu1 %v10309_v0 }
 0x5ef   : > { %v7576_v44 = vpop.f32.mrf.mxu0  ;;  %7821 = vmatmul.mubr.bf16.vlgmr.msra.gmra.mxu0 %v11836_v57  ;;  %7775 = vmatprep.subr.bf16.mxu1 %v10314_v50 }
 0x5f1   : > { %v7617_v1 = vpop.f32.mrf.mxu1  ;;  %v7578_v8 = vpop.f32.mrf.mxu0 }
 0x5f2   : > { %v11951_v4 = vadd.f32 %v7617_v1, %v7576_v44  ;;  %7776 = vmatpush2.bf16.msra.mxu1 %v10312_v38 }
 0x5f3   : > { %v7619_v7 = vpop.f32.mrf.mxu1  ;;  %v7580_v58 = vpop.f32.mrf.mxu0  ;;  %7777 = vmatprep.subr.bf16.mxu1 %v10317_v49 }
 0x5f4   : > { %v11954_v51 = vadd.f32 %v7619_v7, %v7578_v8 }
 0x5f5   : > { %v7621_v57 = vpop.f32.mrf.mxu1  ;;  %v7581_v17 = vpop.f32.mrf.mxu0 }
 0x5f6   : > { %7778 = vmatpush2.bf16.msra.mxu1 %v10315_v42  ;;  %v5996_v17 = vld [vmem:[#allocation2 + $0x18] sm:$0xff] }
 0x5f7   : > { %v7622_v11 = vpop.f32.mrf.mxu1  ;;  %7829 = vmatprep.subr.bf16.mxu1 %v10320_v10 }
 0x5f9   : > { %7780 = vmatmul.mubr.bf16.vlgmr.msra.gmra.mxu1 %v11758_v54  ;;  %v10332_v54 = vld [vmem:[%s10999_s24 + $0x66c] ss:$16 sps:$4 sm:$0xff]  }
 0x5fa   : > { %7830 = vmatpush1.bf16.msra.mxu1 %v10318_v22  ;;  %7861 = vmatprep.mubr.bf16.mxu1 %v11888_v6  ;;  %v10335_v6 = vld [vmem:[%s10999_s24 + $0x64c] ss:$16 sps:$4 sm:$0xff]  }
 0x5fb   : > { %7831 = vmatprep.subr.bf16.mxu1 %v10323_v12 }
 0x5fe   : > { %7832 = vmatpush1.bf16.msra.mxu1 %v10321_v13  ;;  %v5997_v13 = vld [vmem:[#allocation2 + $0x8] sm:$0xff] }
 0x5ff   : > { %7833 = vmatprep.subr.bf16.mxu1 %v10326_v14 }
 0x602   : > { %7834 = vmatpush1.bf16.msra.mxu1 %v10324_v15 }
 0x603   : > { %7835 = vmatprep.subr.bf16.mxu1 %v10329_v31 }
 0x606   : > { %7836 = vmatpush1.bf16.msra.mxu1 %v10327_v29 }
 0x607   : > { %7837 = vmatprep.subr.bf16.mxu1 %v10332_v54 }
 0x60a   : > { %7838 = vmatpush1.bf16.msra.mxu1 %v10330_v16 }
 0x60b   : > { %7839 = vmatprep.subr.bf16.mxu1 %v10335_v6 }
 0x60e   : > { %7840 = vmatpush1.bf16.msra.mxu1 %v10333_v23 }
 0x60f   : > { %7841 = vmatprep.subr.bf16.mxu1 %v10338_v19 }
 0x612   : > { %7842 = vmatpush1.bf16.msra.mxu1 %v10336_v20 }
 0x613   : > { %7843 = vmatprep.subr.bf16.mxu1 %v10341_v21 }
 0x616   : > { %7844 = vmatpush1.bf16.msra.mxu1 %v10339_v24 }
 0x617   : > { %7845 = vmatprep.subr.bf16.mxu1 %v10344_v25 }
 0x61a   : > { %7846 = vmatpush2.bf16.msra.mxu1 %v10342_v26 }
 0x61b   : > { %7847 = vmatprep.subr.bf16.mxu1 %v10347_v28 }
 0x61e   : > { %7848 = vmatpush2.bf16.msra.mxu1 %v10345_v56 }
 0x61f   : > { %7849 = vmatprep.subr.bf16.mxu1 %v10350_v30 }
 0x622   : > { %7850 = vmatpush2.bf16.msra.mxu1 %v10348_v32 }
 0x623   : > { %7851 = vmatprep.subr.bf16.mxu1 %v10353_v33 }
 0x626   : > { %7852 = vmatpush2.bf16.msra.mxu1 %v10351_v34 }
 0x627   : > { %7853 = vmatprep.subr.bf16.mxu1 %v10356_v52 }
 0x62a   : > { %7854 = vmatpush2.bf16.msra.mxu1 %v10354_v35 }
 0x62b   : > { %7855 = vmatprep.subr.bf16.mxu1 %v10359_v5 }
 0x62e   : > { %7856 = vmatpush2.bf16.msra.mxu1 %v10357_v39 }
 0x62f   : > { %v7658_v41 = vpop.f32.mrf.mxu0  ;;  %7857 = vmatprep.subr.bf16.mxu1 %v10362_v63 }
 0x630   : > { %v7659_v43 = vadd.f32 %v7658_v41, %v11951_v4 }
 0x631   : > { %v7660_v3 = vpop.f32.mrf.mxu0 }
 0x632   : > { %v7661_v36 = vadd.f32 %v7660_v3, %v11954_v51  ;;  %7858 = vmatpush2.bf16.msra.mxu1 %v10360_v40 }
 0x633   : > { %v7662_v46 = vpop.f32.mrf.mxu0  ;;  %7859 = vmatprep.subr.bf16.mxu1 %v10365_v2 }
 0x635   : > { %v7663_v48 = vpop.f32.mrf.mxu0 }
 0x636   : > { %7860 = vmatpush2.bf16.msra.mxu1 %v10363_v45 }
 0x639   : > { %7862 = vmatmul.mubr.bf16.vlgmr.msra.gmra.mxu1 %v11891_v9 }
 0x66f   : > { %v7740_v61 = vpop.f32.mrf.mxu0 }
 0x671   : > { %v7742_v53 = vpop.f32.mrf.mxu0 }
 0x673   : > { %v7744_v55 = vpop.f32.mrf.mxu0 }
 0x675   : > { %v7745_v27 = vpop.f32.mrf.mxu0 }
 0x679   : > { %v7699_v18 = vpop.f32.mrf.mxu1 }
 0x67a   : > { %v7700_v47 = vadd.f32 %v7699_v18, %v7659_v43 }
 0x67b   : > { %v7701_v60 = vpop.f32.mrf.mxu1 }
 0x67c   : > { %v7870_v37 = vadd.f32 %v7700_v47, %v5994_v59  ;;  %v7702_v0 = vadd.f32 %v7701_v60, %v7661_v36 }
 0x67d   : > { %v7703_v50 = vpop.f32.mrf.mxu1 }
 0x67e   : > { %7874 = vst [vmem:[#allocation2 + $0x10] sm:$0xff] %v7870_v37  ;;  %v7871_v38 = vadd.f32 %v7702_v0, %v5995_v62 }
 0x67f   : > { %v7704_v44 = vpop.f32.mrf.mxu1 }
 0x680   : > { %7875 = vst [vmem:[#allocation2] sm:$0xff] %v7871_v38 }
 0x6af   : > { %v7822_v49 = vpop.f32.mrf.mxu0 }
 0x6b1   : > { %v7824_v1 = vpop.f32.mrf.mxu0 }
 0x6b3   : > { %v7826_v4 = vpop.f32.mrf.mxu0 }
 0x6b5   : > { %v7827_v9 = vpop.f32.mrf.mxu0 }
 0x6b9   : > { %v7781_v8 = vpop.f32.mrf.mxu1 }
 0x6ba   : > { %v7782_v58 = vadd.f32 %v7781_v8, %v7740_v61 }
 0x6bb   : > { %v7783_v7 = vpop.f32.mrf.mxu1 }
 0x6bc   : > { %v7784_v10 = vadd.f32 %v7783_v7, %v7742_v53  ;;  %v7823_v57 = vadd.f32 %v7822_v49, %v7782_v58 }
 0x6bd   : > { %v7785_v42 = vpop.f32.mrf.mxu1 }
 0x6be   : > { %v7825_v12 = vadd.f32 %v7824_v1, %v7784_v10 }
 0x6bf   : > { %v7786_v51 = vpop.f32.mrf.mxu1 }
 0x6f9   : > { %v7863_v11 = vpop.f32.mrf.mxu1 }
 0x6fa   : > { %v7864_v22 = vadd.f32 %v7863_v11, %v7823_v57 }
 0x6fb   : > { %v7865_v14 = vpop.f32.mrf.mxu1 }
 0x6fc   : > { %v7872_v15 = vadd.f32 %v7864_v22, %v5996_v17  ;;  %v7866_v31 = vadd.f32 %v7865_v14, %v7825_v12  ;;  %7881 = sbr.rel (%p9443_p10) target bundleno = 2029 (0x7ed), region = 108 }
 0x6fd   : > { %v7867_v29 = vpop.f32.mrf.mxu1 }
 0x6fe   : > { %7876 = vst [vmem:[#allocation2 + $0x18] sm:$0xff] %v7872_v15  ;;  %v7873_v54 = vadd.f32 %v7866_v31, %v5997_v13 }
 0x6ff   : > { %v7868_v16 = vpop.f32.mrf.mxu1 }
 0x700   : > { %7877 = vst [vmem:[#allocation2 + $0x8] sm:$0xff] %v7873_v54 }
 0x701   : > { %v10366_v6 = vld [vmem:[#allocation14 + $0x78] sm:$0xff]   ;;  %v10370_v21 = vld [vmem:[#allocation14 + $0x70] sm:$0xff]   ;;  %v10374_v28 = vld [vmem:[#allocation14 + $0x68] sm:$0xff]   ;;  %v7892_v2 = vlaneseq }
 0x702   : > { %v10367_v23 = vld [vmem:[#allocation14 + $0xf8] sm:$0xff]   ;;  %9482 = vmatprep.subr.bf16.mxu0 %v10366_v6  ;;  %v10371_v24 = vld [vmem:[#allocation14 + $0xf0] sm:$0xff]   ;;  %v10375_v56 = vld [vmem:[#allocation14 + $0xe8] sm:$0xff]  }
 0x703   : > { %v10368_v19 = vld [vmem:[#allocation14 + $0x38] sm:$0xff]   ;;  %9504 = vmatprep.subr.bf16.mxu1 %v10367_v23  ;;  %v10372_v25 = vld [vmem:[#allocation14 + $0x30] sm:$0xff]   ;;  %v10376_v30 = vld [vmem:[#allocation14 + $0x28] sm:$0xff]   ;;  %v7893_v46 = vshrl.u32 %v7892_v2, 7 }
 0x704   : > { %v10369_v20 = vld [vmem:[#allocation14 + $0xb8] sm:$0xff]   ;;  %9483 = vmatpush3.bf16.msra.mxu0 %v10368_v19  ;;  %v10373_v26 = vld [vmem:[#allocation14 + $0xb0] sm:$0xff]   ;;  %v10377_v32 = vld [vmem:[#allocation14 + $0xa8] sm:$0xff]  }
 0x705   : > { %9505 = vmatpush3.bf16.msra.mxu1 %v10369_v20  ;;  %9484 = vmatprep.subr.bf16.mxu0 %v10370_v21  ;;  %v10378_v33 = vld [vmem:[#allocation14 + $0x60] sm:$0xff]   ;;  %v10382_v5 = vld [vmem:[#allocation14 + $0x58] sm:$0xff]   ;;  %v10386_v41 = vld [vmem:[#allocation14 + $0x50] sm:$0xff]   ;;  %v7898_v27 = vsub.s32 1, %v7893_v46  ;;  %v7906_v18 = vsub.s32 3, %v7893_v46  ;;  %v7894_v62 = vsub.s32 0, %v7893_v46 }
 0x706   : > { %9506 = vmatprep.subr.bf16.mxu1 %v10371_v24  ;;  %v10379_v34 = vld [vmem:[#allocation14 + $0xe0] sm:$0xff]   ;;  %v10383_v39 = vld [vmem:[#allocation14 + $0xd8] sm:$0xff]   ;;  %v10387_v43 = vld [vmem:[#allocation14 + $0xd0] sm:$0xff]   ;;  %v7902_v37 = vsub.s32 2, %v7893_v46 }
 0x707   : > { %v10380_v52 = vld [vmem:[#allocation14 + $0x20] sm:$0xff]   ;;  %v10384_v63 = vld [vmem:[#allocation14 + $0x18] sm:$0xff]   ;;  %v10388_v3 = vld [vmem:[#allocation14 + $0x10] sm:$0xff]  }
 0x708   : > { %9485 = vmatpush3.bf16.msra.mxu0 %v10372_v25  ;;  %v10381_v35 = vld [vmem:[#allocation14 + $0xa0] sm:$0xff]   ;;  %v10385_v40 = vld [vmem:[#allocation14 + $0x98] sm:$0xff]   ;;  %v10389_v36 = vld [vmem:[#allocation14 + $0x90] sm:$0xff]  }
 0x709   : > { %9507 = vmatpush3.bf16.msra.mxu1 %v10373_v26  ;;  %9486 = vmatprep.subr.bf16.mxu0 %v10374_v28  ;;  %v10390_v45 = vld [vmem:[#allocation14 + $0x48] sm:$0xff]   ;;  %v10394_v55 = vld [vmem:[#allocation14 + $0x40] sm:$0xff]   ;;  %v7883_v0 = vld [vmem:[#allocation2] sm:$0xff] }
 0x70a   : > { %9508 = vmatprep.subr.bf16.mxu1 %v10375_v56  ;;  %v10391_v48 = vld [vmem:[#allocation14 + $0xc8] sm:$0xff]   ;;  %v10395_v59 = vld [vmem:[#allocation14 + $0xc0] sm:$0xff]   ;;  %v7890_v50 = vld [vmem:[#allocation11] sm:$0xf]  ;;  %v7887_v44 = vmax.f32 %v7883_v0, 0.0 }
 0x70b   : > { %v10392_v61 = vld [vmem:[#allocation14 + $0x8] sm:$0xff]   ;;  %v10396_v47 = vld [vmem:[#allocation14] sm:$0xff]   ;;  %v7916_v38 = vld [vmem:[#allocation13] sm:$0xf]  ;;  %v7899_v49 = vrot.slane %v7890_v50, %v7898_v27  ;;  %v7907_v9 = vrot.slane %v7890_v50, %v7906_v18  ;;  %v7895_v10 = vrot.slane %v7890_v50, %v7894_v62  ;;  %v7903_v22 = vrot.slane %v7890_v50, %v7902_v37 }
 0x70c   : > { %9487 = vmatpush3.bf16.msra.mxu0 %v10376_v30  ;;  %v10393_v53 = vld [vmem:[#allocation14 + $0x88] sm:$0xff]   ;;  %v10397_v60 = vld [vmem:[#allocation14 + $0x80] sm:$0xff]   ;;  %v7925_v1 = vrot.slane %v7916_v38, %v7898_v27  ;;  %v7933_v51 = vrot.slane %v7916_v38, %v7906_v18  ;;  %v7921_v17 = vrot.slane %v7916_v38, %v7894_v62  ;;  %v7929_v14 = vrot.slane %v7916_v38, %v7902_v37 }
 0x70d   : > { %9509 = vmatpush3.bf16.msra.mxu1 %v10377_v32  ;;  %9488 = vmatprep.subr.bf16.mxu0 %v10378_v33  ;;  %v7885_v4 = vld [vmem:[#allocation2 + $0x8] sm:$0xff]  ;;  %v7882_v8 = vld [vmem:[#allocation2 + $0x10] sm:$0xff]  ;;  %v7884_v7 = vld [vmem:[#allocation2 + $0x18] sm:$0xff]  ;;  %v7913_v57 = vmul.f32 %v7899_v49, %v7887_v44 }
 0x70e   : > { %9510 = vmatprep.subr.bf16.mxu1 %v10379_v34  ;;  %v7889_v42 = vmax.f32 %v7885_v4, 0.0  ;;  %v7886_v58 = vmax.f32 %v7882_v8, 0.0  ;;  %v7888_v11 = vmax.f32 %v7884_v7, 0.0  ;;  %v9444_v25 = vld [vmem:[#allocation16] ss:$0 sm:$0xff] }
 0x70f   : > { %v7939_v15 = vadd.f32 %v7925_v1, %v7913_v57 }
 0x710   : > { %9489 = vmatpush3.bf16.msra.mxu0 %v10380_v52  ;;  %v7915_v12 = vmul.f32 %v7907_v9, %v7889_v42  ;;  %v7912_v13 = vmul.f32 %v7895_v10, %v7886_v58  ;;  %v7914_v31 = vmul.f32 %v7903_v22, %v7888_v11 }
 0x711   : > { %9511 = vmatpush3.bf16.msra.mxu1 %v10381_v35  ;;  %9490 = vmatprep.subr.bf16.mxu0 %v10382_v5  ;;  %v7943_v16 = vpack.c.bf16 %v7939_v15, %v7939_v15 }
 0x712   : > { %9512 = vmatprep.subr.bf16.mxu1 %v10383_v39  ;;  %v7941_v29 = vadd.f32 %v7933_v51, %v7915_v12  ;;  %v7938_v54 = vadd.f32 %v7921_v17, %v7912_v13  ;;  %v7940_v6 = vadd.f32 %v7929_v14, %v7914_v31 }
 0x713   : > { %8241 = vmatprep.mubr.bf16.mxu0 %v7943_v16 }
 0x714   : > { %9491 = vmatpush3.bf16.msra.mxu0 %v10384_v63  ;;  %v7945_v23 = vpack.c.bf16 %v7941_v29, %v7941_v29  ;;  %v7942_v19 = vpack.c.bf16 %v7938_v54, %v7938_v54  ;;  %v7944_v20 = vpack.c.bf16 %v7940_v6, %v7940_v6 }
 0x715   : > { %9513 = vmatpush3.bf16.msra.mxu1 %v10385_v40  ;;  %9492 = vmatprep.subr.bf16.mxu0 %v10386_v41 }
 0x716   : > { %9514 = vmatprep.subr.bf16.mxu1 %v10387_v43  ;;  %8281 = vmatprep.mubr.bf16.mxu1 %v7945_v23 }
 0x718   : > { %9493 = vmatpush3.bf16.msra.mxu0 %v10388_v3 }
 0x719   : > { %9515 = vmatpush3.bf16.msra.mxu1 %v10389_v36  ;;  %9494 = vmatprep.subr.bf16.mxu0 %v10390_v45 }
 0x71a   : > { %9516 = vmatprep.subr.bf16.mxu1 %v10391_v48 }
 0x71c   : > { %9495 = vmatpush3.bf16.msra.mxu0 %v10392_v61 }
 0x71d   : > { %9517 = vmatpush3.bf16.msra.mxu1 %v10393_v53  ;;  %9496 = vmatprep.subr.bf16.mxu0 %v10394_v55 }
 0x71e   : > { %9518 = vmatprep.subr.bf16.mxu1 %v10395_v59 }
 0x720   : > { %9497 = vmatpush3.bf16.msra.mxu0 %v10396_v47 }
 0x721   : > { %9519 = vmatpush3.bf16.msra.mxu1 %v10397_v60 }
 0x723   : > { %8242 = vmatmul.mubr.bf16.vlgmr.msra.gmra.mxu0 %v7942_v19 }
 0x724   : > { %8282 = vmatmul.mubr.bf16.vlgmr.msra.gmra.mxu1 %v7944_v20 }
 0x7e3   : > { %v9498_v21 = vpop.f32.mrf.mxu0 }
 0x7e4   : > { %v9520_v24 = vpop.f32.mrf.mxu1 }
 0x7e5   : > { %v9499_v26 = vpop.f32.mrf.mxu0 }
 0x7e6   : > { %v9500_v28 = vadd.f32 %v9499_v26, %v9498_v21  ;;  %v9521_v56 = vpop.f32.mrf.mxu1 }
 0x7e7   : > { %v9501_v30 = vpop.f32.mrf.mxu0  ;;  %v9522_v33 = vadd.f32 %v9521_v56, %v9520_v24 }
 0x7e8   : > { %v8244_v32 = vadd.f32 %v9500_v28, %v9444_v25  ;;  %v9523_v34 = vpop.f32.mrf.mxu1 }
 0x7e9   : > { %v9502_v52 = vpop.f32.mrf.mxu0 }
 0x7ea   : > { %v8284_v35 = vadd.f32 %v9522_v33, %v8244_v32  ;;  %v9524_v5 = vpop.f32.mrf.mxu1 }
 0x7ec   : > { %8289 = vst [vmem:[%s12021_s11] sm:$0xff] %v8284_v35 }
 0x7ed PF: > { %p27_p7 = scmp.ge.s32.totalorder %s10879_s27, 4   ;;  %s12062_s17 = smov %s10686_s18 }
 0x7ee   : > { %s12063_s18 = smov %s10690_s19  ;;  %s12064_s19 = smov %s10890_s25 }
 0x7ef   : > { %s12065_s20 = smov %s10879_s27  ;;  %29 = sbr.rel (!%p27_p7) target bundleno = 15 (0xf), region = 150 }
 0x7f4   :  { %8301 = vsyncpa [#allocation4], 1 }
 0x7f5   :  { %8303 = vsyncpa [#allocation4 + $0x1], 1 }
 0x7f6   :  { %8304 = vsyncpa [#allocation6], 1 }
 0x7f7   :  { %8306 = vsyncpa [#allocation6 + $0x1], 1 }
 0x7f8   :  { %8307 = vsyncpa [#allocation9], 1 }
 0x7f9   :  { %8309 = vsyncpa [#allocation9 + $0x1], 1 }
 0x7fa   :  { %8310 = vsyncpa [#allocation12], 1 }
 0x7fb   :  { %8311 = vsyncpa [#allocation15], 1 }

</bundles_post_ra>
